<compile_context>
chip_gen: v6e
topology: v6e:2x2x1
jax: 0.10.0
libtpu: 0.0.40
codegen_flags: <defaults>
</compile_context>

<pallas_src>
import functools

import jax
import jax.numpy as jnp
from jax import lax
from jax.experimental import pallas as pl
from jax.experimental.pallas import tpu as pltpu


# ----------------------------------------------------------------------------
# pyramid_roi_align (CropAndResizeFunction) -- data-dependent bilinear gather,
# implemented as plain-JAX glue.
# TODO(synk): a Pallas version would need manual per-box/level DMA gather.
# ----------------------------------------------------------------------------
def _crop_and_resize(fmap, boxes, crop_h, crop_w, extrapolation_value=0.0):
    # fmap: [C, H, W]; boxes: [Nb, 4] normalized (y1, x1, y2, x2)
    C, H, W = fmap.shape
    Nb = boxes.shape[0]
    y1, x1, y2, x2 = boxes[:, 0], boxes[:, 1], boxes[:, 2], boxes[:, 3]

    if crop_h > 1:
        hscale = (y2 - y1) * (H - 1) / (crop_h - 1)
        ys = y1[:, None] * (H - 1) + jnp.arange(crop_h, dtype=fmap.dtype)[None, :] * hscale[:, None]
    else:
        ys = jnp.broadcast_to(0.5 * (y1 + y2)[:, None] * (H - 1), (Nb, crop_h))
    if crop_w > 1:
        wscale = (x2 - x1) * (W - 1) / (crop_w - 1)
        xs = x1[:, None] * (W - 1) + jnp.arange(crop_w, dtype=fmap.dtype)[None, :] * wscale[:, None]
    else:
        xs = jnp.broadcast_to(0.5 * (x1 + x2)[:, None] * (W - 1), (Nb, crop_w))

    valid_y = (ys >= 0) & (ys <= H - 1)      # [Nb, ph]
    valid_x = (xs >= 0) & (xs <= W - 1)      # [Nb, pw]

    y_top, y_bot = jnp.floor(ys), jnp.ceil(ys)
    x_lft, x_rgt = jnp.floor(xs), jnp.ceil(xs)
    y_lerp = ys - y_top
    x_lerp = xs - x_lft

    yt = jnp.clip(y_top, 0, H - 1).astype(jnp.int32)
    yb = jnp.clip(y_bot, 0, H - 1).astype(jnp.int32)
    xl = jnp.clip(x_lft, 0, W - 1).astype(jnp.int32)
    xr = jnp.clip(x_rgt, 0, W - 1).astype(jnp.int32)

    def gather(yi, xi):
        g = fmap[:, yi[:, :, None], xi[:, None, :]]      # [C, Nb, ph, pw]
        return jnp.transpose(g, (1, 0, 2, 3))            # [Nb, C, ph, pw]

    tl, tr = gather(yt, xl), gather(yt, xr)
    bl, br = gather(yb, xl), gather(yb, xr)
    xl_ = x_lerp[:, None, None, :]
    yl_ = y_lerp[:, None, :, None]
    top = tl + (tr - tl) * xl_
    bot = bl + (br - bl) * xl_
    val = top + (bot - top) * yl_
    mask = valid_y[:, None, :, None] & valid_x[:, None, None, :]
    return jnp.where(mask, val, jnp.asarray(extrapolation_value, fmap.dtype))


def pyramid_roi_align(boxes, feature_maps, pool_size, image_shape):
    # boxes: [Nb, 4] normalized; feature_maps: list of [C, H, W] (P2..P5)
    y1, x1, y2, x2 = boxes[:, 0], boxes[:, 1], boxes[:, 2], boxes[:, 3]
    h = y2 - y1
    w = x2 - x1
    image_area = float(image_shape[0] * image_shape[1])
    roi_level = 4.0 + jnp.log2(jnp.sqrt(h * w) / (224.0 / jnp.sqrt(jnp.float32(image_area))))
    roi_level = jnp.clip(jnp.round(roi_level).astype(jnp.int32), 2, 5)

    Nb = boxes.shape[0]
    C = feature_maps[0].shape[0]
    pooled = jnp.zeros((Nb, C, pool_size, pool_size), jnp.float32)
    # NOTE: computes all 4 levels and where-selects (4x redundant gather work,
    # outside the Pallas kernel); fine for the head-sized workloads here.
    for i, level in enumerate(range(2, 6)):
        crops = _crop_and_resize(feature_maps[i], boxes, pool_size, pool_size)
        pooled = jnp.where((roi_level == level)[:, None, None, None], crops, pooled)
    return pooled


# ----------------------------------------------------------------------------
# Tiling helpers (shared by prepare_head_params and classifier_head so the
# one-time w1 padding matches the kernel's K tiles exactly).
# ----------------------------------------------------------------------------
def _round_up(v, m):
    return ((v + m - 1) // m) * m


def _choose_k_tiling(K, max_tk):
    """K-tile that divides the padded K exactly (tk multiple of 128)."""
    K128 = _round_up(K, 128)
    num_k = pl.cdiv(K128, max_tk)
    tk = _round_up(pl.cdiv(K128, num_k), 128)
    return tk * num_k, tk, num_k            # (Kp, tk, num_k)


def _choose_n_tiling(N, max_tile_n):
    """Box-axis tile: multiple of 16 (bf16 sublane packing)."""
    Np = _round_up(N, 16)
    if Np <= max_tile_n:
        return Np, Np                       # single i-tile (v5e/v6e default)
    tile_n = _round_up(max_tile_n, 16)
    return _round_up(Np, tile_n), tile_n


# ----------------------------------------------------------------------------
# Pallas kernel: conv1(+BN1)+relu -> conv2(+BN2)+relu -> fused class/bbox head
# + masked softmax.  conv1 is K-tiled (reduction grid axis) into an f32
# accumulator; everything else runs in the last-k epilogue.
# ----------------------------------------------------------------------------
def _head_kernel(x_ref, w1_ref, t1_ref, w2_ref, t2_ref, wo_ref, bo_ref,
                 fused_ref, probs_ref, acc_ref, *, num_classes):
    k = pl.program_id(1)

    @pl.when(k == 0)
    def _():
        acc_ref[...] = jnp.zeros_like(acc_ref)

    # conv1 (kernel == pool_size) as a K-tiled matmul; bf16 operands, f32 acc.
    acc_ref[...] += jnp.dot(x_ref[...], w1_ref[...],
                            preferred_element_type=jnp.float32)

    @pl.when(k == pl.num_programs(1) - 1)
    def _():
        # BN1 scale folded into w1; conv1 bias + BN1 shift folded into t1.
        h1 = jnp.maximum(acc_ref[...] + t1_ref[...], 0.0)
        # conv2 (1x1) + folded BN2 + relu
        h2 = jnp.dot(h1.astype(jnp.bfloat16), w2_ref[...],
                     preferred_element_type=jnp.float32) + t2_ref[...]
        h2 = jnp.maximum(h2, 0.0)
        # fused class/bbox head: one lane-dense matmul (logits | bbox | pad)
        fused = jnp.dot(h2.astype(jnp.bfloat16), wo_ref[...],
                        preferred_element_type=jnp.float32) + bo_ref[...]
        fused_ref[...] = fused
        # softmax over the first `num_classes` lanes only; EXACT reciprocal
        # (approx=True drifted sum(probs) past tolerance).
        lane = lax.broadcasted_iota(jnp.int32, fused.shape, 1)
        masked = jnp.where(lane < num_classes, fused, -jnp.inf)
        m = jnp.max(masked, axis=-1, keepdims=True)
        e = jnp.exp(masked - m)
        probs_ref[...] = e / jnp.sum(e, axis=-1, keepdims=True)


def classifier_head(x_flat, w1_p, t1, w2, t2, wo, bo, num_classes,
                    *, max_tk=2048, max_tile_n=1024):
    # max_tile_n: 1024 keeps the whole box axis in one tile on v5e/v6e (stream
    # w1 once). On v7x pass max_tile_n = round_up(N,16)//2 so the "parallel"
    # axis shards across the 2 TensorCores.
    N, K = x_flat.shape
    Kp_w, H = w1_p.shape
    cout_p = wo.shape[1]
    C = num_classes

    Kp, tk, num_k = _choose_k_tiling(K, max_tk)
    assert Kp == Kp_w, "w1 must be pre-padded with the same max_tk (prepare_head_params)"
    Np, tile_n = _choose_n_tiling(N, max_tile_n)

    # zero padding is an exact no-op for the matmuls (fused jnp.pad, bf16)
    x_p = jnp.pad(x_flat.astype(jnp.bfloat16), ((0, Np - N), (0, Kp - K)))

    # explicit VMEM budget: streamed tiles (double-buffered), invariant weights
    # (single-buffered), accumulator, epilogue temporaries, outputs.
    bf, f32 = 2, 4
    vmem_bytes = (
        2 * tile_n * tk * bf              # x tiles (double-buffered)
        + 2 * tk * H * bf                 # w1 tiles (double-buffered)
        + H * H * bf                      # w2 (grid-invariant, single buffer)
        + H * cout_p * bf                 # fused head weight (single buffer)
        + 2 * H * f32 + cout_p * f32      # t1, t2, bo
        + tile_n * H * f32                # conv1 accumulator scratch
        + 4 * tile_n * H * f32            # epilogue temporaries (h1/h2 f32+bf16)
        + 4 * tile_n * cout_p * f32       # two f32 outputs (double-buffered)
    )
    vmem_limit = int(min(max(vmem_bytes * 1.25 + (4 << 20), 16 << 20), 48 << 20))

    invariant = pl.Buffered(1)            # constant index_map -> single buffer
    kernel = functools.partial(_head_kernel, num_classes=C)
    fused, probs = pl.pallas_call(
        kernel,
        grid=(Np // tile_n, num_k),
        in_specs=[
            pl.BlockSpec((tile_n, tk), lambda i, k: (i, k)),                        # x
            pl.BlockSpec((tk, H), lambda i, k: (k, 0)),                             # w1 (scaled)
            pl.BlockSpec((1, H), lambda i, k: (0, 0), pipeline_mode=invariant),     # t1
            pl.BlockSpec((H, H), lambda i, k: (0, 0), pipeline_mode=invariant),     # w2 (scaled)
            pl.BlockSpec((1, H), lambda i, k: (0, 0), pipeline_mode=invariant),     # t2
            pl.BlockSpec((H, cout_p), lambda i, k: (0, 0), pipeline_mode=invariant),# fused head W
            pl.BlockSpec((1, cout_p), lambda i, k: (0, 0), pipeline_mode=invariant),# fused head b
        ],
        out_specs=(
            pl.BlockSpec((tile_n, cout_p), lambda i, k: (i, 0)),
            pl.BlockSpec((tile_n, cout_p), lambda i, k: (i, 0)),
        ),
        out_shape=(
            jax.ShapeDtypeStruct((Np, cout_p), jnp.float32),
            jax.ShapeDtypeStruct((Np, cout_p), jnp.float32),
        ),
        scratch_shapes=[pltpu.VMEM((tile_n, H), jnp.float32)],
        compiler_params=pltpu.CompilerParams(
            dimension_semantics=("parallel", "arbitrary"),
            vmem_limit_bytes=vmem_limit),
    )(x_p, w1_p, t1, w2, t2, wo, bo)

    logits = fused[:N, :C]
    bbox = fused[:N, C:5 * C]
    probs_out = probs[:N, :C]
    return logits, probs_out, bbox


# ----------------------------------------------------------------------------
# Classifier module (JAX)
# ----------------------------------------------------------------------------
def make_classifier_params(key, depth, pool_size, num_classes):
    ks = jax.random.split(key, 12)
    p = {}
    p["conv1_w"] = jax.random.normal(ks[0], (1024, depth, pool_size, pool_size), jnp.float32) * 0.02
    p["conv1_b"] = jax.random.normal(ks[1], (1024,), jnp.float32) * 0.02
    p["bn1_gamma"] = 1.0 + 0.1 * jax.random.normal(ks[2], (1024,), jnp.float32)
    p["bn1_beta"] = 0.1 * jax.random.normal(ks[3], (1024,), jnp.float32)
    p["bn1_mean"] = 0.1 * jax.random.normal(ks[4], (1024,), jnp.float32)
    p["bn1_var"] = jnp.abs(jax.random.normal(ks[5], (1024,), jnp.float32)) * 0.1 + 0.5
    p["conv2_w"] = jax.random.normal(ks[6], (1024, 1024, 1, 1), jnp.float32) * 0.02
    p["conv2_b"] = jax.random.normal(ks[7], (1024,), jnp.float32) * 0.02
    p["bn2_gamma"] = 1.0 + 0.1 * jax.random.normal(ks[8], (1024,), jnp.float32)
    p["bn2_beta"] = 0.1 * jax.random.normal(ks[9], (1024,), jnp.float32)
    p["bn2_mean"] = 0.1 * jax.random.normal(ks[10], (1024,), jnp.float32)
    p["bn2_var"] = jnp.abs(jax.random.normal(ks[11], (1024,), jnp.float32)) * 0.1 + 0.5
    ks2 = jax.random.split(jax.random.fold_in(key, 777), 4)
    p["lin_class_w"] = jax.random.normal(ks2[0], (num_classes, 1024), jnp.float32) * 0.02
    p["lin_class_b"] = jax.random.normal(ks2[1], (num_classes,), jnp.float32) * 0.02
    p["lin_bbox_w"] = jax.random.normal(ks2[2], (num_classes * 4, 1024), jnp.float32) * 0.02
    p["lin_bbox_b"] = jax.random.normal(ks2[3], (num_classes * 4,), jnp.float32) * 0.02
    return p


def prepare_head_params(params, depth, pool_size, num_classes, eps=0.001, max_tk=2048):
    """One-time weight prep (outside the per-call forward): fold eval-mode BN +
    conv biases, pre-transpose to matmul layout, pad w1 to the exact K-tile
    boundary, fuse class/bbox heads into one lane-dense matmul, cast to bf16."""
    K = depth * pool_size * pool_size
    C = num_classes
    H = 1024
    Kp, _, _ = _choose_k_tiling(K, max_tk)

    s1 = params["bn1_gamma"] / jnp.sqrt(params["bn1_var"] + eps)
    t1 = (params["conv1_b"] - params["bn1_mean"]) * s1 + params["bn1_beta"]
    w1 = params["conv1_w"].reshape(H, K).T * s1[None, :]              # [K, H]
    # hoisted one-time pad + bf16 cast (was per-call before)
    w1_p = jnp.pad(w1.astype(jnp.bfloat16), ((0, Kp - K), (0, 0)))

    s2 = params["bn2_gamma"] / jnp.sqrt(params["bn2_var"] + eps)
    t2 = (params["conv2_b"] - params["bn2_mean"]) * s2 + params["bn2_beta"]
    w2 = (params["conv2_w"].reshape(H, H).T * s2[None, :]).astype(jnp.bfloat16)

    cout = 5 * C                                     # logits (C) + bbox (4C)
    cout_p = max(_round_up(cout, 128), 128)          # lane-dense output width
    wo = jnp.zeros((H, cout_p), jnp.float32)
    wo = wo.at[:, :C].set(params["lin_class_w"].T)
    wo = wo.at[:, C:cout].set(params["lin_bbox_w"].T)
    bo = jnp.zeros((cout_p,), jnp.float32)
    bo = bo.at[:C].set(params["lin_class_b"])
    bo = bo.at[C:cout].set(params["lin_bbox_b"])

    return {
        "w1": w1_p, "t1": t1[None, :].astype(jnp.float32),
        "w2": w2, "t2": t2[None, :].astype(jnp.float32),
        "wo": wo.astype(jnp.bfloat16), "bo": bo[None, :],
    }


def classifier_forward(x_list, rois, head_params, depth, pool_size,
                       image_shape, num_classes):
    boxes = rois[0]                              # squeeze batch dim -> [Nb, 4]
    fmaps = [f[0] for f in x_list]               # each [C, H, W]

    pooled = pyramid_roi_align(boxes, fmaps, pool_size, image_shape)   # [Nb, depth, ps, ps]
    K = depth * pool_size * pool_size
    x_flat = pooled.reshape(pooled.shape[0], K)

    logits, probs, bbox_flat = classifier_head(
        x_flat, head_params["w1"], head_params["t1"],
        head_params["w2"], head_params["t2"],
        head_params["wo"], head_params["bo"], num_classes)
    bbox = bbox_flat.reshape(bbox_flat.shape[0], -1, 4)
    return [logits, probs, bbox]


if __name__ == "__main__":
    depth = 4
    pool_size = 7
    image_shape = (128, 128, 3)
    num_classes = 8
    num_boxes = 6

    key = jax.random.PRNGKey(0)
    k_par, k_feat, k_box = jax.random.split(key, 3)

    params = make_classifier_params(k_par, depth, pool_size, num_classes)
    # one-time weight folding / padding / transposition / bf16 cast
    head_params = jax.tree_util.tree_map(
        jax.block_until_ready,
        prepare_head_params(params, depth, pool_size, num_classes))

    # feature pyramid P2..P5: [1, depth, H, W]
    fk = jax.random.split(k_feat, 4)
    x = [jax.random.normal(fk[i], (1, depth, s, s), jnp.float32)
         for i, s in enumerate((32, 16, 8, 4))]

    # rois: [1, num_boxes, (y1, x1, y2, x2)] normalized
    bk = jax.random.split(k_box, 4)
    y1 = jax.random.uniform(bk[0], (num_boxes,), minval=0.0, maxval=0.5)
    x1 = jax.random.uniform(bk[1], (num_boxes,), minval=0.0, maxval=0.5)
    hh = jax.random.uniform(bk[2], (num_boxes,), minval=0.1, maxval=0.5)
    ww = jax.random.uniform(bk[3], (num_boxes,), minval=0.1, maxval=0.5)
    rois = jnp.stack([y1, x1, jnp.minimum(y1 + hh, 1.0), jnp.minimum(x1 + ww, 1.0)], axis=1)[None]

    fwd = jax.jit(functools.partial(
        classifier_forward,
        depth=depth, pool_size=pool_size,
        image_shape=image_shape, num_classes=num_classes))
    logits, probs, bbox = fwd(x, rois, head_params)
    jax.block_until_ready((logits, probs, bbox))

    assert logits.shape == (num_boxes, num_classes)
    assert probs.shape == (num_boxes, num_classes)
    assert bbox.shape == (num_boxes, num_classes, 4)
    assert bool(jnp.all(jnp.isfinite(logits)))
    assert bool(jnp.all(jnp.isfinite(bbox)))
    assert bool(jnp.all(probs >= 0.0))
    assert bool(jnp.allclose(jnp.sum(probs, axis=-1), 1.0, atol=1e-3))
    print("KERNEL_OK")
</pallas_src>

<mosaic_0001>
module attributes {stable_mosaic.version = 11 : i64} {
  func.func @_head_kernel(%arg0: i32, %arg1: i32, %arg2: memref<16x256xbf16, #tpu.memory_space<vmem>>, %arg3: memref<256x1024xbf16, #tpu.memory_space<vmem>>, %arg4: memref<1x1024xf32, #tpu.memory_space<vmem>>, %arg5: memref<1024x1024xbf16, #tpu.memory_space<vmem>>, %arg6: memref<1x1024xf32, #tpu.memory_space<vmem>>, %arg7: memref<1024x128xbf16, #tpu.memory_space<vmem>>, %arg8: memref<1x128xf32, #tpu.memory_space<vmem>>, %arg9: memref<16x128xf32, #tpu.memory_space<vmem>>, %arg10: memref<16x128xf32, #tpu.memory_space<vmem>>, %arg11: memref<16x1024xf32, #tpu.memory_space<vmem>>) attributes {dimension_semantics = [#tpu.dimension_semantics<parallel>, #tpu.dimension_semantics<arbitrary>], iteration_bounds = array<i64: 1, 1>, scalar_prefetch = 0 : i64, scratch_operands = 1 : i64, tpu.core_type = #tpu.core_type<tc>, window_params = [{transform_indices = @transform_0, window_bounds = array<i64: 16, 256>}, {transform_indices = @transform_1, window_bounds = array<i64: 256, 1024>}, {pipeline_mode = #tpu.pipeline_mode<synchronous>, transform_indices = @transform_2, window_bounds = array<i64: 1, 1024>}, {pipeline_mode = #tpu.pipeline_mode<synchronous>, transform_indices = @transform_3, window_bounds = array<i64: 1024, 1024>}, {pipeline_mode = #tpu.pipeline_mode<synchronous>, transform_indices = @transform_4, window_bounds = array<i64: 1, 1024>}, {pipeline_mode = #tpu.pipeline_mode<synchronous>, transform_indices = @transform_5, window_bounds = array<i64: 1024, 128>}, {pipeline_mode = #tpu.pipeline_mode<synchronous>, transform_indices = @transform_6, window_bounds = array<i64: 1, 128>}, {transform_indices = @transform_7, window_bounds = array<i64: 16, 128>}, {transform_indices = @transform_8, window_bounds = array<i64: 16, 128>}]} {
    %c0_i32 = arith.constant 0 : i32
    %0 = arith.cmpi eq, %arg1, %c0_i32 : i32
    %1 = arith.extui %0 : i1 to i32
    %c0_i32_0 = arith.constant 0 : i32
    %2 = arith.cmpi ne, %1, %c0_i32_0 : i32
    scf.if %2 {
      %cst_10 = arith.constant 0.000000e+00 : f32
      %12 = vector.broadcast %cst_10 : f32 to vector<16x1024xf32>
      %c0_11 = arith.constant 0 : index
      %c0_12 = arith.constant 0 : index
      %13 = vector.load %arg11[%c0_11, %c0_12] : memref<16x1024xf32, #tpu.memory_space<vmem>>, vector<16x1024xf32>
      tpu.vector_store %arg11[%c0_11, %c0_12], %12 {strides = array<i32>} : memref<16x1024xf32, #tpu.memory_space<vmem>>, vector<16x1024xf32>,
    } else {
    }
    %c0 = arith.constant 0 : index
    %c0_1 = arith.constant 0 : index
    %3 = vector.load %arg11[%c0, %c0_1] : memref<16x1024xf32, #tpu.memory_space<vmem>>, vector<16x1024xf32>
    %c0_2 = arith.constant 0 : index
    %c0_3 = arith.constant 0 : index
    %4 = vector.load %arg2[%c0_2, %c0_3] : memref<16x256xbf16, #tpu.memory_space<vmem>>, vector<16x256xbf16>
    %c0_4 = arith.constant 0 : index
    %c0_5 = arith.constant 0 : index
    %5 = vector.load %arg3[%c0_4, %c0_5] : memref<256x1024xbf16, #tpu.memory_space<vmem>>, vector<256x1024xbf16>
    %cst = arith.constant dense<0.000000e+00> : vector<16x1024xf32>
    %6 = tpu.matmul %4, %5, %cst {dimension_numbers = #tpu.dot_dimension_numbers<[1], [0], [0], [1], [0, 0, 1, 1], [], []>} : vector<16x256xbf16>, vector<256x1024xbf16>, vector<16x1024xf32> -> vector<16x1024xf32>
    %7 = arith.addf %3, %6 : vector<16x1024xf32>
    %c0_6 = arith.constant 0 : index
    %c0_7 = arith.constant 0 : index
    %8 = vector.load %arg11[%c0_6, %c0_7] : memref<16x1024xf32, #tpu.memory_space<vmem>>, vector<16x1024xf32>
    tpu.vector_store %arg11[%c0_6, %c0_7], %7 {strides = array<i32>} : memref<16x1024xf32, #tpu.memory_space<vmem>>, vector<16x1024xf32>,
    %c0_i32_8 = arith.constant 0 : i32
    %9 = arith.cmpi eq, %arg1, %c0_i32_8 : i32
    %10 = arith.extui %9 : i1 to i32
    %c0_i32_9 = arith.constant 0 : i32
    %11 = arith.cmpi ne, %10, %c0_i32_9 : i32
    scf.if %11 {
      %c0_10 = arith.constant 0 : index
      %c0_11 = arith.constant 0 : index
      %12 = vector.load %arg11[%c0_10, %c0_11] : memref<16x1024xf32, #tpu.memory_space<vmem>>, vector<16x1024xf32>
      %c0_12 = arith.constant 0 : index
      %c0_13 = arith.constant 0 : index
      %13 = vector.load %arg4[%c0_12, %c0_13] : memref<1x1024xf32, #tpu.memory_space<vmem>>, vector<1x1024xf32>
      %14 = vector.broadcast %13 : vector<1x1024xf32> to vector<16x1024xf32>
      %15 = arith.addf %12, %14 : vector<16x1024xf32>
      %cst_14 = arith.constant 0.000000e+00 : f32
      %16 = vector.broadcast %cst_14 : f32 to vector<16x1024xf32>
      %17 = arith.maximumf %15, %16 : vector<16x1024xf32>
      %18 = arith.truncf %17 : vector<16x1024xf32> to vector<16x1024xbf16>
      %c0_15 = arith.constant 0 : index
      %c0_16 = arith.constant 0 : index
      %19 = vector.load %arg5[%c0_15, %c0_16] : memref<1024x1024xbf16, #tpu.memory_space<vmem>>, vector<1024x1024xbf16>
      %cst_17 = arith.constant dense<0.000000e+00> : vector<16x1024xf32>
      %20 = tpu.matmul %18, %19, %cst_17 {dimension_numbers = #tpu.dot_dimension_numbers<[1], [0], [0], [1], [0, 0, 1, 1], [], []>} : vector<16x1024xbf16>, vector<1024x1024xbf16>, vector<16x1024xf32> -> vector<16x1024xf32>
      %c0_18 = arith.constant 0 : index
      %c0_19 = arith.constant 0 : index
      %21 = vector.load %arg6[%c0_18, %c0_19] : memref<1x1024xf32, #tpu.memory_space<vmem>>, vector<1x1024xf32>
      %22 = vector.broadcast %21 : vector<1x1024xf32> to vector<16x1024xf32>
      %23 = arith.addf %20, %22 : vector<16x1024xf32>
      %cst_20 = arith.constant 0.000000e+00 : f32
      %24 = vector.broadcast %cst_20 : f32 to vector<16x1024xf32>
      %25 = arith.maximumf %23, %24 : vector<16x1024xf32>
      %26 = arith.truncf %25 : vector<16x1024xf32> to vector<16x1024xbf16>
      %c0_21 = arith.constant 0 : index
      %c0_22 = arith.constant 0 : index
      %27 = vector.load %arg7[%c0_21, %c0_22] : memref<1024x128xbf16, #tpu.memory_space<vmem>>, vector<1024x128xbf16>
      %cst_23 = arith.constant dense<0.000000e+00> : vector<16x128xf32>
      %28 = tpu.matmul %26, %27, %cst_23 {dimension_numbers = #tpu.dot_dimension_numbers<[1], [0], [0], [1], [0, 0, 1, 1], [], []>} : vector<16x1024xbf16>, vector<1024x128xbf16>, vector<16x128xf32> -> vector<16x128xf32>
      %c0_24 = arith.constant 0 : index
      %c0_25 = arith.constant 0 : index
      %29 = vector.load %arg8[%c0_24, %c0_25] : memref<1x128xf32, #tpu.memory_space<vmem>>, vector<1x128xf32>
      %30 = vector.broadcast %29 : vector<1x128xf32> to vector<16x128xf32>
      %31 = arith.addf %28, %30 : vector<16x128xf32>
      %c0_26 = arith.constant 0 : index
      %c0_27 = arith.constant 0 : index
      %32 = vector.load %arg9[%c0_26, %c0_27] : memref<16x128xf32, #tpu.memory_space<vmem>>, vector<16x128xf32>
      tpu.vector_store %arg9[%c0_26, %c0_27], %31 {strides = array<i32>} : memref<16x128xf32, #tpu.memory_space<vmem>>, vector<16x128xf32>,
      %33 = tpu.iota {dimensions = array<i32: 1>} : vector<16x128xi32>
      %c8_i32 = arith.constant 8 : i32
      %34 = vector.broadcast %c8_i32 : i32 to vector<16x128xi32>
      %35 = arith.cmpi slt, %33, %34 : vector<16x128xi32>
      %cst_28 = arith.constant 0xFF800000 : f32
      %36 = vector.broadcast %cst_28 : f32 to vector<16x128xf32>
      %37 = arith.select %35, %31, %36 : vector<16x128xi1>, vector<16x128xf32>
      %cst_29 = arith.constant dense<0xFF800000> : vector<16xf32>
      %38 = vector.multi_reduction <maximumf>, %37, %cst_29 [1] : vector<16x128xf32> to vector<16xf32>
      %39 = vector.shape_cast %38 : vector<16xf32> to vector<16x1xf32>
      %40 = vector.broadcast %39 : vector<16x1xf32> to vector<16x128xf32>
      %41 = arith.subf %37, %40 : vector<16x128xf32>
      %42 = math.exp %41 : vector<16x128xf32>
      %cst_30 = arith.constant dense<0.000000e+00> : vector<16xf32>
      %43 = vector.multi_reduction <add>, %42, %cst_30 [1] : vector<16x128xf32> to vector<16xf32>
      %44 = vector.shape_cast %43 : vector<16xf32> to vector<16x1xf32>
      %45 = vector.broadcast %44 : vector<16x1xf32> to vector<16x128xf32>
      %46 = arith.divf %42, %45 : vector<16x128xf32>
      %c0_31 = arith.constant 0 : index
      %c0_32 = arith.constant 0 : index
      %47 = vector.load %arg10[%c0_31, %c0_32] : memref<16x128xf32, #tpu.memory_space<vmem>>, vector<16x128xf32>
      tpu.vector_store %arg10[%c0_31, %c0_32], %46 {strides = array<i32>} : memref<16x128xf32, #tpu.memory_space<vmem>>, vector<16x128xf32>,
    } else {
    }
    return
  }
  func.func @transform_0(%arg0: i32, %arg1: i32) -> (i32, i32) {
    %c0_i32 = arith.constant 0 : i32
    return %arg0, %arg1 : i32, i32
  }
  func.func @transform_1(%arg0: i32, %arg1: i32) -> (i32, i32) {
    %c0_i32 = arith.constant 0 : i32
    %c0_i32_0 = arith.constant 0 : i32
    return %arg1, %c0_i32 : i32, i32
  }
  func.func @transform_2(%arg0: i32, %arg1: i32) -> (i32, i32) {
    %c0_i32 = arith.constant 0 : i32
    %c0_i32_0 = arith.constant 0 : i32
    %c0_i32_1 = arith.constant 0 : i32
    return %c0_i32, %c0_i32_0 : i32, i32
  }
  func.func @transform_3(%arg0: i32, %arg1: i32) -> (i32, i32) {
    %c0_i32 = arith.constant 0 : i32
    %c0_i32_0 = arith.constant 0 : i32
    %c0_i32_1 = arith.constant 0 : i32
    return %c0_i32, %c0_i32_0 : i32, i32
  }
  func.func @transform_4(%arg0: i32, %arg1: i32) -> (i32, i32) {
    %c0_i32 = arith.constant 0 : i32
    %c0_i32_0 = arith.constant 0 : i32
    %c0_i32_1 = arith.constant 0 : i32
    return %c0_i32, %c0_i32_0 : i32, i32
  }
  func.func @transform_5(%arg0: i32, %arg1: i32) -> (i32, i32) {
    %c0_i32 = arith.constant 0 : i32
    %c0_i32_0 = arith.constant 0 : i32
    %c0_i32_1 = arith.constant 0 : i32
    return %c0_i32, %c0_i32_0 : i32, i32
  }
  func.func @transform_6(%arg0: i32, %arg1: i32) -> (i32, i32) {
    %c0_i32 = arith.constant 0 : i32
    %c0_i32_0 = arith.constant 0 : i32
    %c0_i32_1 = arith.constant 0 : i32
    return %c0_i32, %c0_i32_0 : i32, i32
  }
  func.func @transform_7(%arg0: i32, %arg1: i32) -> (i32, i32) {
    %c0_i32 = arith.constant 0 : i32
    %c0_i32_0 = arith.constant 0 : i32
    return %arg0, %c0_i32 : i32, i32
  }
  func.func @transform_8(%arg0: i32, %arg1: i32) -> (i32, i32) {
    %c0_i32 = arith.constant 0 : i32
    %c0_i32_0 = arith.constant 0 : i32
    return %arg0, %c0_i32 : i32, i32
  }
}

</mosaic_0001>

<bundles_post_ra>
// kernel: classifier_forward.1
= control target key start
LH: loop header
LB: loop body
LE: loop exit
PB: predicated region body
PF: predicated region fallthrough
CT: control target
= control target key end

     0   :  { %s8972_s1 = inlined_call_operand.vmem [shape: bf16[256,1024], index: 1, kind: input, shape index: {}]   ;;  %s8973_s0 = inlined_call_operand.vmem [shape: bf16[16,256], index: 0, kind: input, shape index: {}]   ;;  %s8974_s3 = inlined_call_operand.vmem [shape: bf16[1024,1024], index: 3, kind: input, shape index: {}]   ;;  %s8975_s2 = inlined_call_operand.vmem [shape: f32[1,1024], index: 2, kind: input, shape index: {}]   ;;  %s8976_s5 = inlined_call_operand.vmem [shape: bf16[1024,128], index: 5, kind: input, shape index: {}]   ;;  %s8977_s4 = inlined_call_operand.vmem [shape: f32[1,1024], index: 4, kind: input, shape index: {}]   ;;  %s8978_s6 = inlined_call_operand.vmem [shape: f32[1,128], index: 6, kind: input, shape index: {}]   ;;  %s8979_s7 = inlined_call_operand.vmem [shape: f32[16,128], index: 7, kind: output, shape index: {0}]   ;;  %s8980_s8 = inlined_call_operand.vmem [shape: f32[16,128], index: 8, kind: output, shape index: {1}]  }
   0x1   :  { %v123_v0 = vld [vmem:[%s8972_s1 + $0x1c0] sm:$0xff]  ;;  %v124_v2 = vld [vmem:[%s8972_s1 + $0x1c8] sm:$0xff] }
   0x2   :  { %v127_v1 = vld [vmem:[%s8972_s1 + $0x1e0] sm:$0xff]  ;;  %v128_v4 = vld [vmem:[%s8972_s1 + $0x1e8] sm:$0xff] }
   0x3   :  { %v5753_v3 = vcombine.high %v123_v0, %v127_v1  ;;  %v5752_v5 = vcombine.low %v123_v0, %v127_v1  ;;  %v115_v6 = vld [vmem:[%s8972_s1 + $0x180] sm:$0xff]  ;;  %v5755_v8 = vcombine.high %v124_v2, %v128_v4  ;;  %v5754_v9 = vcombine.low %v124_v2, %v128_v4  ;;  %v116_v11 = vld [vmem:[%s8972_s1 + $0x188] sm:$0xff] }
   0x4   :  { %v119_v7 = vld [vmem:[%s8972_s1 + $0x1a0] sm:$0xff]  ;;  %v120_v12 = vld [vmem:[%s8972_s1 + $0x1a8] sm:$0xff] }
   0x5   :  { %v5745_v10 = vcombine.high %v115_v6, %v119_v7  ;;  %v107_v13 = vld [vmem:[%s8972_s1 + $0x140] sm:$0xff]  ;;  %845 = vmatprep.subr.bf16.mxu0 %v5753_v3  ;;  %v5747_v14 = vcombine.high %v116_v11, %v120_v12  ;;  %v108_v16 = vld [vmem:[%s8972_s1 + $0x148] sm:$0xff]  ;;  %888 = vmatprep.subr.bf16.mxu1 %v5755_v8  ;;  %v5744_v18 = vcombine.low %v115_v6, %v119_v7 }
   0x6   :  { %v111_v15 = vld [vmem:[%s8972_s1 + $0x160] sm:$0xff]  ;;  %v112_v17 = vld [vmem:[%s8972_s1 + $0x168] sm:$0xff]  ;;  %846 = vmatpush1.bf16.msra.mxu0 %v5752_v5  ;;  %889 = vmatpush1.bf16.msra.mxu1 %v5754_v9  ;;  %v5746_v19 = vcombine.low %v116_v11, %v120_v12 }
   0x7   :  { %847 = vmatprep.subr.bf16.mxu0 %v5745_v10  ;;  %v5737_v20 = vcombine.high %v107_v13, %v111_v15  ;;  %890 = vmatprep.subr.bf16.mxu1 %v5747_v14  ;;  %v5739_v21 = vcombine.high %v108_v16, %v112_v17  ;;  %v99_v22 = vld [vmem:[%s8972_s1 + $0x100] sm:$0xff]  ;;  %v100_v24 = vld [vmem:[%s8972_s1 + $0x108] sm:$0xff]  ;;  %v5736_v26 = vcombine.low %v107_v13, %v111_v15 }
   0x8   :  { %v103_v23 = vld [vmem:[%s8972_s1 + $0x120] sm:$0xff]  ;;  %v104_v25 = vld [vmem:[%s8972_s1 + $0x128] sm:$0xff]  ;;  %v5738_v27 = vcombine.low %v108_v16, %v112_v17 }
   0x9   :  { %v5729_v28 = vcombine.high %v99_v22, %v103_v23  ;;  %v5731_v29 = vcombine.high %v100_v24, %v104_v25  ;;  %v91_v30 = vld [vmem:[%s8972_s1 + $0xc0] sm:$0xff]  ;;  %v92_v32 = vld [vmem:[%s8972_s1 + $0xc8] sm:$0xff]  ;;  %v5728_v34 = vcombine.low %v99_v22, %v103_v23  ;;  %v5730_v35 = vcombine.low %v100_v24, %v104_v25 }
   0xa   :  { %848 = vmatpush1.bf16.msra.mxu0 %v5744_v18  ;;  %891 = vmatpush1.bf16.msra.mxu1 %v5746_v19  ;;  %v95_v31 = vld [vmem:[%s8972_s1 + $0xe0] sm:$0xff]  ;;  %v96_v33 = vld [vmem:[%s8972_s1 + $0xe8] sm:$0xff] }
   0xb   :  { %849 = vmatprep.subr.bf16.mxu0 %v5737_v20  ;;  %892 = vmatprep.subr.bf16.mxu1 %v5739_v21  ;;  %v5721_v36 = vcombine.high %v91_v30, %v95_v31  ;;  %v5723_v37 = vcombine.high %v92_v32, %v96_v33  ;;  %v83_v38 = vld [vmem:[%s8972_s1 + $0x80] sm:$0xff]  ;;  %v84_v40 = vld [vmem:[%s8972_s1 + $0x88] sm:$0xff]  ;;  %v5720_v42 = vcombine.low %v91_v30, %v95_v31 }
   0xc   :  { %v87_v39 = vld [vmem:[%s8972_s1 + $0xa0] sm:$0xff]  ;;  %v88_v41 = vld [vmem:[%s8972_s1 + $0xa8] sm:$0xff]  ;;  %v5722_v43 = vcombine.low %v92_v32, %v96_v33 }
   0xd   :  { %v5713_v44 = vcombine.high %v83_v38, %v87_v39  ;;  %v5715_v45 = vcombine.high %v84_v40, %v88_v41  ;;  %v75_v46 = vld [vmem:[%s8972_s1 + $0x40] sm:$0xff]  ;;  %v76_v48 = vld [vmem:[%s8972_s1 + $0x48] sm:$0xff]  ;;  %v5712_v50 = vcombine.low %v83_v38, %v87_v39  ;;  %v5714_v51 = vcombine.low %v84_v40, %v88_v41 }
   0xe   :  { %850 = vmatpush1.bf16.msra.mxu0 %v5736_v26  ;;  %893 = vmatpush1.bf16.msra.mxu1 %v5738_v27  ;;  %v79_v47 = vld [vmem:[%s8972_s1 + $0x60] sm:$0xff]  ;;  %v80_v49 = vld [vmem:[%s8972_s1 + $0x68] sm:$0xff] }
   0xf   :  { %851 = vmatprep.subr.bf16.mxu0 %v5729_v28  ;;  %894 = vmatprep.subr.bf16.mxu1 %v5731_v29  ;;  %v5705_v52 = vcombine.high %v75_v46, %v79_v47  ;;  %v5707_v53 = vcombine.high %v76_v48, %v80_v49  ;;  %v67_v54 = vld [vmem:[%s8972_s1] sm:$0xff]  ;;  %v68_v57 = vld [vmem:[%s8972_s1 + $0x8] sm:$0xff]  ;;  %v5704_v59 = vcombine.low %v75_v46, %v79_v47 }
  0x10   :  { %v71_v55 = vld [vmem:[%s8972_s1 + $0x20] sm:$0xff]  ;;  %v72_v58 = vld [vmem:[%s8972_s1 + $0x28] sm:$0xff]  ;;  %v5706_v60 = vcombine.low %v76_v48, %v80_v49 }
  0x11   :  { %v6702_v56 = vld [vmem:[%s8973_s0 + $0x4] ss:$8 sps:$4 sm:$0xff]   ;;  %v5697_v61 = vcombine.high %v67_v54, %v71_v55  ;;  %v5699_v62 = vcombine.high %v68_v57, %v72_v58  ;;  %v5696_v3 = vcombine.low %v67_v54, %v71_v55  ;;  %v5698_v4 = vcombine.low %v68_v57, %v72_v58 }
  0x12   :  { %852 = vmatpush1.bf16.msra.mxu0 %v5728_v34  ;;  %895 = vmatpush1.bf16.msra.mxu1 %v5730_v35  ;;  %v187_v63 = vld [vmem:[%s8972_s1 + $0x3c0] sm:$0xff]  ;;  %v188_v1 = vld [vmem:[%s8972_s1 + $0x3c8] sm:$0xff] }
  0x13   :  { %853 = vmatprep.subr.bf16.mxu0 %v5721_v36  ;;  %896 = vmatprep.subr.bf16.mxu1 %v5723_v37  ;;  %v191_v0 = vld [vmem:[%s8972_s1 + $0x3e0] sm:$0xff]  ;;  %v192_v2 = vld [vmem:[%s8972_s1 + $0x3e8] sm:$0xff] }
  0x14   :  { %877 = vmatprep.mubr.bf16.mxu0 %v6702_v56  ;;  %920 = vmatprep.mubr.bf16.mxu1 %v6702_v56  ;;  %v5817_v5 = vcombine.high %v187_v63, %v191_v0  ;;  %v5819_v6 = vcombine.high %v188_v1, %v192_v2  ;;  %v179_v7 = vld [vmem:[%s8972_s1 + $0x380] sm:$0xff]  ;;  %v180_v9 = vld [vmem:[%s8972_s1 + $0x388] sm:$0xff]  ;;  %v5816_v11 = vcombine.low %v187_v63, %v191_v0  ;;  %v125_v0 = vld [vmem:[%s8972_s1 + $0x1d0] sm:$0xff] }
  0x15   :  { %v183_v8 = vld [vmem:[%s8972_s1 + $0x3a0] sm:$0xff]  ;;  %v184_v10 = vld [vmem:[%s8972_s1 + $0x3a8] sm:$0xff]  ;;  %v5818_v12 = vcombine.low %v188_v1, %v192_v2  ;;  %v129_v1 = vld [vmem:[%s8972_s1 + $0x1f0] sm:$0xff] }
  0x16   :  { %854 = vmatpush1.bf16.msra.mxu0 %v5720_v42  ;;  %897 = vmatpush1.bf16.msra.mxu1 %v5722_v43  ;;  %v5809_v13 = vcombine.high %v179_v7, %v183_v8  ;;  %v5811_v14 = vcombine.high %v180_v9, %v184_v10  ;;  %v171_v15 = vld [vmem:[%s8972_s1 + $0x340] sm:$0xff]  ;;  %v172_v17 = vld [vmem:[%s8972_s1 + $0x348] sm:$0xff]  ;;  %v5808_v19 = vcombine.low %v179_v7, %v183_v8  ;;  %v126_v2 = vld [vmem:[%s8972_s1 + $0x1d8] sm:$0xff] }
  0x17   :  { %855 = vmatprep.subr.bf16.mxu0 %v5713_v44  ;;  %898 = vmatprep.subr.bf16.mxu1 %v5715_v45  ;;  %v175_v16 = vld [vmem:[%s8972_s1 + $0x360] sm:$0xff]  ;;  %v176_v18 = vld [vmem:[%s8972_s1 + $0x368] sm:$0xff]  ;;  %v5810_v20 = vcombine.low %v180_v9, %v184_v10  ;;  %v117_v8 = vld [vmem:[%s8972_s1 + $0x190] sm:$0xff] }
  0x18   :  { %v5801_v21 = vcombine.high %v171_v15, %v175_v16  ;;  %v5803_v22 = vcombine.high %v172_v17, %v176_v18  ;;  %v163_v23 = vld [vmem:[%s8972_s1 + $0x300] sm:$0xff]  ;;  %v164_v25 = vld [vmem:[%s8972_s1 + $0x308] sm:$0xff]  ;;  %v5800_v27 = vcombine.low %v171_v15, %v175_v16  ;;  %v5802_v28 = vcombine.low %v172_v17, %v176_v18  ;;  %v121_v9 = vld [vmem:[%s8972_s1 + $0x1b0] sm:$0xff] }
  0x19   :  { %v167_v24 = vld [vmem:[%s8972_s1 + $0x320] sm:$0xff]  ;;  %v168_v26 = vld [vmem:[%s8972_s1 + $0x328] sm:$0xff]  ;;  %v5749_v15 = vcombine.high %v117_v8, %v121_v9  ;;  %v109_v17 = vld [vmem:[%s8972_s1 + $0x150] sm:$0xff] }
  0x1a   :  { %856 = vmatpush1.bf16.msra.mxu0 %v5712_v50  ;;  %899 = vmatpush1.bf16.msra.mxu1 %v5714_v51  ;;  %v5793_v29 = vcombine.high %v163_v23, %v167_v24  ;;  %v5795_v30 = vcombine.high %v164_v25, %v168_v26  ;;  %v155_v31 = vld [vmem:[%s8972_s1 + $0x2c0] sm:$0xff]  ;;  %v156_v33 = vld [vmem:[%s8972_s1 + $0x2c8] sm:$0xff]  ;;  %v5792_v35 = vcombine.low %v163_v23, %v167_v24  ;;  %v113_v18 = vld [vmem:[%s8972_s1 + $0x170] sm:$0xff] }
  0x1b   :  { %857 = vmatprep.subr.bf16.mxu0 %v5705_v52  ;;  %900 = vmatprep.subr.bf16.mxu1 %v5707_v53  ;;  %v159_v32 = vld [vmem:[%s8972_s1 + $0x2e0] sm:$0xff]  ;;  %v160_v34 = vld [vmem:[%s8972_s1 + $0x2e8] sm:$0xff]  ;;  %v5794_v36 = vcombine.low %v164_v25, %v168_v26  ;;  %v5741_v23 = vcombine.high %v109_v17, %v113_v18  ;;  %v101_v25 = vld [vmem:[%s8972_s1 + $0x110] sm:$0xff] }
  0x1c   :  { %v5785_v37 = vcombine.high %v155_v31, %v159_v32  ;;  %v5787_v38 = vcombine.high %v156_v33, %v160_v34  ;;  %v147_v39 = vld [vmem:[%s8972_s1 + $0x280] sm:$0xff]  ;;  %v148_v41 = vld [vmem:[%s8972_s1 + $0x288] sm:$0xff]  ;;  %v5784_v43 = vcombine.low %v155_v31, %v159_v32  ;;  %v5786_v44 = vcombine.low %v156_v33, %v160_v34  ;;  %v105_v26 = vld [vmem:[%s8972_s1 + $0x130] sm:$0xff] }
  0x1d   :  { %v151_v40 = vld [vmem:[%s8972_s1 + $0x2a0] sm:$0xff]  ;;  %v152_v42 = vld [vmem:[%s8972_s1 + $0x2a8] sm:$0xff]  ;;  %v5733_v31 = vcombine.high %v101_v25, %v105_v26  ;;  %v93_v33 = vld [vmem:[%s8972_s1 + $0xd0] sm:$0xff] }
  0x1e   :  { %858 = vmatpush1.bf16.msra.mxu0 %v5704_v59  ;;  %901 = vmatpush1.bf16.msra.mxu1 %v5706_v60  ;;  %v5777_v45 = vcombine.high %v147_v39, %v151_v40  ;;  %v5779_v46 = vcombine.high %v148_v41, %v152_v42  ;;  %v139_v47 = vld [vmem:[%s8972_s1 + $0x240] sm:$0xff]  ;;  %v140_v49 = vld [vmem:[%s8972_s1 + $0x248] sm:$0xff]  ;;  %v5776_v51 = vcombine.low %v147_v39, %v151_v40  ;;  %v97_v34 = vld [vmem:[%s8972_s1 + $0xf0] sm:$0xff] }
  0x1f   :  { %859 = vmatprep.subr.bf16.mxu0 %v5697_v61  ;;  %902 = vmatprep.subr.bf16.mxu1 %v5699_v62  ;;  %v143_v48 = vld [vmem:[%s8972_s1 + $0x260] sm:$0xff]  ;;  %v144_v50 = vld [vmem:[%s8972_s1 + $0x268] sm:$0xff]  ;;  %v5778_v52 = vcombine.low %v148_v41, %v152_v42  ;;  %v85_v40 = vld [vmem:[%s8972_s1 + $0x90] sm:$0xff] }
  0x20   :  { %v5769_v53 = vcombine.high %v139_v47, %v143_v48  ;;  %v5771_v54 = vcombine.high %v140_v49, %v144_v50  ;;  %v131_v55 = vld [vmem:[%s8972_s1 + $0x200] sm:$0xff]  ;;  %v132_v58 = vld [vmem:[%s8972_s1 + $0x208] sm:$0xff]  ;;  %v5768_v60 = vcombine.low %v139_v47, %v143_v48  ;;  %v5770_v61 = vcombine.low %v140_v49, %v144_v50  ;;  %v89_v41 = vld [vmem:[%s8972_s1 + $0xb0] sm:$0xff] }
  0x21   :  { %v135_v57 = vld [vmem:[%s8972_s1 + $0x220] sm:$0xff]  ;;  %v136_v59 = vld [vmem:[%s8972_s1 + $0x228] sm:$0xff]  ;;  %v86_v42 = vld [vmem:[%s8972_s1 + $0x98] sm:$0xff] }
  0x22   :  { %860 = vmatpush1.bf16.msra.mxu0 %v5696_v3  ;;  %903 = vmatpush1.bf16.msra.mxu1 %v5698_v4  ;;  %v5761_v62 = vcombine.high %v131_v55, %v135_v57  ;;  %v5763_v63 = vcombine.high %v132_v58, %v136_v59  ;;  %v130_v3 = vld [vmem:[%s8972_s1 + $0x1f8] sm:$0xff]  ;;  %v5760_v4 = vcombine.low %v131_v55, %v135_v57  ;;  %v6829_v10 = vld [vmem:[%s8973_s0] ss:$8 sps:$4 sm:$0xff]   ;;  %v77_v48 = vld [vmem:[%s8972_s1 + $0x50] sm:$0xff] }
  0x23   :  { %861 = vmatprep.subr.bf16.mxu0 %v5817_v5  ;;  %904 = vmatprep.subr.bf16.mxu1 %v5819_v6  ;;  %v5762_v5 = vcombine.low %v132_v58, %v136_v59  ;;  %v5757_v6 = vcombine.high %v125_v0, %v129_v1  ;;  %v5759_v7 = vcombine.high %v126_v2, %v130_v3  ;;  %v81_v49 = vld [vmem:[%s8972_s1 + $0x70] sm:$0xff]  ;;  %v78_v50 = vld [vmem:[%s8972_s1 + $0x58] sm:$0xff] }
  0x24   :  { %v69_v57 = vld [vmem:[%s8972_s1 + $0x10] sm:$0xff]  ;;  %v70_v59 = vld [vmem:[%s8972_s1 + $0x18] sm:$0xff] }
  0x25   :  { %v73_v58 = vld [vmem:[%s8972_s1 + $0x30] sm:$0xff] }
  0x26   :  { %862 = vmatpush2.bf16.msra.mxu0 %v5816_v11  ;;  %905 = vmatpush2.bf16.msra.mxu1 %v5818_v12  ;;  %v118_v11 = vld [vmem:[%s8972_s1 + $0x198] sm:$0xff] }
  0x27   :  { %863 = vmatprep.subr.bf16.mxu0 %v5809_v13  ;;  %906 = vmatprep.subr.bf16.mxu1 %v5811_v14  ;;  %v122_v12 = vld [vmem:[%s8972_s1 + $0x1b8] sm:$0xff]  ;;  %v5756_v13 = vcombine.low %v125_v0, %v129_v1  ;;  %v5758_v14 = vcombine.low %v126_v2, %v130_v3  ;;  %v189_v1 = vld [vmem:[%s8972_s1 + $0x3d0] sm:$0xff] }
  0x28   :  { %v5751_v16 = vcombine.high %v118_v11, %v122_v12  ;;  %v193_v2 = vld [vmem:[%s8972_s1 + $0x3f0] sm:$0xff]  ;;  %v190_v3 = vld [vmem:[%s8972_s1 + $0x3d8] sm:$0xff] }
  0x2a   :  { %864 = vmatpush2.bf16.msra.mxu0 %v5808_v19  ;;  %907 = vmatpush2.bf16.msra.mxu1 %v5810_v20  ;;  %v110_v19 = vld [vmem:[%s8972_s1 + $0x158] sm:$0xff] }
  0x2b   :  { %865 = vmatprep.subr.bf16.mxu0 %v5801_v21  ;;  %908 = vmatprep.subr.bf16.mxu1 %v5803_v22  ;;  %v114_v20 = vld [vmem:[%s8972_s1 + $0x178] sm:$0xff]  ;;  %v5748_v21 = vcombine.low %v117_v8, %v121_v9  ;;  %v5750_v22 = vcombine.low %v118_v11, %v122_v12  ;;  %v181_v9 = vld [vmem:[%s8972_s1 + $0x390] sm:$0xff] }
  0x2c   :  { %v5743_v24 = vcombine.high %v110_v19, %v114_v20  ;;  %v185_v11 = vld [vmem:[%s8972_s1 + $0x3b0] sm:$0xff]  ;;  %v182_v12 = vld [vmem:[%s8972_s1 + $0x398] sm:$0xff] }
  0x2e   :  { %866 = vmatpush2.bf16.msra.mxu0 %v5800_v27  ;;  %909 = vmatpush2.bf16.msra.mxu1 %v5802_v28  ;;  %v102_v27 = vld [vmem:[%s8972_s1 + $0x118] sm:$0xff] }
  0x2f   :  { %867 = vmatprep.subr.bf16.mxu0 %v5793_v29  ;;  %910 = vmatprep.subr.bf16.mxu1 %v5795_v30  ;;  %v106_v28 = vld [vmem:[%s8972_s1 + $0x138] sm:$0xff]  ;;  %v5740_v29 = vcombine.low %v109_v17, %v113_v18  ;;  %v5742_v30 = vcombine.low %v110_v19, %v114_v20  ;;  %v173_v18 = vld [vmem:[%s8972_s1 + $0x350] sm:$0xff] }
  0x30   :  { %v5735_v32 = vcombine.high %v102_v27, %v106_v28  ;;  %v177_v19 = vld [vmem:[%s8972_s1 + $0x370] sm:$0xff]  ;;  %v174_v20 = vld [vmem:[%s8972_s1 + $0x358] sm:$0xff] }
  0x32   :  { %868 = vmatpush2.bf16.msra.mxu0 %v5792_v35  ;;  %911 = vmatpush2.bf16.msra.mxu1 %v5794_v36  ;;  %v98_v35 = vld [vmem:[%s8972_s1 + $0xf8] sm:$0xff]  ;;  %v5732_v36 = vcombine.low %v101_v25, %v105_v26  ;;  %v165_v26 = vld [vmem:[%s8972_s1 + $0x310] sm:$0xff] }
  0x33   :  { %869 = vmatprep.subr.bf16.mxu0 %v5785_v37  ;;  %912 = vmatprep.subr.bf16.mxu1 %v5787_v38  ;;  %v5734_v37 = vcombine.low %v102_v27, %v106_v28  ;;  %v5725_v38 = vcombine.high %v93_v33, %v97_v34  ;;  %v169_v27 = vld [vmem:[%s8972_s1 + $0x330] sm:$0xff]  ;;  %v166_v28 = vld [vmem:[%s8972_s1 + $0x318] sm:$0xff] }
  0x36   :  { %870 = vmatpush2.bf16.msra.mxu0 %v5784_v43  ;;  %913 = vmatpush2.bf16.msra.mxu1 %v5786_v44  ;;  %v90_v43 = vld [vmem:[%s8972_s1 + $0xb8] sm:$0xff]  ;;  %v5724_v44 = vcombine.low %v93_v33, %v97_v34  ;;  %v157_v34 = vld [vmem:[%s8972_s1 + $0x2d0] sm:$0xff] }
  0x37   :  { %871 = vmatprep.subr.bf16.mxu0 %v5777_v45  ;;  %914 = vmatprep.subr.bf16.mxu1 %v5779_v46  ;;  %v5717_v46 = vcombine.high %v85_v40, %v89_v41  ;;  %v5719_v47 = vcombine.high %v86_v42, %v90_v43 }
  0x3a   :  { %872 = vmatpush2.bf16.msra.mxu0 %v5776_v51  ;;  %915 = vmatpush2.bf16.msra.mxu1 %v5778_v52  ;;  %v82_v51 = vld [vmem:[%s8972_s1 + $0x78] sm:$0xff]  ;;  %v5716_v52 = vcombine.low %v85_v40, %v89_v41  ;;  %v149_v41 = vld [vmem:[%s8972_s1 + $0x290] sm:$0xff] }
  0x3b   :  { %873 = vmatprep.subr.bf16.mxu0 %v5769_v53  ;;  %916 = vmatprep.subr.bf16.mxu1 %v5771_v54  ;;  %v5718_v53 = vcombine.low %v86_v42, %v90_v43  ;;  %v5709_v54 = vcombine.high %v77_v48, %v81_v49  ;;  %v5711_v55 = vcombine.high %v78_v50, %v82_v51  ;;  %v153_v42 = vld [vmem:[%s8972_s1 + $0x2b0] sm:$0xff]  ;;  %v150_v43 = vld [vmem:[%s8972_s1 + $0x298] sm:$0xff] }
  0x3e   :  { %874 = vmatpush2.bf16.msra.mxu0 %v5768_v60  ;;  %917 = vmatpush2.bf16.msra.mxu1 %v5770_v61  ;;  %v74_v60 = vld [vmem:[%s8972_s1 + $0x38] sm:$0xff]  ;;  %v5708_v61 = vcombine.low %v77_v48, %v81_v49  ;;  %v141_v49 = vld [vmem:[%s8972_s1 + $0x250] sm:$0xff] }
  0x3f   :  { %875 = vmatprep.subr.bf16.mxu0 %v5761_v62  ;;  %918 = vmatprep.subr.bf16.mxu1 %v5763_v63  ;;  %v5710_v62 = vcombine.low %v78_v50, %v82_v51  ;;  %v5701_v63 = vcombine.high %v69_v57, %v73_v58  ;;  %v5703_v0 = vcombine.high %v70_v59, %v74_v60  ;;  %v145_v50 = vld [vmem:[%s8972_s1 + $0x270] sm:$0xff]  ;;  %v142_v51 = vld [vmem:[%s8972_s1 + $0x258] sm:$0xff] }
  0x42   :  { %876 = vmatpush2.bf16.msra.mxu0 %v5760_v4  ;;  %919 = vmatpush2.bf16.msra.mxu1 %v5762_v5  ;;  %v194_v4 = vld [vmem:[%s8972_s1 + $0x3f8] sm:$0xff]  ;;  %v5700_v5 = vcombine.low %v69_v57, %v73_v58  ;;  %v133_v58 = vld [vmem:[%s8972_s1 + $0x210] sm:$0xff] }
  0x43   :  { %931 = vmatprep.subr.bf16.mxu0 %v5757_v6  ;;  %974 = vmatprep.subr.bf16.mxu1 %v5759_v7  ;;  %v5702_v6 = vcombine.low %v70_v59, %v74_v60  ;;  %v5821_v7 = vcombine.high %v189_v1, %v193_v2  ;;  %v5823_v8 = vcombine.high %v190_v3, %v194_v4  ;;  %v137_v59 = vld [vmem:[%s8972_s1 + $0x230] sm:$0xff]  ;;  %v134_v60 = vld [vmem:[%s8972_s1 + $0x218] sm:$0xff] }
  0x45   :  { %878 = vmatmul.mubr.bf16.vlgmr.msra.gmra.mxu0 %v6829_v10  ;;  %921 = vmatmul.mubr.bf16.vlgmr.msra.gmra.mxu1 %v6829_v10 }
  0x46   :  { %932 = vmatpush1.bf16.msra.mxu0 %v5756_v13  ;;  %975 = vmatpush1.bf16.msra.mxu1 %v5758_v14  ;;  %v186_v13 = vld [vmem:[%s8972_s1 + $0x3b8] sm:$0xff]  ;;  %v5820_v14 = vcombine.low %v189_v1, %v193_v2  ;;  %v1206_v2 = vld [vmem:[%s8974_s3 + $0x1c0] sm:$0xff] }
  0x47   :  { %933 = vmatprep.subr.bf16.mxu0 %v5749_v15  ;;  %976 = vmatprep.subr.bf16.mxu1 %v5751_v16  ;;  %v5822_v15 = vcombine.low %v190_v3, %v194_v4  ;;  %v5813_v16 = vcombine.high %v181_v9, %v185_v11  ;;  %v5815_v17 = vcombine.high %v182_v12, %v186_v13  ;;  %v1210_v3 = vld [vmem:[%s8974_s3 + $0x1e0] sm:$0xff] }
  0x48   :  { %963 = vmatprep.mubr.bf16.mxu0 %v6702_v56  ;;  %1006 = vmatprep.mubr.bf16.mxu1 %v6702_v56  ;;  %v94_v56 = vld [vmem:[%s8972_s1 + $0xd8] sm:$0xff]  ;;  %v1334_v4 = vld [vmem:[%s8974_s3 + $0x5c0] sm:$0xff] }
  0x49   :  { %v5727_v39 = vcombine.high %v94_v56, %v98_v35  ;;  %v5726_v45 = vcombine.low %v94_v56, %v98_v35  ;;  %v161_v56 = vld [vmem:[%s8972_s1 + $0x2f0] sm:$0xff]  ;;  %v158_v35 = vld [vmem:[%s8972_s1 + $0x2d8] sm:$0xff] }
  0x4a   :  { %934 = vmatpush1.bf16.msra.mxu0 %v5748_v21  ;;  %977 = vmatpush1.bf16.msra.mxu1 %v5750_v22  ;;  %v178_v21 = vld [vmem:[%s8972_s1 + $0x378] sm:$0xff]  ;;  %v5812_v22 = vcombine.low %v181_v9, %v185_v11  ;;  %v1198_v11 = vld [vmem:[%s8974_s3 + $0x180] sm:$0xff] }
  0x4b   :  { %935 = vmatprep.subr.bf16.mxu0 %v5741_v23  ;;  %978 = vmatprep.subr.bf16.mxu1 %v5743_v24  ;;  %v5814_v23 = vcombine.low %v182_v12, %v186_v13  ;;  %v5805_v24 = vcombine.high %v173_v18, %v177_v19  ;;  %v5807_v25 = vcombine.high %v174_v20, %v178_v21  ;;  %v1202_v12 = vld [vmem:[%s8974_s3 + $0x1a0] sm:$0xff] }
  0x4c   :  { %v1326_v13 = vld [vmem:[%s8974_s3 + $0x580] sm:$0xff] }
  0x4e   :  { %936 = vmatpush1.bf16.msra.mxu0 %v5740_v29  ;;  %979 = vmatpush1.bf16.msra.mxu1 %v5742_v30  ;;  %v170_v29 = vld [vmem:[%s8972_s1 + $0x338] sm:$0xff]  ;;  %v5804_v30 = vcombine.low %v173_v18, %v177_v19  ;;  %v1190_v19 = vld [vmem:[%s8974_s3 + $0x140] sm:$0xff] }
  0x4f   :  { %937 = vmatprep.subr.bf16.mxu0 %v5733_v31  ;;  %980 = vmatprep.subr.bf16.mxu1 %v5735_v32  ;;  %v5806_v31 = vcombine.low %v174_v20, %v178_v21  ;;  %v5797_v32 = vcombine.high %v165_v26, %v169_v27  ;;  %v5799_v33 = vcombine.high %v166_v28, %v170_v29  ;;  %v1194_v20 = vld [vmem:[%s8974_s3 + $0x160] sm:$0xff] }
  0x50   :  { %v1318_v21 = vld [vmem:[%s8974_s3 + $0x540] sm:$0xff] }
  0x52   :  { %938 = vmatpush1.bf16.msra.mxu0 %v5732_v36  ;;  %981 = vmatpush1.bf16.msra.mxu1 %v5734_v37  ;;  %v162_v36 = vld [vmem:[%s8972_s1 + $0x2f8] sm:$0xff]  ;;  %v5796_v37 = vcombine.low %v165_v26, %v169_v27  ;;  %v1182_v27 = vld [vmem:[%s8974_s3 + $0x100] sm:$0xff] }
  0x53   :  { %939 = vmatprep.subr.bf16.mxu0 %v5725_v38  ;;  %982 = vmatprep.subr.bf16.mxu1 %v5727_v39  ;;  %v5798_v38 = vcombine.low %v166_v28, %v170_v29  ;;  %v5789_v39 = vcombine.high %v157_v34, %v161_v56  ;;  %v5791_v40 = vcombine.high %v158_v35, %v162_v36  ;;  %v1186_v28 = vld [vmem:[%s8974_s3 + $0x120] sm:$0xff] }
  0x54   :  { %v1314_v29 = vld [vmem:[%s8974_s3 + $0x520] sm:$0xff] }
  0x56   :  { %940 = vmatpush1.bf16.msra.mxu0 %v5724_v44  ;;  %983 = vmatpush1.bf16.msra.mxu1 %v5726_v45  ;;  %v154_v44 = vld [vmem:[%s8972_s1 + $0x2b8] sm:$0xff]  ;;  %v5788_v45 = vcombine.low %v157_v34, %v161_v56  ;;  %v1174_v34 = vld [vmem:[%s8974_s3 + $0xc0] sm:$0xff] }
  0x57   :  { %941 = vmatprep.subr.bf16.mxu0 %v5717_v46  ;;  %984 = vmatprep.subr.bf16.mxu1 %v5719_v47  ;;  %v5790_v46 = vcombine.low %v158_v35, %v162_v36  ;;  %v5781_v47 = vcombine.high %v149_v41, %v153_v42  ;;  %v5783_v48 = vcombine.high %v150_v43, %v154_v44  ;;  %v1178_v56 = vld [vmem:[%s8974_s3 + $0xe0] sm:$0xff] }
  0x58   :  { %v1302_v35 = vld [vmem:[%s8974_s3 + $0x4c0] sm:$0xff] }
  0x59   :  { %v1306_v36 = vld [vmem:[%s8974_s3 + $0x4e0] sm:$0xff] }
  0x5a   :  { %942 = vmatpush1.bf16.msra.mxu0 %v5716_v52  ;;  %985 = vmatpush1.bf16.msra.mxu1 %v5718_v53  ;;  %v146_v52 = vld [vmem:[%s8972_s1 + $0x278] sm:$0xff]  ;;  %v5780_v53 = vcombine.low %v149_v41, %v153_v42  ;;  %v1170_v41 = vld [vmem:[%s8974_s3 + $0xa0] sm:$0xff]  ;;  %v5977_v42 = vcombine.high %v1302_v35, %v1306_v36 }
  0x5b   :  { %943 = vmatprep.subr.bf16.mxu0 %v5709_v54  ;;  %986 = vmatprep.subr.bf16.mxu1 %v5711_v55  ;;  %v5782_v54 = vcombine.low %v150_v43, %v154_v44  ;;  %v5773_v55 = vcombine.high %v141_v49, %v145_v50  ;;  %v5775_v57 = vcombine.high %v142_v51, %v146_v52  ;;  %v7080_v43 = vld [vmem:[%s8974_s3 + $0x9c0] sm:$0xff] }
  0x5c   :  { %v7085_v44 = vld [vmem:[%s8974_s3 + $0x9e0] sm:$0xff] }
  0x5e   :  { %944 = vmatpush1.bf16.msra.mxu0 %v5708_v61  ;;  %987 = vmatpush1.bf16.msra.mxu1 %v5710_v62  ;;  %v138_v61 = vld [vmem:[%s8972_s1 + $0x238] sm:$0xff]  ;;  %v5772_v62 = vcombine.low %v141_v49, %v145_v50  ;;  %v5848_v49 = vcombine.low %v1174_v34, %v1178_v56  ;;  %v6136_v50 = vcombine.low %v7080_v43, %v7085_v44 }
  0x5f   :  { %945 = vmatprep.subr.bf16.mxu0 %v5701_v63  ;;  %988 = vmatprep.subr.bf16.mxu1 %v5703_v0  ;;  %v5774_v63 = vcombine.low %v142_v51, %v146_v52  ;;  %v5765_v0 = vcombine.high %v133_v58, %v137_v59  ;;  %v5767_v1 = vcombine.high %v134_v60, %v138_v61 }
  0x60   :  { %v5976_v52 = vcombine.low %v1302_v35, %v1306_v36 }
  0x62   :  { %946 = vmatpush1.bf16.msra.mxu0 %v5700_v5  ;;  %989 = vmatpush1.bf16.msra.mxu1 %v5702_v6  ;;  %v1338_v5 = vld [vmem:[%s8974_s3 + $0x5e0] sm:$0xff]  ;;  %v5764_v6 = vcombine.low %v133_v58, %v137_v59 }
  0x63   :  { %947 = vmatprep.subr.bf16.mxu0 %v5821_v7  ;;  %990 = vmatprep.subr.bf16.mxu1 %v5823_v8  ;;  %v5766_v7 = vcombine.low %v134_v60, %v138_v61  ;;  %v5881_v8 = vcombine.high %v1206_v2, %v1210_v3  ;;  %v6009_v9 = vcombine.high %v1334_v4, %v1338_v5  ;;  %v1286_v58 = vld [vmem:[%s8974_s3 + $0x440] sm:$0xff] }
  0x64   :  { %v1290_v59 = vld [vmem:[%s8974_s3 + $0x460] sm:$0xff] }
  0x66   :  { %948 = vmatpush2.bf16.msra.mxu0 %v5820_v14  ;;  %991 = vmatpush2.bf16.msra.mxu1 %v5822_v15  ;;  %v1330_v14 = vld [vmem:[%s8974_s3 + $0x5a0] sm:$0xff]  ;;  %v5880_v15 = vcombine.low %v1206_v2, %v1210_v3 }
  0x67   :  { %949 = vmatprep.subr.bf16.mxu0 %v5813_v16  ;;  %992 = vmatprep.subr.bf16.mxu1 %v5815_v17  ;;  %v6008_v16 = vcombine.low %v1334_v4, %v1338_v5  ;;  %v5873_v17 = vcombine.high %v1198_v11, %v1202_v12  ;;  %v6001_v18 = vcombine.high %v1326_v13, %v1330_v14  ;;  %v1278_v2 = vld [vmem:[%s8974_s3 + $0x400] sm:$0xff] }
  0x68   :  { %v1282_v3 = vld [vmem:[%s8974_s3 + $0x420] sm:$0xff]  ;;  %v5960_v5 = vcombine.low %v1286_v58, %v1290_v59 }
  0x6a   :  { %950 = vmatpush2.bf16.msra.mxu0 %v5812_v22  ;;  %993 = vmatpush2.bf16.msra.mxu1 %v5814_v23  ;;  %v1322_v22 = vld [vmem:[%s8974_s3 + $0x560] sm:$0xff]  ;;  %v5872_v23 = vcombine.low %v1198_v11, %v1202_v12 }
  0x6b   :  { %951 = vmatprep.subr.bf16.mxu0 %v5805_v24  ;;  %994 = vmatprep.subr.bf16.mxu1 %v5807_v25  ;;  %v6000_v24 = vcombine.low %v1326_v13, %v1330_v14  ;;  %v5865_v25 = vcombine.high %v1190_v19, %v1194_v20  ;;  %v5993_v26 = vcombine.high %v1318_v21, %v1322_v22  ;;  %v1398_v11 = vld [vmem:[%s8974_s3 + $0x7c0] sm:$0xff] }
  0x6c   :  { %v1402_v12 = vld [vmem:[%s8974_s3 + $0x7e0] sm:$0xff]  ;;  %v5952_v14 = vcombine.low %v1278_v2, %v1282_v3 }
  0x6e   :  { %952 = vmatpush2.bf16.msra.mxu0 %v5804_v30  ;;  %995 = vmatpush2.bf16.msra.mxu1 %v5806_v31  ;;  %v5864_v30 = vcombine.low %v1190_v19, %v1194_v20  ;;  %v5992_v31 = vcombine.low %v1318_v21, %v1322_v22  ;;  %v1390_v19 = vld [vmem:[%s8974_s3 + $0x780] sm:$0xff]  ;;  %v6072_v22 = vcombine.low %v1398_v11, %v1402_v12 }
  0x6f   :  { %953 = vmatprep.subr.bf16.mxu0 %v5797_v32  ;;  %996 = vmatprep.subr.bf16.mxu1 %v5799_v33  ;;  %v5857_v32 = vcombine.high %v1182_v27, %v1186_v28  ;;  %v1394_v20 = vld [vmem:[%s8974_s3 + $0x7a0] sm:$0xff] }
  0x72   :  { %954 = vmatpush2.bf16.msra.mxu0 %v5796_v37  ;;  %997 = vmatpush2.bf16.msra.mxu1 %v5798_v38  ;;  %v5856_v37 = vcombine.low %v1182_v27, %v1186_v28  ;;  %v1382_v27 = vld [vmem:[%s8974_s3 + $0x740] sm:$0xff] }
  0x73   :  { %955 = vmatprep.subr.bf16.mxu0 %v5789_v39  ;;  %998 = vmatprep.subr.bf16.mxu1 %v5791_v40  ;;  %v5849_v39 = vcombine.high %v1174_v34, %v1178_v56  ;;  %v1166_v40 = vld [vmem:[%s8974_s3 + $0x80] sm:$0xff] }
  0x74   :  { %v5840_v60 = vcombine.low %v1166_v40, %v1170_v41  ;;  %v1386_v28 = vld [vmem:[%s8974_s3 + $0x760] sm:$0xff] }
  0x75   :  { %v1374_v34 = vld [vmem:[%s8974_s3 + $0x700] sm:$0xff]  ;;  %v6056_v36 = vcombine.low %v1382_v27, %v1386_v28 }
  0x76   :  { %956 = vmatpush2.bf16.msra.mxu0 %v5788_v45  ;;  %999 = vmatpush2.bf16.msra.mxu1 %v5790_v46  ;;  %v7090_v45 = vld [vmem:[%s8974_s3 + $0xdc0] sm:$0xff] }
  0x77   :  { %957 = vmatprep.subr.bf16.mxu0 %v5781_v47  ;;  %1000 = vmatprep.subr.bf16.mxu1 %v5783_v48  ;;  %v1294_v46 = vld [vmem:[%s8974_s3 + $0x480] sm:$0xff] }
  0x78   :  { %v1298_v47 = vld [vmem:[%s8974_s3 + $0x4a0] sm:$0xff] }
  0x79   :  { %v7101_v48 = vld [vmem:[%s8974_s3 + $0xde0] sm:$0xff]  ;;  %v5968_v61 = vcombine.low %v1294_v46, %v1298_v47 }
  0x7a   :  { %958 = vmatpush2.bf16.msra.mxu0 %v5780_v53  ;;  %1001 = vmatpush2.bf16.msra.mxu1 %v5782_v54  ;;  %v6264_v51 = vcombine.low %v7090_v45, %v7101_v48  ;;  %v5841_v53 = vcombine.high %v1166_v40, %v1170_v41  ;;  %v5969_v54 = vcombine.high %v1294_v46, %v1298_v47  ;;  %v1378_v56 = vld [vmem:[%s8974_s3 + $0x720] sm:$0xff] }
  0x7b   :  { %959 = vmatprep.subr.bf16.mxu0 %v5773_v55  ;;  %1002 = vmatprep.subr.bf16.mxu1 %v5775_v57  ;;  %v1158_v55 = vld [vmem:[%s8974_s3 + $0x40] sm:$0xff]  ;;  %v6048_v47 = vcombine.low %v1374_v34, %v1378_v56 }
  0x7c   :  { %v1162_v57 = vld [vmem:[%s8974_s3 + $0x60] sm:$0xff] }
  0x7d   :  { %v5832_v4 = vcombine.low %v1158_v55, %v1162_v57  ;;  %v1242_v40 = vld [vmem:[%s8974_s3 + $0x2e0] sm:$0xff] }
  0x7e   :  { %960 = vmatpush2.bf16.msra.mxu0 %v5772_v62  ;;  %1003 = vmatpush2.bf16.msra.mxu1 %v5774_v63  ;;  %v5833_v62 = vcombine.high %v1158_v55, %v1162_v57  ;;  %v5961_v63 = vcombine.high %v1286_v58, %v1290_v59  ;;  %v1366_v41 = vld [vmem:[%s8974_s3 + $0x6c0] sm:$0xff] }
  0x7f   :  { %961 = vmatprep.subr.bf16.mxu0 %v5765_v0  ;;  %1004 = vmatprep.subr.bf16.mxu1 %v5767_v1  ;;  %v1150_v0 = vld [vmem:[%s8974_s3] sm:$0xff] }
  0x80   :  { %v1154_v1 = vld [vmem:[%s8974_s3 + $0x20] sm:$0xff] }
  0x81   :  { %v5824_v13 = vcombine.low %v1150_v0, %v1154_v1  ;;  %v1358_v55 = vld [vmem:[%s8974_s3 + $0x680] sm:$0xff] }
  0x82   :  { %962 = vmatpush2.bf16.msra.mxu0 %v5764_v6  ;;  %1005 = vmatpush2.bf16.msra.mxu1 %v5766_v7  ;;  %v5825_v6 = vcombine.high %v1150_v0, %v1154_v1  ;;  %v5953_v7 = vcombine.high %v1278_v2, %v1282_v3  ;;  %v1362_v57 = vld [vmem:[%s8974_s3 + $0x6a0] sm:$0xff] }
  0x83   :  { %4264 = vmatprep.subr.bf16.mxu0 %v5881_v8  ;;  %4307 = vmatprep.subr.bf16.mxu1 %v6009_v9  ;;  %v1270_v8 = vld [vmem:[%s8974_s3 + $0x3c0] sm:$0xff]  ;;  %v6032_v3 = vcombine.low %v1358_v55, %v1362_v57 }
  0x84   :  { %v1274_v9 = vld [vmem:[%s8974_s3 + $0x3e0] sm:$0xff] }
  0x85   :  { %964 = vmatmul.mubr.bf16.vlgmr.msra.gmra.mxu0 %v6829_v10  ;;  %1007 = vmatmul.mubr.bf16.vlgmr.msra.gmra.mxu1 %v6829_v10  ;;  %v1310_v10 = vld [vmem:[%s8974_s3 + $0x500] sm:$0xff]  ;;  %v5944_v21 = vcombine.low %v1270_v8, %v1274_v9 }
  0x86   :  { %4265 = vmatpush1.bf16.msra.mxu0 %v5880_v15  ;;  %4308 = vmatpush1.bf16.msra.mxu1 %v6008_v16  ;;  %v5985_v33 = vcombine.high %v1310_v10, %v1314_v29  ;;  %v5984_v38 = vcombine.low %v1310_v10, %v1314_v29  ;;  %v5945_v15 = vcombine.high %v1270_v8, %v1274_v9  ;;  %v1350_v0 = vld [vmem:[%s8974_s3 + $0x640] sm:$0xff] }
  0x87   :  { %4266 = vmatprep.subr.bf16.mxu0 %v5873_v17  ;;  %4309 = vmatprep.subr.bf16.mxu1 %v6001_v18  ;;  %v6073_v16 = vcombine.high %v1398_v11, %v1402_v12  ;;  %v1262_v17 = vld [vmem:[%s8974_s3 + $0x380] sm:$0xff]  ;;  %v6064_v29 = vcombine.low %v1390_v19, %v1394_v20 }
  0x88   :  { %v1266_v18 = vld [vmem:[%s8974_s3 + $0x3a0] sm:$0xff] }
  0x89   :  { %v5936_v10 = vcombine.low %v1262_v17, %v1266_v18  ;;  %v1354_v1 = vld [vmem:[%s8974_s3 + $0x660] sm:$0xff] }
  0x8a   :  { %4267 = vmatpush1.bf16.msra.mxu0 %v5872_v23  ;;  %4310 = vmatpush1.bf16.msra.mxu1 %v6000_v24  ;;  %v5937_v23 = vcombine.high %v1262_v17, %v1266_v18  ;;  %v6065_v24 = vcombine.high %v1390_v19, %v1394_v20  ;;  %v1342_v8 = vld [vmem:[%s8974_s3 + $0x600] sm:$0xff]  ;;  %v6024_v12 = vcombine.low %v1350_v0, %v1354_v1  ;;  %v1070_v19 = vlaneseq }
  0x8b   :  { %4268 = vmatprep.subr.bf16.mxu0 %v5865_v25  ;;  %4311 = vmatprep.subr.bf16.mxu1 %v5993_v26  ;;  %v1254_v25 = vld [vmem:[%s8974_s3 + $0x340] sm:$0xff]  ;;  %v6137_v17 = vcombine.high %v7080_v43, %v7085_v44  ;;  %v6265_v18 = vcombine.high %v7090_v45, %v7101_v48 }
  0x8c   :  { %v1258_v26 = vld [vmem:[%s8974_s3 + $0x360] sm:$0xff]  ;;  %v7232_v20 = vshrl.u32 %v1070_v19, 7 }
  0x8d   :  { %v5928_v35 = vcombine.low %v1254_v25, %v1258_v26  ;;  %v1346_v9 = vld [vmem:[%s8974_s3 + $0x620] sm:$0xff] }
  0x8e   :  { %4269 = vmatpush1.bf16.msra.mxu0 %v5864_v30  ;;  %4312 = vmatpush1.bf16.msra.mxu1 %v5992_v31  ;;  %v5929_v30 = vcombine.high %v1254_v25, %v1258_v26  ;;  %v6057_v31 = vcombine.high %v1382_v27, %v1386_v28  ;;  %v1080_v25 = vsub.s32 2, %v7232_v20  ;;  %v1566_v43 = vld [vmem:[%s8974_s3 + $0xd00] sm:$0xff] }
  0x8f   :  { %4270 = vmatprep.subr.bf16.mxu0 %v5857_v32  ;;  %4313 = vmatprep.subr.bf16.mxu1 %v5985_v33  ;;  %v1246_v32 = vld [vmem:[%s8974_s3 + $0x300] sm:$0xff] }
  0x90   :  { %v1250_v33 = vld [vmem:[%s8974_s3 + $0x320] sm:$0xff] }
  0x91   :  { %v5920_v46 = vcombine.low %v1246_v32, %v1250_v33  ;;  %v1570_v44 = vld [vmem:[%s8974_s3 + $0xd20] sm:$0xff] }
  0x92   :  { %4271 = vmatpush1.bf16.msra.mxu0 %v5856_v37  ;;  %4314 = vmatpush1.bf16.msra.mxu1 %v5984_v38  ;;  %v5921_v37 = vcombine.high %v1246_v32, %v1250_v33  ;;  %v6049_v38 = vcombine.high %v1374_v34, %v1378_v56 }
  0x93   :  { %4272 = vmatprep.subr.bf16.mxu0 %v5849_v39  ;;  %4315 = vmatprep.subr.bf16.mxu1 %v5977_v42  ;;  %v1238_v39 = vld [vmem:[%s8974_s3 + $0x2c0] sm:$0xff] }
  0x94   :  { %v1370_v42 = vld [vmem:[%s8974_s3 + $0x6e0] sm:$0xff]  ;;  %v5912_v58 = vcombine.low %v1238_v39, %v1242_v40 }
  0x95   :  { %v6040_v59 = vcombine.low %v1366_v41, %v1370_v42 }
  0x96   :  { %4273 = vmatpush1.bf16.msra.mxu0 %v5848_v49  ;;  %4316 = vmatpush1.bf16.msra.mxu1 %v5976_v52  ;;  %v5913_v49 = vcombine.high %v1238_v39, %v1242_v40  ;;  %v6041_v52 = vcombine.high %v1366_v41, %v1370_v42 }
  0x97   :  { %4274 = vmatprep.subr.bf16.mxu0 %v5841_v53  ;;  %4317 = vmatprep.subr.bf16.mxu1 %v5969_v54  ;;  %v1230_v53 = vld [vmem:[%s8974_s3 + $0x280] sm:$0xff] }
  0x98   :  { %v1234_v54 = vld [vmem:[%s8974_s3 + $0x2a0] sm:$0xff] }
  0x99   :  { %v5904_v2 = vcombine.low %v1230_v53, %v1234_v54 }
  0x9a   :  { %4275 = vmatpush1.bf16.msra.mxu0 %v5840_v60  ;;  %4318 = vmatpush1.bf16.msra.mxu1 %v5968_v61  ;;  %v5905_v60 = vcombine.high %v1230_v53, %v1234_v54  ;;  %v6033_v61 = vcombine.high %v1358_v55, %v1362_v57  ;;  %v1454_v54 = vld [vmem:[%s8974_s3 + $0x980] sm:$0xff] }
  0x9b   :  { %4276 = vmatprep.subr.bf16.mxu0 %v5833_v62  ;;  %4319 = vmatprep.subr.bf16.mxu1 %v5961_v63  ;;  %v1222_v62 = vld [vmem:[%s8974_s3 + $0x240] sm:$0xff] }
  0x9c   :  { %v1226_v63 = vld [vmem:[%s8974_s3 + $0x260] sm:$0xff] }
  0x9d   :  { %v5896_v11 = vcombine.low %v1222_v62, %v1226_v63  ;;  %v1458_v55 = vld [vmem:[%s8974_s3 + $0x9a0] sm:$0xff] }
  0x9e   :  { %4277 = vmatpush1.bf16.msra.mxu0 %v5832_v4  ;;  %4320 = vmatpush1.bf16.msra.mxu1 %v5960_v5  ;;  %v5897_v4 = vcombine.high %v1222_v62, %v1226_v63  ;;  %v6025_v5 = vcombine.high %v1350_v0, %v1354_v1 }
  0x9f   :  { %4278 = vmatprep.subr.bf16.mxu0 %v5825_v6  ;;  %4321 = vmatprep.subr.bf16.mxu1 %v5953_v7  ;;  %v1214_v6 = vld [vmem:[%s8974_s3 + $0x200] sm:$0xff] }
  0xa0   :  { %v1218_v7 = vld [vmem:[%s8974_s3 + $0x220] sm:$0xff] }
  0xa2   :  { %4279 = vmatpush1.bf16.msra.mxu0 %v5824_v13  ;;  %4322 = vmatpush1.bf16.msra.mxu1 %v5952_v14  ;;  %v5889_v13 = vcombine.high %v1214_v6, %v1218_v7  ;;  %v6017_v14 = vcombine.high %v1342_v8, %v1346_v9 }
  0xa3   :  { %4280 = vmatprep.subr.bf16.mxu0 %v5945_v15  ;;  %4323 = vmatprep.subr.bf16.mxu1 %v6073_v16  ;;  %v5888_v15 = vcombine.low %v1214_v6, %v1218_v7  ;;  %v6016_v16 = vcombine.low %v1342_v8, %v1346_v9  ;;  %v1450_v6 = vld [vmem:[%s8974_s3 + $0x960] sm:$0xff]  ;;  %v6128_v9 = vcombine.low %v1454_v54, %v1458_v55 }
  0xa4   :  { %v1574_v7 = vld [vmem:[%s8974_s3 + $0xd40] sm:$0xff] }
  0xa5   :  { %v1578_v8 = vld [vmem:[%s8974_s3 + $0xd60] sm:$0xff] }
  0xa6   :  { %4281 = vmatpush2.bf16.msra.mxu0 %v5944_v21  ;;  %4324 = vmatpush2.bf16.msra.mxu1 %v6072_v22  ;;  %v1076_v21 = vsub.s32 1, %v7232_v20  ;;  %v1072_v22 = vsub.s32 0, %v7232_v20  ;;  %v6248_v48 = vcombine.low %v1574_v7, %v1578_v8 }
  0xa7   :  { %4282 = vmatprep.subr.bf16.mxu0 %v5937_v23  ;;  %4325 = vmatprep.subr.bf16.mxu1 %v6065_v24  ;;  %v1084_v23 = vsub.s32 3, %v7232_v20  ;;  %v7240_v24 = vld [vmem:[%s8975_s2] sm:$0xff] }
  0xa8   :  { %v1077_v28 = vrot.slane %v7240_v24, %v1076_v21 }
  0xaa   :  { %4283 = vmatpush2.bf16.msra.mxu0 %v5936_v10  ;;  %4326 = vmatpush2.bf16.msra.mxu1 %v6064_v29  ;;  %v1073_v10 = vrot.slane %v7240_v24, %v1072_v22 }
  0xab   :  { %4284 = vmatprep.subr.bf16.mxu0 %v5929_v30  ;;  %4327 = vmatprep.subr.bf16.mxu1 %v6057_v31  ;;  %v1085_v30 = vrot.slane %v7240_v24, %v1084_v23  ;;  %v1081_v31 = vrot.slane %v7240_v24, %v1080_v25 }
  0xae   :  { %4285 = vmatpush2.bf16.msra.mxu0 %v5928_v35  ;;  %4328 = vmatpush2.bf16.msra.mxu1 %v6056_v36 }
  0xaf   :  { %4286 = vmatprep.subr.bf16.mxu0 %v5921_v37  ;;  %4329 = vmatprep.subr.bf16.mxu1 %v6049_v38 }
  0xb2   :  { %4287 = vmatpush2.bf16.msra.mxu0 %v5920_v46  ;;  %4330 = vmatpush2.bf16.msra.mxu1 %v6048_v47 }
  0xb3   :  { %4288 = vmatprep.subr.bf16.mxu0 %v5913_v49  ;;  %4331 = vmatprep.subr.bf16.mxu1 %v6041_v52 }
  0xb6   :  { %4289 = vmatpush2.bf16.msra.mxu0 %v5912_v58  ;;  %4332 = vmatpush2.bf16.msra.mxu1 %v6040_v59 }
  0xb7   :  { %4290 = vmatprep.subr.bf16.mxu0 %v5905_v60  ;;  %4333 = vmatprep.subr.bf16.mxu1 %v6033_v61  ;;  %v1582_v60 = vld [vmem:[%s8974_s3 + $0xd80] sm:$0xff] }
  0xb8   :  { %v1586_v61 = vld [vmem:[%s8974_s3 + $0xda0] sm:$0xff] }
  0xba   :  { %4291 = vmatpush2.bf16.msra.mxu0 %v5904_v2  ;;  %4334 = vmatpush2.bf16.msra.mxu1 %v6032_v3  ;;  %v6129_v2 = vcombine.high %v1454_v54, %v1458_v55  ;;  %v1538_v54 = vld [vmem:[%s8974_s3 + $0xc20] sm:$0xff] }
  0xbb   :  { %4292 = vmatprep.subr.bf16.mxu0 %v5897_v4  ;;  %4335 = vmatprep.subr.bf16.mxu1 %v6025_v5  ;;  %v6257_v4 = vcombine.high %v1582_v60, %v1586_v61  ;;  %v1446_v5 = vld [vmem:[%s8974_s3 + $0x940] sm:$0xff] }
  0xbc   :  { %v6120_v45 = vcombine.low %v1446_v5, %v1450_v6 }
  0xbe   :  { %4293 = vmatpush2.bf16.msra.mxu0 %v5896_v11  ;;  %4336 = vmatpush2.bf16.msra.mxu1 %v6024_v12  ;;  %v6256_v11 = vcombine.low %v1582_v60, %v1586_v61  ;;  %v6121_v12 = vcombine.high %v1446_v5, %v1450_v6  ;;  %v1526_v60 = vld [vmem:[%s8974_s3 + $0xbc0] sm:$0xff] }
  0xbf   :  { %4294 = vmatprep.subr.bf16.mxu0 %v5889_v13  ;;  %4337 = vmatprep.subr.bf16.mxu1 %v6017_v14  ;;  %v6249_v13 = vcombine.high %v1574_v7, %v1578_v8  ;;  %v1438_v14 = vld [vmem:[%s8974_s3 + $0x900] sm:$0xff] }
  0xc0   :  { %v1530_v61 = vld [vmem:[%s8974_s3 + $0xbe0] sm:$0xff] }
  0xc1   :  { %v6201_v6 = vcombine.high %v1526_v60, %v1530_v61  ;;  %v1518_v8 = vld [vmem:[%s8974_s3 + $0xb80] sm:$0xff] }
  0xc2   :  { %4295 = vmatpush2.bf16.msra.mxu0 %v5888_v15  ;;  %4338 = vmatpush2.bf16.msra.mxu1 %v6016_v16  ;;  %v1442_v15 = vld [vmem:[%s8974_s3 + $0x920] sm:$0xff] }
  0xc3   :  { %4350 = vmatprep.subr.bf16.mxu0 %v6137_v17  ;;  %4393 = vmatprep.subr.bf16.mxu1 %v6265_v18  ;;  %v1430_v16 = vld [vmem:[%s8974_s3 + $0x8c0] sm:$0xff] }
  0xc4   :  { %v1434_v17 = vld [vmem:[%s8974_s3 + $0x8e0] sm:$0xff] }
  0xc5   :  { %v1558_v18 = vld [vmem:[%s8974_s3 + $0xcc0] sm:$0xff] }
 0x105   :  { %v879_v26 = vpop.f32.mrf.mxu0  ;;  %v922_v27 = vpop.f32.mrf.mxu1 }
 0x106   :  { %v1110_v36 = vadd.f32 %v1073_v10, %v879_v26  ;;  %v1112_v40 = vadd.f32 %v1081_v31, %v922_v27  ;;  %v1562_v26 = vld [vmem:[%s8974_s3 + $0xce0] sm:$0xff]  ;;  %v6112_v27 = vcombine.low %v1438_v14, %v1442_v15 }
 0x107   :  { %v881_v29 = vpop.f32.mrf.mxu0  ;;  %v924_v32 = vpop.f32.mrf.mxu1 }
 0x108   :  { %v1111_v34 = vadd.f32 %v1077_v28, %v881_v29  ;;  %v1113_v37 = vadd.f32 %v1085_v30, %v924_v32  ;;  %v1126_v57 = vmax.f32 %v1110_v36, 0.0  ;;  %v1128_v62 = vmax.f32 %v1112_v40, 0.0  ;;  %v1550_v32 = vld [vmem:[%s8974_s3 + $0xc80] sm:$0xff] }
 0x109   :  { %v883_v33 = vpop.f32.mrf.mxu0  ;;  %v926_v35 = vpop.f32.mrf.mxu1  ;;  %v6233_v29 = vcombine.high %v1558_v18, %v1562_v26  ;;  %v1546_v40 = vld [vmem:[%s8974_s3 + $0xc60] sm:$0xff] }
 0x10a   :  { %v1118_v56 = vadd.f32 %v1073_v10, %v883_v33  ;;  %v1120_v38 = vadd.f32 %v1081_v31, %v926_v35  ;;  %v1127_v49 = vmax.f32 %v1111_v34, 0.0  ;;  %v1129_v58 = vmax.f32 %v1113_v37, 0.0  ;;  %v1426_v31 = vld [vmem:[%s8974_s3 + $0x8a0] sm:$0xff] }
 0x10b   :  { %v885_v39 = vpop.f32.mrf.mxu0  ;;  %v928_v42 = vpop.f32.mrf.mxu1  ;;  %v6105_v10 = vcombine.high %v1430_v16, %v1434_v17  ;;  %v1554_v33 = vld [vmem:[%s8974_s3 + $0xca0] sm:$0xff]  ;;  %v6104_v34 = vcombine.low %v1430_v16, %v1434_v17 }
 0x10c   :  { %v1119_v41 = vadd.f32 %v1077_v28, %v885_v39  ;;  %v1134_v46 = vmax.f32 %v1118_v56, 0.0  ;;  %v1121_v47 = vadd.f32 %v1085_v30, %v928_v42  ;;  %v1136_v52 = vmax.f32 %v1120_v38, 0.0  ;;  %v1422_v30 = vld [vmem:[%s8974_s3 + $0x880] sm:$0xff] }
 0x10d   :  { %v6240_v28 = vcombine.low %v1566_v43, %v1570_v44  ;;  %v6232_v56 = vcombine.low %v1558_v18, %v1562_v26  ;;  %v6097_v35 = vcombine.high %v1422_v30, %v1426_v31  ;;  %v6225_v36 = vcombine.high %v1550_v32, %v1554_v33  ;;  %v1414_v37 = vld [vmem:[%s8974_s3 + $0x840] sm:$0xff] }
 0x10e   :  { %v1135_v53 = vmax.f32 %v1119_v41, 0.0  ;;  %v1137_v59 = vmax.f32 %v1121_v47, 0.0  ;;  %v7269_v0 = vpack.c.bf16 %v1134_v46, %v1126_v57  ;;  %v7273_v3 = vpack.c.bf16 %v1136_v52, %v1128_v62  ;;  %v1418_v38 = vld [vmem:[%s8974_s3 + $0x860] sm:$0xff] }
 0x10f   :  { %v1542_v39 = vld [vmem:[%s8974_s3 + $0xc40] sm:$0xff]  ;;  %v6096_v41 = vcombine.low %v1422_v30, %v1426_v31  ;;  %v6224_v42 = vcombine.low %v1550_v32, %v1554_v33  ;;  %v6089_v46 = vcombine.high %v1414_v37, %v1418_v38  ;;  %v6088_v55 = vcombine.low %v1414_v37, %v1418_v38 }
 0x110   :  { %v7267_v63 = vpack.c.bf16 %v1135_v53, %v1127_v49  ;;  %v7271_v1 = vpack.c.bf16 %v1137_v59, %v1129_v58  ;;  %v6217_v47 = vcombine.high %v1542_v39, %v1546_v40  ;;  %v1406_v49 = vld [vmem:[%s8974_s3 + $0x800] sm:$0xff]  ;;  %v6216_v57 = vcombine.low %v1542_v39, %v1546_v40 }
 0x111   :  { %v1410_v52 = vld [vmem:[%s8974_s3 + $0x820] sm:$0xff] }
 0x112   :  { %4296 = vmatprep.mubr.bf16.mxu0 %v7267_v63  ;;  %4339 = vmatprep.mubr.bf16.mxu1 %v7271_v1  ;;  %v1534_v53 = vld [vmem:[%s8974_s3 + $0xc00] sm:$0xff]  ;;  %v6081_v58 = vcombine.high %v1406_v49, %v1410_v52 }
 0x113   :  { %4297 = vmatmul.mubr.bf16.vlgmr.msra.gmra.mxu0 %v7269_v0  ;;  %4340 = vmatmul.mubr.bf16.vlgmr.msra.gmra.mxu1 %v7273_v3  ;;  %v6209_v59 = vcombine.high %v1534_v53, %v1538_v54  ;;  %v1654_v62 = vld [vmem:[%s8974_s3 + $0xfc0] sm:$0xff]  ;;  %v6208_v5 = vcombine.low %v1534_v53, %v1538_v54  ;;  %v1092_v54 = vsub.s32 5, %v7232_v20 }
 0x114   :  { %4351 = vmatpush1.bf16.msra.mxu0 %v6136_v50  ;;  %4394 = vmatpush1.bf16.msra.mxu1 %v6264_v51  ;;  %v6113_v50 = vcombine.high %v1438_v14, %v1442_v15  ;;  %v6241_v51 = vcombine.high %v1566_v43, %v1570_v44  ;;  %v1510_v44 = vld [vmem:[%s8974_s3 + $0xb40] sm:$0xff] }
 0x115   :  { %4352 = vmatprep.subr.bf16.mxu0 %v6129_v2  ;;  %4395 = vmatprep.subr.bf16.mxu1 %v6257_v4  ;;  %v1658_v2 = vld [vmem:[%s8974_s3 + $0xfe0] sm:$0xff]  ;;  %v6080_v4 = vcombine.low %v1406_v49, %v1410_v52 }
 0x116   :  { %v6329_v7 = vcombine.high %v1654_v62, %v1658_v2  ;;  %v6328_v14 = vcombine.low %v1654_v62, %v1658_v2  ;;  %v1502_v26 = vld [vmem:[%s8974_s3 + $0xb00] sm:$0xff]  ;;  %v1096_v62 = vsub.s32 6, %v7232_v20 }
 0x117   :  { %v1494_v33 = vld [vmem:[%s8974_s3 + $0xac0] sm:$0xff] }
 0x118   :  { %4353 = vmatpush1.bf16.msra.mxu0 %v6128_v9  ;;  %4396 = vmatpush1.bf16.msra.mxu1 %v6256_v11  ;;  %v1522_v9 = vld [vmem:[%s8974_s3 + $0xba0] sm:$0xff] }
 0x119   :  { %4354 = vmatprep.subr.bf16.mxu0 %v6121_v12  ;;  %4397 = vmatprep.subr.bf16.mxu1 %v6249_v13  ;;  %v1646_v11 = vld [vmem:[%s8974_s3 + $0xf80] sm:$0xff]  ;;  %v6200_v13 = vcombine.low %v1526_v60, %v1530_v61  ;;  %v6193_v15 = vcombine.high %v1518_v8, %v1522_v9 }
 0x11a   :  { %v1650_v12 = vld [vmem:[%s8974_s3 + $0xfa0] sm:$0xff] }
 0x11b   :  { %v6321_v43 = vcombine.high %v1646_v11, %v1650_v12  ;;  %v6320_v16 = vcombine.low %v1646_v11, %v1650_v12  ;;  %v1486_v40 = vld [vmem:[%s8974_s3 + $0xa80] sm:$0xff] }
 0x11c   :  { %4355 = vmatpush1.bf16.msra.mxu0 %v6120_v45  ;;  %4398 = vmatpush1.bf16.msra.mxu1 %v6248_v48  ;;  %v1514_v45 = vld [vmem:[%s8974_s3 + $0xb60] sm:$0xff] }
 0x11d   :  { %4356 = vmatprep.subr.bf16.mxu0 %v6113_v50  ;;  %4399 = vmatprep.subr.bf16.mxu1 %v6241_v51  ;;  %v1638_v48 = vld [vmem:[%s8974_s3 + $0xf40] sm:$0xff]  ;;  %v6192_v51 = vcombine.low %v1518_v8, %v1522_v9  ;;  %v6185_v17 = vcombine.high %v1510_v44, %v1514_v45  ;;  %v1093_v8 = vrot.slane %v7240_v24, %v1092_v54 }
 0x11e   :  { %v1642_v50 = vld [vmem:[%s8974_s3 + $0xf60] sm:$0xff] }
 0x11f   :  { %v6313_v18 = vcombine.high %v1638_v48, %v1642_v50  ;;  %v6312_v30 = vcombine.low %v1638_v48, %v1642_v50  ;;  %v1606_v60 = vld [vmem:[%s8974_s3 + $0xe40] sm:$0xff] }
 0x120   :  { %4357 = vmatpush1.bf16.msra.mxu0 %v6112_v27  ;;  %4400 = vmatpush1.bf16.msra.mxu1 %v6240_v28  ;;  %v1506_v27 = vld [vmem:[%s8974_s3 + $0xb20] sm:$0xff] }
 0x121   :  { %4358 = vmatprep.subr.bf16.mxu0 %v6105_v10  ;;  %4401 = vmatprep.subr.bf16.mxu1 %v6233_v29  ;;  %v1630_v28 = vld [vmem:[%s8974_s3 + $0xf00] sm:$0xff]  ;;  %v6184_v29 = vcombine.low %v1510_v44, %v1514_v45  ;;  %v6177_v31 = vcombine.high %v1502_v26, %v1506_v27  ;;  %v1097_v45 = vrot.slane %v7240_v24, %v1096_v62 }
 0x122   :  { %v1634_v10 = vld [vmem:[%s8974_s3 + $0xf20] sm:$0xff] }
 0x123   :  { %v6305_v32 = vcombine.high %v1630_v28, %v1634_v10  ;;  %v6304_v37 = vcombine.low %v1630_v28, %v1634_v10  ;;  %v1610_v61 = vld [vmem:[%s8974_s3 + $0xe60] sm:$0xff]  ;;  %v1207_v10 = vld [vmem:[%s8974_s3 + $0x1c8] sm:$0xff] }
 0x124   :  { %4359 = vmatpush1.bf16.msra.mxu0 %v6104_v34  ;;  %4402 = vmatpush1.bf16.msra.mxu1 %v6232_v56  ;;  %v1498_v34 = vld [vmem:[%s8974_s3 + $0xae0] sm:$0xff]  ;;  %v6281_v9 = vcombine.high %v1606_v60, %v1610_v61 }
 0x125   :  { %4360 = vmatprep.subr.bf16.mxu0 %v6097_v35  ;;  %4403 = vmatprep.subr.bf16.mxu1 %v6225_v36  ;;  %v1622_v56 = vld [vmem:[%s8974_s3 + $0xec0] sm:$0xff]  ;;  %v6176_v36 = vcombine.low %v1502_v26, %v1506_v27  ;;  %v6169_v38 = vcombine.high %v1494_v33, %v1498_v34 }
 0x126   :  { %v1626_v35 = vld [vmem:[%s8974_s3 + $0xee0] sm:$0xff] }
 0x127   :  { %v6297_v39 = vcombine.high %v1622_v56, %v1626_v35  ;;  %v6296_v49 = vcombine.low %v1622_v56, %v1626_v35  ;;  %v1470_v11 = vld [vmem:[%s8974_s3 + $0xa00] sm:$0xff] }
 0x128   :  { %4361 = vmatpush1.bf16.msra.mxu0 %v6096_v41  ;;  %4404 = vmatpush1.bf16.msra.mxu1 %v6224_v42  ;;  %v1490_v41 = vld [vmem:[%s8974_s3 + $0xaa0] sm:$0xff] }
 0x129   :  { %4362 = vmatprep.subr.bf16.mxu0 %v6089_v46  ;;  %4405 = vmatprep.subr.bf16.mxu1 %v6217_v47  ;;  %v1614_v42 = vld [vmem:[%s8974_s3 + $0xe80] sm:$0xff]  ;;  %v6168_v47 = vcombine.low %v1494_v33, %v1498_v34  ;;  %v6161_v52 = vcombine.high %v1486_v40, %v1490_v41  ;;  %v6160_v2 = vcombine.low %v1486_v40, %v1490_v41  ;;  %v1335_v33 = vld [vmem:[%s8974_s3 + $0x5c8] sm:$0xff] }
 0x12a   :  { %v1618_v46 = vld [vmem:[%s8974_s3 + $0xea0] sm:$0xff]  ;;  %v1339_v34 = vld [vmem:[%s8974_s3 + $0x5e8] sm:$0xff] }
 0x12b   :  { %v6289_v53 = vcombine.high %v1614_v42, %v1618_v46  ;;  %v1474_v12 = vld [vmem:[%s8974_s3 + $0xa20] sm:$0xff] }
 0x12c   :  { %4363 = vmatpush1.bf16.msra.mxu0 %v6088_v55  ;;  %4406 = vmatpush1.bf16.msra.mxu1 %v6216_v57  ;;  %v1478_v55 = vld [vmem:[%s8974_s3 + $0xa40] sm:$0xff] }
 0x12d   :  { %4364 = vmatprep.subr.bf16.mxu0 %v6081_v58  ;;  %4407 = vmatprep.subr.bf16.mxu1 %v6209_v59  ;;  %v1482_v57 = vld [vmem:[%s8974_s3 + $0xa60] sm:$0xff]  ;;  %v1088_v58 = vsub.s32 4, %v7232_v20  ;;  %v1100_v59 = vsub.s32 7, %v7232_v20 }
 0x12e   :  { %v1602_v44 = vld [vmem:[%s8974_s3 + $0xe20] sm:$0xff]  ;;  %v6152_v50 = vcombine.low %v1478_v55, %v1482_v57 }
 0x130   :  { %4365 = vmatpush1.bf16.msra.mxu0 %v6080_v4  ;;  %4408 = vmatpush1.bf16.msra.mxu1 %v6208_v5  ;;  %v6288_v5 = vcombine.low %v1614_v42, %v1618_v46 }
 0x131   :  { %4366 = vmatprep.subr.bf16.mxu0 %v6201_v6  ;;  %4409 = vmatprep.subr.bf16.mxu1 %v6329_v7  ;;  %v6153_v6 = vcombine.high %v1478_v55, %v1482_v57  ;;  %v1199_v57 = vld [vmem:[%s8974_s3 + $0x188] sm:$0xff] }
 0x134   :  { %4367 = vmatpush2.bf16.msra.mxu0 %v6200_v13  ;;  %4410 = vmatpush2.bf16.msra.mxu1 %v6328_v14  ;;  %v1089_v13 = vrot.slane %v7240_v24, %v1088_v58 }
 0x135   :  { %4368 = vmatprep.subr.bf16.mxu0 %v6193_v15  ;;  %4411 = vmatprep.subr.bf16.mxu1 %v6321_v43  ;;  %v1101_v15 = vrot.slane %v7240_v24, %v1100_v59  ;;  %v1598_v43 = vld [vmem:[%s8974_s3 + $0xe00] sm:$0xff]  ;;  %v1211_v24 = vld [vmem:[%s8974_s3 + $0x1e8] sm:$0xff] }
 0x136   :  { %v6273_v28 = vcombine.high %v1598_v43, %v1602_v44  ;;  %v6272_v40 = vcombine.low %v1598_v43, %v1602_v44  ;;  %v5883_v41 = vcombine.high %v1207_v10, %v1211_v24  ;;  %v1319_v43 = vld [vmem:[%s8974_s3 + $0x548] sm:$0xff] }
 0x137   :  { %v1323_v44 = vld [vmem:[%s8974_s3 + $0x568] sm:$0xff] }
 0x138   :  { %4369 = vmatpush2.bf16.msra.mxu0 %v6192_v51  ;;  %4412 = vmatpush2.bf16.msra.mxu1 %v6320_v16  ;;  %v6280_v16 = vcombine.low %v1606_v60, %v1610_v61  ;;  %v1203_v60 = vld [vmem:[%s8974_s3 + $0x1a8] sm:$0xff] }
 0x139   :  { %4370 = vmatprep.subr.bf16.mxu0 %v6185_v17  ;;  %4413 = vmatprep.subr.bf16.mxu1 %v6313_v18  ;;  %v6145_v17 = vcombine.high %v1470_v11, %v1474_v12 }
 0x13c   :  { %4371 = vmatpush2.bf16.msra.mxu0 %v6184_v29  ;;  %4414 = vmatpush2.bf16.msra.mxu1 %v6312_v30 }
 0x13d   :  { %4372 = vmatprep.subr.bf16.mxu0 %v6177_v31  ;;  %4415 = vmatprep.subr.bf16.mxu1 %v6305_v32 }
 0x140   :  { %4373 = vmatpush2.bf16.msra.mxu0 %v6176_v36  ;;  %4416 = vmatpush2.bf16.msra.mxu1 %v6304_v37  ;;  %v6144_v37 = vcombine.low %v1470_v11, %v1474_v12  ;;  %v5875_v12 = vcombine.high %v1199_v57, %v1203_v60 }
 0x141   :  { %4374 = vmatprep.subr.bf16.mxu0 %v6169_v38  ;;  %4417 = vmatprep.subr.bf16.mxu1 %v6297_v39 }
 0x144   :  { %4375 = vmatpush2.bf16.msra.mxu0 %v6168_v47  ;;  %4418 = vmatpush2.bf16.msra.mxu1 %v6296_v49  ;;  %v6011_v49 = vcombine.high %v1335_v33, %v1339_v34 }
 0x145   :  { %v965_v4 = vpop.f32.mrf.mxu0  ;;  %4376 = vmatprep.subr.bf16.mxu0 %v6161_v52  ;;  %v1008_v7 = vpop.f32.mrf.mxu1  ;;  %4419 = vmatprep.subr.bf16.mxu1 %v6289_v53 }
 0x146   :  { %v1114_v29 = vadd.f32 %v1089_v13, %v965_v4  ;;  %v1116_v56 = vadd.f32 %v1097_v45, %v1008_v7  ;;  %v5882_v4 = vcombine.low %v1207_v10, %v1211_v24 }
 0x147   :  { %v967_v14 = vpop.f32.mrf.mxu0  ;;  %v1010_v48 = vpop.f32.mrf.mxu1 }
 0x148   :  { %4377 = vmatpush2.bf16.msra.mxu0 %v6160_v2  ;;  %4420 = vmatpush2.bf16.msra.mxu1 %v6288_v5  ;;  %v1115_v18 = vadd.f32 %v1093_v8, %v967_v14  ;;  %v1117_v30 = vadd.f32 %v1101_v15, %v1010_v48  ;;  %v1130_v52 = vmax.f32 %v1114_v29, 0.0  ;;  %v1132_v61 = vmax.f32 %v1116_v56, 0.0  ;;  %v1327_v5 = vld [vmem:[%s8974_s3 + $0x588] sm:$0xff] }
 0x149   :  { %v969_v51 = vpop.f32.mrf.mxu0  ;;  %4378 = vmatprep.subr.bf16.mxu0 %v6153_v6  ;;  %v1012_v27 = vpop.f32.mrf.mxu1  ;;  %4421 = vmatprep.subr.bf16.mxu1 %v6281_v9  ;;  %v1331_v6 = vld [vmem:[%s8974_s3 + $0x5a8] sm:$0xff]  ;;  %v6010_v9 = vcombine.low %v1335_v33, %v1339_v34 }
 0x14a   :  { %v1122_v26 = vadd.f32 %v1089_v13, %v969_v51  ;;  %v1124_v31 = vadd.f32 %v1097_v45, %v1012_v27  ;;  %v1131_v42 = vmax.f32 %v1115_v18, 0.0  ;;  %v1133_v53 = vmax.f32 %v1117_v30, 0.0  ;;  %v1191_v13 = vld [vmem:[%s8974_s3 + $0x148] sm:$0xff] }
 0x14b   :  { %v971_v32 = vpop.f32.mrf.mxu0  ;;  %v1014_v36 = vpop.f32.mrf.mxu1  ;;  %v1195_v14 = vld [vmem:[%s8974_s3 + $0x168] sm:$0xff]  ;;  %v5874_v45 = vcombine.low %v1199_v57, %v1203_v60  ;;  %v6002_v48 = vcombine.low %v1327_v5, %v1331_v6  ;;  %v5995_v51 = vcombine.high %v1319_v43, %v1323_v44 }
 0x14c   :  { %v1123_v35 = vadd.f32 %v1093_v8, %v971_v32  ;;  %4379 = vmatpush2.bf16.msra.mxu0 %v6152_v50  ;;  %v1138_v38 = vmax.f32 %v1122_v26, 0.0  ;;  %v1125_v39 = vadd.f32 %v1101_v15, %v1014_v36  ;;  %4422 = vmatpush2.bf16.msra.mxu1 %v6280_v16  ;;  %v1140_v46 = vmax.f32 %v1124_v31, 0.0  ;;  %v1183_v16 = vld [vmem:[%s8974_s3 + $0x108] sm:$0xff] }
 0x14d   :  { %4380 = vmatprep.subr.bf16.mxu0 %v6145_v17  ;;  %4423 = vmatprep.subr.bf16.mxu1 %v6273_v28  ;;  %v6003_v15 = vcombine.high %v1327_v5, %v1331_v6  ;;  %v5867_v50 = vcombine.high %v1191_v13, %v1195_v14  ;;  %v1187_v17 = vld [vmem:[%s8974_s3 + $0x128] sm:$0xff]  ;;  %v5866_v27 = vcombine.low %v1191_v13, %v1195_v14 }
 0x14e   :  { %v1139_v47 = vmax.f32 %v1123_v35, 0.0  ;;  %v1141_v55 = vmax.f32 %v1125_v39, 0.0  ;;  %v7495_v7 = vpack.c.bf16 %v1138_v38, %v1130_v52  ;;  %v7499_v11 = vpack.c.bf16 %v1140_v46, %v1132_v61  ;;  %v1311_v18 = vld [vmem:[%s8974_s3 + $0x508] sm:$0xff] }
 0x14f   :  { %v1315_v26 = vld [vmem:[%s8974_s3 + $0x528] sm:$0xff]  ;;  %v5994_v28 = vcombine.low %v1319_v43, %v1323_v44  ;;  %v5859_v10 = vcombine.high %v1183_v16, %v1187_v17  ;;  %v5858_v33 = vcombine.low %v1183_v16, %v1187_v17 }
 0x150   :  { %v7487_v2 = vpack.c.bf16 %v1139_v47, %v1131_v42  ;;  %4381 = vmatpush2.bf16.msra.mxu0 %v6144_v37  ;;  %v7497_v8 = vpack.c.bf16 %v1141_v55, %v1133_v53  ;;  %4424 = vmatpush2.bf16.msra.mxu1 %v6272_v40  ;;  %v5987_v24 = vcombine.high %v1311_v18, %v1315_v26  ;;  %v1175_v29 = vld [vmem:[%s8974_s3 + $0xc8] sm:$0xff] }
 0x151   :  { %4436 = vmatprep.subr.bf16.mxu0 %v5883_v41  ;;  %4479 = vmatprep.subr.bf16.mxu1 %v6011_v49  ;;  %v1179_v30 = vld [vmem:[%s8974_s3 + $0xe8] sm:$0xff]  ;;  %v5986_v34 = vcombine.low %v1311_v18, %v1315_v26 }
 0x152   :  { %4382 = vmatprep.mubr.bf16.mxu0 %v7487_v2  ;;  %4425 = vmatprep.mubr.bf16.mxu1 %v7497_v8  ;;  %v1303_v31 = vld [vmem:[%s8974_s3 + $0x4c8] sm:$0xff]  ;;  %v5851_v56 = vcombine.high %v1175_v29, %v1179_v30  ;;  %v5850_v40 = vcombine.low %v1175_v29, %v1179_v30 }
 0x153   :  { %4383 = vmatmul.mubr.bf16.vlgmr.msra.gmra.mxu0 %v7495_v7  ;;  %4426 = vmatmul.mubr.bf16.vlgmr.msra.gmra.mxu1 %v7499_v11  ;;  %v1307_v32 = vld [vmem:[%s8974_s3 + $0x4e8] sm:$0xff] }
 0x154   :  { %4437 = vmatpush1.bf16.msra.mxu0 %v5882_v4  ;;  %4480 = vmatpush1.bf16.msra.mxu1 %v6010_v9  ;;  %v5979_v35 = vcombine.high %v1303_v31, %v1307_v32  ;;  %v1167_v36 = vld [vmem:[%s8974_s3 + $0x88] sm:$0xff]  ;;  %v5978_v41 = vcombine.low %v1303_v31, %v1307_v32 }
 0x155   :  { %4468 = vmatprep.mubr.bf16.mxu0 %v7267_v63  ;;  %4511 = vmatprep.mubr.bf16.mxu1 %v7271_v1  ;;  %v1171_v37 = vld [vmem:[%s8974_s3 + $0xa8] sm:$0xff] }
 0x156   :  { %4438 = vmatprep.subr.bf16.mxu0 %v5875_v12  ;;  %4481 = vmatprep.subr.bf16.mxu1 %v6003_v15  ;;  %v1295_v38 = vld [vmem:[%s8974_s3 + $0x488] sm:$0xff]  ;;  %v5843_v42 = vcombine.high %v1167_v36, %v1171_v37  ;;  %v5842_v55 = vcombine.low %v1167_v36, %v1171_v37 }
 0x157   :  { %v1299_v39 = vld [vmem:[%s8974_s3 + $0x4a8] sm:$0xff] }
 0x158   :  { %4439 = vmatpush1.bf16.msra.mxu0 %v5874_v45  ;;  %4482 = vmatpush1.bf16.msra.mxu1 %v6002_v48  ;;  %v5971_v46 = vcombine.high %v1295_v38, %v1299_v39  ;;  %v1159_v47 = vld [vmem:[%s8974_s3 + $0x48] sm:$0xff]  ;;  %v5970_v57 = vcombine.low %v1295_v38, %v1299_v39 }
 0x159   :  { %4440 = vmatprep.subr.bf16.mxu0 %v5867_v50  ;;  %4483 = vmatprep.subr.bf16.mxu1 %v5995_v51  ;;  %v1163_v49 = vld [vmem:[%s8974_s3 + $0x68] sm:$0xff] }
 0x15a   :  { %v1287_v52 = vld [vmem:[%s8974_s3 + $0x448] sm:$0xff]  ;;  %v5835_v60 = vcombine.high %v1159_v47, %v1163_v49  ;;  %v5834_v12 = vcombine.low %v1159_v47, %v1163_v49 }
 0x15b   :  { %v1291_v53 = vld [vmem:[%s8974_s3 + $0x468] sm:$0xff] }
 0x15c   :  { %4441 = vmatpush1.bf16.msra.mxu0 %v5866_v27  ;;  %4484 = vmatpush1.bf16.msra.mxu1 %v5994_v28  ;;  %v5963_v61 = vcombine.high %v1287_v52, %v1291_v53  ;;  %v1151_v4 = vld [vmem:[%s8974_s3 + $0x8] sm:$0xff]  ;;  %v5962_v13 = vcombine.low %v1287_v52, %v1291_v53 }
 0x15d   :  { %4442 = vmatprep.subr.bf16.mxu0 %v5859_v10  ;;  %4485 = vmatprep.subr.bf16.mxu1 %v5987_v24  ;;  %v1155_v5 = vld [vmem:[%s8974_s3 + $0x28] sm:$0xff] }
 0x15e   :  { %v1279_v6 = vld [vmem:[%s8974_s3 + $0x408] sm:$0xff]  ;;  %v5827_v14 = vcombine.high %v1151_v4, %v1155_v5  ;;  %v5826_v50 = vcombine.low %v1151_v4, %v1155_v5 }
 0x15f   :  { %v1283_v9 = vld [vmem:[%s8974_s3 + $0x428] sm:$0xff] }
 0x160   :  { %4443 = vmatpush1.bf16.msra.mxu0 %v5858_v33  ;;  %4486 = vmatpush1.bf16.msra.mxu1 %v5986_v34  ;;  %v5955_v15 = vcombine.high %v1279_v6, %v1283_v9  ;;  %v1271_v43 = vld [vmem:[%s8974_s3 + $0x3c8] sm:$0xff]  ;;  %v5954_v51 = vcombine.low %v1279_v6, %v1283_v9 }
 0x161   :  { %4444 = vmatprep.subr.bf16.mxu0 %v5851_v56  ;;  %4487 = vmatprep.subr.bf16.mxu1 %v5979_v35  ;;  %v1275_v44 = vld [vmem:[%s8974_s3 + $0x3e8] sm:$0xff] }
 0x162   :  { %v1399_v45 = vld [vmem:[%s8974_s3 + $0x7c8] sm:$0xff]  ;;  %v5947_v16 = vcombine.high %v1271_v43, %v1275_v44  ;;  %v5946_v10 = vcombine.low %v1271_v43, %v1275_v44 }
 0x163   :  { %v1403_v48 = vld [vmem:[%s8974_s3 + $0x7e8] sm:$0xff] }
 0x164   :  { %4445 = vmatpush1.bf16.msra.mxu0 %v5850_v40  ;;  %4488 = vmatpush1.bf16.msra.mxu1 %v5978_v41  ;;  %v6075_v17 = vcombine.high %v1399_v45, %v1403_v48  ;;  %v1263_v18 = vld [vmem:[%s8974_s3 + $0x388] sm:$0xff]  ;;  %v6074_v24 = vcombine.low %v1399_v45, %v1403_v48 }
 0x165   :  { %4446 = vmatprep.subr.bf16.mxu0 %v5843_v42  ;;  %4489 = vmatprep.subr.bf16.mxu1 %v5971_v46  ;;  %v1267_v26 = vld [vmem:[%s8974_s3 + $0x3a8] sm:$0xff] }
 0x166   :  { %v1391_v27 = vld [vmem:[%s8974_s3 + $0x788] sm:$0xff]  ;;  %v5939_v29 = vcombine.high %v1263_v18, %v1267_v26  ;;  %v5938_v56 = vcombine.low %v1263_v18, %v1267_v26 }
 0x167   :  { %v1395_v28 = vld [vmem:[%s8974_s3 + $0x7a8] sm:$0xff] }
 0x168   :  { %4447 = vmatpush1.bf16.msra.mxu0 %v5842_v55  ;;  %4490 = vmatpush1.bf16.msra.mxu1 %v5970_v57  ;;  %v6067_v30 = vcombine.high %v1391_v27, %v1395_v28  ;;  %v1255_v31 = vld [vmem:[%s8974_s3 + $0x348] sm:$0xff]  ;;  %v6066_v35 = vcombine.low %v1391_v27, %v1395_v28 }
 0x169   :  { %4448 = vmatprep.subr.bf16.mxu0 %v5835_v60  ;;  %4491 = vmatprep.subr.bf16.mxu1 %v5963_v61  ;;  %v1259_v32 = vld [vmem:[%s8974_s3 + $0x368] sm:$0xff] }
 0x16a   :  { %v1383_v33 = vld [vmem:[%s8974_s3 + $0x748] sm:$0xff]  ;;  %v5931_v36 = vcombine.high %v1255_v31, %v1259_v32  ;;  %v5930_v42 = vcombine.low %v1255_v31, %v1259_v32 }
 0x16b   :  { %v1387_v34 = vld [vmem:[%s8974_s3 + $0x768] sm:$0xff] }
 0x16c   :  { %4449 = vmatpush1.bf16.msra.mxu0 %v5834_v12  ;;  %4492 = vmatpush1.bf16.msra.mxu1 %v5962_v13  ;;  %v6059_v37 = vcombine.high %v1383_v33, %v1387_v34  ;;  %v1247_v38 = vld [vmem:[%s8974_s3 + $0x308] sm:$0xff]  ;;  %v6058_v46 = vcombine.low %v1383_v33, %v1387_v34 }
 0x16d   :  { %4450 = vmatprep.subr.bf16.mxu0 %v5827_v14  ;;  %4493 = vmatprep.subr.bf16.mxu1 %v5955_v15  ;;  %v1251_v39 = vld [vmem:[%s8974_s3 + $0x328] sm:$0xff] }
 0x16e   :  { %v1375_v40 = vld [vmem:[%s8974_s3 + $0x708] sm:$0xff]  ;;  %v5923_v47 = vcombine.high %v1247_v38, %v1251_v39  ;;  %v5922_v60 = vcombine.low %v1247_v38, %v1251_v39 }
 0x16f   :  { %v1379_v41 = vld [vmem:[%s8974_s3 + $0x728] sm:$0xff] }
 0x170   :  { %4451 = vmatpush1.bf16.msra.mxu0 %v5826_v50  ;;  %4494 = vmatpush1.bf16.msra.mxu1 %v5954_v51  ;;  %v6051_v49 = vcombine.high %v1375_v40, %v1379_v41  ;;  %v1239_v52 = vld [vmem:[%s8974_s3 + $0x2c8] sm:$0xff]  ;;  %v6050_v61 = vcombine.low %v1375_v40, %v1379_v41 }
 0x171   :  { %4452 = vmatprep.subr.bf16.mxu0 %v5947_v16  ;;  %4495 = vmatprep.subr.bf16.mxu1 %v6075_v17  ;;  %v1243_v53 = vld [vmem:[%s8974_s3 + $0x2e8] sm:$0xff] }
 0x172   :  { %v1367_v55 = vld [vmem:[%s8974_s3 + $0x6c8] sm:$0xff]  ;;  %v5915_v4 = vcombine.high %v1239_v52, %v1243_v53  ;;  %v5914_v14 = vcombine.low %v1239_v52, %v1243_v53 }
 0x173   :  { %v1371_v57 = vld [vmem:[%s8974_s3 + $0x6e8] sm:$0xff] }
 0x174   :  { %4453 = vmatpush2.bf16.msra.mxu0 %v5946_v10  ;;  %4496 = vmatpush2.bf16.msra.mxu1 %v6074_v24  ;;  %v6043_v5 = vcombine.high %v1367_v55, %v1371_v57  ;;  %v1231_v6 = vld [vmem:[%s8974_s3 + $0x288] sm:$0xff]  ;;  %v6042_v15 = vcombine.low %v1367_v55, %v1371_v57 }
 0x175   :  { %4454 = vmatprep.subr.bf16.mxu0 %v5939_v29  ;;  %4497 = vmatprep.subr.bf16.mxu1 %v6067_v30  ;;  %v1235_v9 = vld [vmem:[%s8974_s3 + $0x2a8] sm:$0xff] }
 0x176   :  { %v1359_v12 = vld [vmem:[%s8974_s3 + $0x688] sm:$0xff]  ;;  %v5907_v43 = vcombine.high %v1231_v6, %v1235_v9  ;;  %v5906_v16 = vcombine.low %v1231_v6, %v1235_v9 }
 0x177   :  { %v1363_v13 = vld [vmem:[%s8974_s3 + $0x6a8] sm:$0xff] }
 0x178   :  { %4455 = vmatpush2.bf16.msra.mxu0 %v5938_v56  ;;  %4498 = vmatpush2.bf16.msra.mxu1 %v6066_v35  ;;  %v6035_v44 = vcombine.high %v1359_v12, %v1363_v13  ;;  %v1223_v45 = vld [vmem:[%s8974_s3 + $0x248] sm:$0xff]  ;;  %v6034_v17 = vcombine.low %v1359_v12, %v1363_v13 }
 0x179   :  { %4456 = vmatprep.subr.bf16.mxu0 %v5931_v36  ;;  %4499 = vmatprep.subr.bf16.mxu1 %v6059_v37  ;;  %v1227_v48 = vld [vmem:[%s8974_s3 + $0x268] sm:$0xff] }
 0x17a   :  { %v1351_v50 = vld [vmem:[%s8974_s3 + $0x648] sm:$0xff]  ;;  %v5899_v18 = vcombine.high %v1223_v45, %v1227_v48  ;;  %v5898_v29 = vcombine.low %v1223_v45, %v1227_v48 }
 0x17b   :  { %v1355_v51 = vld [vmem:[%s8974_s3 + $0x668] sm:$0xff] }
 0x17c   :  { %4457 = vmatpush2.bf16.msra.mxu0 %v5930_v42  ;;  %4500 = vmatpush2.bf16.msra.mxu1 %v6058_v46  ;;  %v6027_v26 = vcombine.high %v1351_v50, %v1355_v51  ;;  %v1215_v27 = vld [vmem:[%s8974_s3 + $0x208] sm:$0xff]  ;;  %v6026_v30 = vcombine.low %v1351_v50, %v1355_v51 }
 0x17d   :  { %4458 = vmatprep.subr.bf16.mxu0 %v5923_v47  ;;  %4501 = vmatprep.subr.bf16.mxu1 %v6051_v49  ;;  %v1219_v28 = vld [vmem:[%s8974_s3 + $0x228] sm:$0xff] }
 0x17e   :  { %v1343_v10 = vld [vmem:[%s8974_s3 + $0x608] sm:$0xff]  ;;  %v5891_v31 = vcombine.high %v1215_v27, %v1219_v28  ;;  %v5890_v36 = vcombine.low %v1215_v27, %v1219_v28 }
 0x17f   :  { %v1347_v24 = vld [vmem:[%s8974_s3 + $0x628] sm:$0xff] }
 0x180   :  { %4459 = vmatpush2.bf16.msra.mxu0 %v5922_v60  ;;  %4502 = vmatpush2.bf16.msra.mxu1 %v6050_v61  ;;  %v6019_v32 = vcombine.high %v1343_v10, %v1347_v24  ;;  %v1463_v33 = vld [vmem:[%s8974_s3 + $0x9c8] sm:$0xff]  ;;  %v6018_v37 = vcombine.low %v1343_v10, %v1347_v24 }
 0x181   :  { %4460 = vmatprep.subr.bf16.mxu0 %v5915_v4  ;;  %4503 = vmatprep.subr.bf16.mxu1 %v6043_v5  ;;  %v1467_v34 = vld [vmem:[%s8974_s3 + $0x9e8] sm:$0xff] }
 0x182   :  { %v1591_v56 = vld [vmem:[%s8974_s3 + $0xdc8] sm:$0xff]  ;;  %v6139_v38 = vcombine.high %v1463_v33, %v1467_v34  ;;  %v6138_v42 = vcombine.low %v1463_v33, %v1467_v34 }
 0x183   :  { %v1595_v35 = vld [vmem:[%s8974_s3 + $0xde8] sm:$0xff] }
 0x184   :  { %4461 = vmatpush2.bf16.msra.mxu0 %v5914_v14  ;;  %4504 = vmatpush2.bf16.msra.mxu1 %v6042_v15  ;;  %v6267_v39 = vcombine.high %v1591_v56, %v1595_v35  ;;  %v1455_v40 = vld [vmem:[%s8974_s3 + $0x988] sm:$0xff]  ;;  %v6266_v49 = vcombine.low %v1591_v56, %v1595_v35 }
 0x185   :  { %4462 = vmatprep.subr.bf16.mxu0 %v5907_v43  ;;  %4505 = vmatprep.subr.bf16.mxu1 %v6035_v44  ;;  %v1459_v41 = vld [vmem:[%s8974_s3 + $0x9a8] sm:$0xff] }
 0x186   :  { %v1583_v46 = vld [vmem:[%s8974_s3 + $0xd88] sm:$0xff]  ;;  %v6131_v52 = vcombine.high %v1455_v40, %v1459_v41  ;;  %v6130_v4 = vcombine.low %v1455_v40, %v1459_v41 }
 0x187   :  { %v1587_v47 = vld [vmem:[%s8974_s3 + $0xda8] sm:$0xff] }
 0x188   :  { %4463 = vmatpush2.bf16.msra.mxu0 %v5906_v16  ;;  %4506 = vmatpush2.bf16.msra.mxu1 %v6034_v17  ;;  %v1447_v53 = vld [vmem:[%s8974_s3 + $0x948] sm:$0xff]  ;;  %v6259_v57 = vcombine.high %v1583_v46, %v1587_v47  ;;  %v6258_v5 = vcombine.low %v1583_v46, %v1587_v47 }
 0x189   :  { %4464 = vmatprep.subr.bf16.mxu0 %v5899_v18  ;;  %4507 = vmatprep.subr.bf16.mxu1 %v6027_v26  ;;  %v1451_v55 = vld [vmem:[%s8974_s3 + $0x968] sm:$0xff] }
 0x18a   :  { %v1575_v60 = vld [vmem:[%s8974_s3 + $0xd48] sm:$0xff]  ;;  %v6123_v6 = vcombine.high %v1447_v53, %v1451_v55  ;;  %v6122_v43 = vcombine.low %v1447_v53, %v1451_v55 }
 0x18b   :  { %v1579_v61 = vld [vmem:[%s8974_s3 + $0xd68] sm:$0xff] }
 0x18c   :  { %4465 = vmatpush2.bf16.msra.mxu0 %v5898_v29  ;;  %4508 = vmatpush2.bf16.msra.mxu1 %v6026_v30  ;;  %v6251_v9 = vcombine.high %v1575_v60, %v1579_v61  ;;  %v1439_v12 = vld [vmem:[%s8974_s3 + $0x908] sm:$0xff]  ;;  %v6250_v44 = vcombine.low %v1575_v60, %v1579_v61 }
 0x18d   :  { %4466 = vmatprep.subr.bf16.mxu0 %v5891_v31  ;;  %4509 = vmatprep.subr.bf16.mxu1 %v6019_v32  ;;  %v1443_v13 = vld [vmem:[%s8974_s3 + $0x928] sm:$0xff] }
 0x18e   :  { %v1567_v14 = vld [vmem:[%s8974_s3 + $0xd08] sm:$0xff]  ;;  %v6115_v45 = vcombine.high %v1439_v12, %v1443_v13  ;;  %v6114_v18 = vcombine.low %v1439_v12, %v1443_v13 }
 0x18f   :  { %v1571_v15 = vld [vmem:[%s8974_s3 + $0xd28] sm:$0xff] }
 0x190   :  { %4467 = vmatpush2.bf16.msra.mxu0 %v5890_v36  ;;  %4510 = vmatpush2.bf16.msra.mxu1 %v6018_v37  ;;  %v6243_v48 = vcombine.high %v1567_v14, %v1571_v15  ;;  %v1431_v50 = vld [vmem:[%s8974_s3 + $0x8c8] sm:$0xff]  ;;  %v6242_v26 = vcombine.low %v1567_v14, %v1571_v15 }
 0x191   :  { %4522 = vmatprep.subr.bf16.mxu0 %v6139_v38  ;;  %4565 = vmatprep.subr.bf16.mxu1 %v6267_v39  ;;  %v1435_v51 = vld [vmem:[%s8974_s3 + $0x8e8] sm:$0xff] }
 0x192   :  { %v1559_v16 = vld [vmem:[%s8974_s3 + $0xcc8] sm:$0xff]  ;;  %v6107_v27 = vcombine.high %v1431_v50, %v1435_v51  ;;  %v6106_v31 = vcombine.low %v1431_v50, %v1435_v51 }
 0x193   :  { %4469 = vmatmul.mubr.bf16.vlgmr.msra.gmra.mxu0 %v7269_v0  ;;  %4512 = vmatmul.mubr.bf16.vlgmr.msra.gmra.mxu1 %v7273_v3  ;;  %v1563_v17 = vld [vmem:[%s8974_s3 + $0xce8] sm:$0xff] }
 0x194   :  { %4523 = vmatpush1.bf16.msra.mxu0 %v6138_v42  ;;  %4554 = vmatprep.mubr.bf16.mxu0 %v7487_v2  ;;  %v6235_v28 = vcombine.high %v1559_v16, %v1563_v17  ;;  %v1423_v10 = vld [vmem:[%s8974_s3 + $0x888] sm:$0xff]  ;;  %v6234_v32 = vcombine.low %v1559_v16, %v1563_v17 }
 0x195   :  { %4566 = vmatpush1.bf16.msra.mxu1 %v6266_v49  ;;  %4597 = vmatprep.mubr.bf16.mxu1 %v7497_v8  ;;  %v1427_v24 = vld [vmem:[%s8974_s3 + $0x8a8] sm:$0xff] }
 0x196   :  { %4524 = vmatprep.subr.bf16.mxu0 %v6131_v52  ;;  %4567 = vmatprep.subr.bf16.mxu1 %v6259_v57  ;;  %v1551_v29 = vld [vmem:[%s8974_s3 + $0xc88] sm:$0xff]  ;;  %v6099_v33 = vcombine.high %v1423_v10, %v1427_v24  ;;  %v6098_v38 = vcombine.low %v1423_v10, %v1427_v24 }
 0x197   :  { %v1555_v30 = vld [vmem:[%s8974_s3 + $0xca8] sm:$0xff] }
 0x198   :  { %4525 = vmatpush1.bf16.msra.mxu0 %v6130_v4  ;;  %v6227_v34 = vcombine.high %v1551_v29, %v1555_v30  ;;  %v1415_v56 = vld [vmem:[%s8974_s3 + $0x848] sm:$0xff]  ;;  %v6226_v39 = vcombine.low %v1551_v29, %v1555_v30 }
 0x199   :  { %4568 = vmatpush1.bf16.msra.mxu1 %v6258_v5  ;;  %4526 = vmatprep.subr.bf16.mxu0 %v6123_v6  ;;  %v1419_v35 = vld [vmem:[%s8974_s3 + $0x868] sm:$0xff] }
 0x19a   :  { %4569 = vmatprep.subr.bf16.mxu1 %v6251_v9  ;;  %v1543_v36 = vld [vmem:[%s8974_s3 + $0xc48] sm:$0xff]  ;;  %v6091_v40 = vcombine.high %v1415_v56, %v1419_v35  ;;  %v6090_v52 = vcombine.low %v1415_v56, %v1419_v35 }
 0x19b   :  { %v1547_v37 = vld [vmem:[%s8974_s3 + $0xc68] sm:$0xff] }
 0x19c   :  { %4527 = vmatpush1.bf16.msra.mxu0 %v6122_v43  ;;  %v6219_v41 = vcombine.high %v1543_v36, %v1547_v37  ;;  %v1407_v42 = vld [vmem:[%s8974_s3 + $0x808] sm:$0xff]  ;;  %v6218_v53 = vcombine.low %v1543_v36, %v1547_v37 }
 0x19d   :  { %4570 = vmatpush1.bf16.msra.mxu1 %v6250_v44  ;;  %4528 = vmatprep.subr.bf16.mxu0 %v6115_v45  ;;  %v1411_v46 = vld [vmem:[%s8974_s3 + $0x828] sm:$0xff] }
 0x19e   :  { %4571 = vmatprep.subr.bf16.mxu1 %v6243_v48  ;;  %v1535_v47 = vld [vmem:[%s8974_s3 + $0xc08] sm:$0xff]  ;;  %v6083_v55 = vcombine.high %v1407_v42, %v1411_v46  ;;  %v6082_v6 = vcombine.low %v1407_v42, %v1411_v46 }
 0x19f   :  { %v1539_v49 = vld [vmem:[%s8974_s3 + $0xc28] sm:$0xff] }
 0x1a0   :  { %4529 = vmatpush1.bf16.msra.mxu0 %v6114_v18  ;;  %v6211_v57 = vcombine.high %v1535_v47, %v1539_v49  ;;  %v1527_v60 = vld [vmem:[%s8974_s3 + $0xbc8] sm:$0xff]  ;;  %v6210_v9 = vcombine.low %v1535_v47, %v1539_v49 }
 0x1a1   :  { %4572 = vmatpush1.bf16.msra.mxu1 %v6242_v26  ;;  %4530 = vmatprep.subr.bf16.mxu0 %v6107_v27  ;;  %v1531_v61 = vld [vmem:[%s8974_s3 + $0xbe8] sm:$0xff] }
 0x1a2   :  { %4573 = vmatprep.subr.bf16.mxu1 %v6235_v28  ;;  %v1655_v4 = vld [vmem:[%s8974_s3 + $0xfc8] sm:$0xff]  ;;  %v6203_v12 = vcombine.high %v1527_v60, %v1531_v61  ;;  %v6202_v45 = vcombine.low %v1527_v60, %v1531_v61 }
 0x1a3   :  { %v1659_v5 = vld [vmem:[%s8974_s3 + $0xfe8] sm:$0xff] }
 0x1a4   :  { %4531 = vmatpush1.bf16.msra.mxu0 %v6106_v31  ;;  %v6331_v13 = vcombine.high %v1655_v4, %v1659_v5  ;;  %v1519_v14 = vld [vmem:[%s8974_s3 + $0xb88] sm:$0xff]  ;;  %v6330_v48 = vcombine.low %v1655_v4, %v1659_v5 }
 0x1a5   :  { %4574 = vmatpush1.bf16.msra.mxu1 %v6234_v32  ;;  %4532 = vmatprep.subr.bf16.mxu0 %v6099_v33  ;;  %v1523_v15 = vld [vmem:[%s8974_s3 + $0xba8] sm:$0xff] }
 0x1a6   :  { %4575 = vmatprep.subr.bf16.mxu1 %v6227_v34  ;;  %v1647_v43 = vld [vmem:[%s8974_s3 + $0xf88] sm:$0xff]  ;;  %v6195_v50 = vcombine.high %v1519_v14, %v1523_v15  ;;  %v6194_v27 = vcombine.low %v1519_v14, %v1523_v15 }
 0x1a7   :  { %v1651_v44 = vld [vmem:[%s8974_s3 + $0xfa8] sm:$0xff] }
 0x1a8   :  { %4533 = vmatpush1.bf16.msra.mxu0 %v6098_v38  ;;  %v6323_v51 = vcombine.high %v1647_v43, %v1651_v44  ;;  %v1511_v16 = vld [vmem:[%s8974_s3 + $0xb48] sm:$0xff]  ;;  %v6322_v28 = vcombine.low %v1647_v43, %v1651_v44 }
 0x1a9   :  { %4576 = vmatpush1.bf16.msra.mxu1 %v6226_v39  ;;  %4534 = vmatprep.subr.bf16.mxu0 %v6091_v40  ;;  %v1515_v17 = vld [vmem:[%s8974_s3 + $0xb68] sm:$0xff] }
 0x1aa   :  { %4577 = vmatprep.subr.bf16.mxu1 %v6219_v41  ;;  %v1639_v18 = vld [vmem:[%s8974_s3 + $0xf48] sm:$0xff]  ;;  %v6187_v10 = vcombine.high %v1511_v16, %v1515_v17  ;;  %v6186_v33 = vcombine.low %v1511_v16, %v1515_v17 }
 0x1ab   :  { %v1643_v26 = vld [vmem:[%s8974_s3 + $0xf68] sm:$0xff] }
 0x1ac   :  { %4535 = vmatpush1.bf16.msra.mxu0 %v6090_v52  ;;  %v6315_v24 = vcombine.high %v1639_v18, %v1643_v26  ;;  %v1503_v29 = vld [vmem:[%s8974_s3 + $0xb08] sm:$0xff]  ;;  %v6314_v34 = vcombine.low %v1639_v18, %v1643_v26  ;;  %v1208_v18 = vld [vmem:[%s8974_s3 + $0x1d0] sm:$0xff] }
 0x1ad   :  { %4578 = vmatpush1.bf16.msra.mxu1 %v6218_v53  ;;  %4536 = vmatprep.subr.bf16.mxu0 %v6083_v55  ;;  %v1507_v30 = vld [vmem:[%s8974_s3 + $0xb28] sm:$0xff]  ;;  %v1212_v26 = vld [vmem:[%s8974_s3 + $0x1f0] sm:$0xff] }
 0x1ae   :  { %4579 = vmatprep.subr.bf16.mxu1 %v6211_v57  ;;  %v1631_v31 = vld [vmem:[%s8974_s3 + $0xf08] sm:$0xff]  ;;  %v6179_v56 = vcombine.high %v1503_v29, %v1507_v30  ;;  %v6178_v40 = vcombine.low %v1503_v29, %v1507_v30  ;;  %v5885_v29 = vcombine.high %v1208_v18, %v1212_v26 }
 0x1af   :  { %v1635_v32 = vld [vmem:[%s8974_s3 + $0xf28] sm:$0xff] }
 0x1b0   :  { %4537 = vmatpush1.bf16.msra.mxu0 %v6082_v6  ;;  %v6307_v35 = vcombine.high %v1631_v31, %v1635_v32  ;;  %v1495_v36 = vld [vmem:[%s8974_s3 + $0xac8] sm:$0xff]  ;;  %v6306_v41 = vcombine.low %v1631_v31, %v1635_v32  ;;  %v1200_v31 = vld [vmem:[%s8974_s3 + $0x190] sm:$0xff] }
 0x1b1   :  { %4580 = vmatpush1.bf16.msra.mxu1 %v6210_v9  ;;  %4538 = vmatprep.subr.bf16.mxu0 %v6203_v12  ;;  %v1499_v37 = vld [vmem:[%s8974_s3 + $0xae8] sm:$0xff]  ;;  %v1204_v32 = vld [vmem:[%s8974_s3 + $0x1b0] sm:$0xff] }
 0x1b2   :  { %4581 = vmatprep.subr.bf16.mxu1 %v6331_v13  ;;  %v1623_v38 = vld [vmem:[%s8974_s3 + $0xec8] sm:$0xff]  ;;  %v6171_v42 = vcombine.high %v1495_v36, %v1499_v37  ;;  %v6170_v55 = vcombine.low %v1495_v36, %v1499_v37  ;;  %v5877_v36 = vcombine.high %v1200_v31, %v1204_v32  ;;  %v1192_v37 = vld [vmem:[%s8974_s3 + $0x150] sm:$0xff] }
 0x1b3   :  { %v1627_v39 = vld [vmem:[%s8974_s3 + $0xee8] sm:$0xff] }
 0x1b4   :  { %4539 = vmatpush2.bf16.msra.mxu0 %v6202_v45  ;;  %v6299_v46 = vcombine.high %v1623_v38, %v1627_v39  ;;  %v1487_v47 = vld [vmem:[%s8974_s3 + $0xa88] sm:$0xff]  ;;  %v6298_v57 = vcombine.low %v1623_v38, %v1627_v39  ;;  %v1196_v38 = vld [vmem:[%s8974_s3 + $0x170] sm:$0xff] }
 0x1b5   :  { %4582 = vmatpush2.bf16.msra.mxu1 %v6330_v48  ;;  %4540 = vmatprep.subr.bf16.mxu0 %v6195_v50  ;;  %v1491_v49 = vld [vmem:[%s8974_s3 + $0xaa8] sm:$0xff] }
 0x1b6   :  { %4583 = vmatprep.subr.bf16.mxu1 %v6323_v51  ;;  %v1615_v52 = vld [vmem:[%s8974_s3 + $0xe88] sm:$0xff]  ;;  %v6163_v60 = vcombine.high %v1487_v47, %v1491_v49  ;;  %v6162_v12 = vcombine.low %v1487_v47, %v1491_v49  ;;  %v5869_v47 = vcombine.high %v1192_v37, %v1196_v38 }
 0x1b7   :  { %v1619_v53 = vld [vmem:[%s8974_s3 + $0xea8] sm:$0xff] }
 0x1b8   :  { %4541 = vmatpush2.bf16.msra.mxu0 %v6194_v27  ;;  %v6291_v61 = vcombine.high %v1615_v52, %v1619_v53  ;;  %v1479_v4 = vld [vmem:[%s8974_s3 + $0xa48] sm:$0xff]  ;;  %v6290_v13 = vcombine.low %v1615_v52, %v1619_v53  ;;  %v1336_v27 = vld [vmem:[%s8974_s3 + $0x5d0] sm:$0xff] }
 0x1b9   :  { %4584 = vmatpush2.bf16.msra.mxu1 %v6322_v28  ;;  %4542 = vmatprep.subr.bf16.mxu0 %v6187_v10  ;;  %v1483_v5 = vld [vmem:[%s8974_s3 + $0xa68] sm:$0xff]  ;;  %v1340_v28 = vld [vmem:[%s8974_s3 + $0x5f0] sm:$0xff] }
 0x1ba   :  { %4585 = vmatprep.subr.bf16.mxu1 %v6315_v24  ;;  %v1607_v6 = vld [vmem:[%s8974_s3 + $0xe48] sm:$0xff]  ;;  %v6155_v14 = vcombine.high %v1479_v4, %v1483_v5  ;;  %v6154_v50 = vcombine.low %v1479_v4, %v1483_v5  ;;  %v6013_v30 = vcombine.high %v1336_v27, %v1340_v28  ;;  %v1184_v52 = vld [vmem:[%s8974_s3 + $0x110] sm:$0xff] }
 0x1bb   :  { %v1611_v9 = vld [vmem:[%s8974_s3 + $0xe68] sm:$0xff]  ;;  %v1188_v53 = vld [vmem:[%s8974_s3 + $0x130] sm:$0xff] }
 0x1bc   :  { %4543 = vmatpush2.bf16.msra.mxu0 %v6186_v33  ;;  %v6283_v15 = vcombine.high %v1607_v6, %v1611_v9  ;;  %v1471_v43 = vld [vmem:[%s8974_s3 + $0xa08] sm:$0xff]  ;;  %v6282_v51 = vcombine.low %v1607_v6, %v1611_v9  ;;  %v5884_v33 = vcombine.low %v1208_v18, %v1212_v26  ;;  %v5861_v4 = vcombine.high %v1184_v52, %v1188_v53  ;;  %v1176_v6 = vld [vmem:[%s8974_s3 + $0xd0] sm:$0xff] }
 0x1bd   :  { %4586 = vmatpush2.bf16.msra.mxu1 %v6314_v34  ;;  %4544 = vmatprep.subr.bf16.mxu0 %v6179_v56  ;;  %v1475_v44 = vld [vmem:[%s8974_s3 + $0xa28] sm:$0xff]  ;;  %v1328_v34 = vld [vmem:[%s8974_s3 + $0x590] sm:$0xff] }
 0x1be   :  { %4587 = vmatprep.subr.bf16.mxu1 %v6307_v35  ;;  %v1599_v45 = vld [vmem:[%s8974_s3 + $0xe08] sm:$0xff]  ;;  %v6147_v16 = vcombine.high %v1471_v43, %v1475_v44  ;;  %v6146_v10 = vcombine.low %v1471_v43, %v1475_v44  ;;  %v1332_v56 = vld [vmem:[%s8974_s3 + $0x5b0] sm:$0xff]  ;;  %v6012_v35 = vcombine.low %v1336_v27, %v1340_v28 }
 0x1bf   :  { %v1603_v48 = vld [vmem:[%s8974_s3 + $0xe28] sm:$0xff]  ;;  %v6005_v39 = vcombine.high %v1328_v34, %v1332_v56  ;;  %v1180_v9 = vld [vmem:[%s8974_s3 + $0xf0] sm:$0xff] }
 0x1c0   :  { %4545 = vmatpush2.bf16.msra.mxu0 %v6178_v40  ;;  %v6275_v17 = vcombine.high %v1599_v45, %v1603_v48  ;;  %v6274_v24 = vcombine.low %v1599_v45, %v1603_v48  ;;  %v1320_v40 = vld [vmem:[%s8974_s3 + $0x550] sm:$0xff]  ;;  %v5853_v43 = vcombine.high %v1176_v6, %v1180_v9 }
 0x1c1   :  { %4588 = vmatpush2.bf16.msra.mxu1 %v6306_v41  ;;  %4546 = vmatprep.subr.bf16.mxu0 %v6171_v42  ;;  %v1324_v41 = vld [vmem:[%s8974_s3 + $0x570] sm:$0xff]  ;;  %v5876_v42 = vcombine.low %v1200_v31, %v1204_v32 }
 0x1c2   :  { %4589 = vmatprep.subr.bf16.mxu1 %v6299_v46  ;;  %v6004_v46 = vcombine.low %v1328_v34, %v1332_v56  ;;  %v5997_v49 = vcombine.high %v1320_v40, %v1324_v41  ;;  %v1168_v45 = vld [vmem:[%s8974_s3 + $0x90] sm:$0xff] }
 0x1c3   :  { %v1172_v48 = vld [vmem:[%s8974_s3 + $0xb0] sm:$0xff] }
 0x1c4   :  { %4547 = vmatpush2.bf16.msra.mxu0 %v6170_v55  ;;  %v1312_v55 = vld [vmem:[%s8974_s3 + $0x510] sm:$0xff]  ;;  %v5845_v18 = vcombine.high %v1168_v45, %v1172_v48 }
 0x1c5   :  { %4590 = vmatpush2.bf16.msra.mxu1 %v6298_v57  ;;  %4548 = vmatprep.subr.bf16.mxu0 %v6163_v60  ;;  %v1316_v57 = vld [vmem:[%s8974_s3 + $0x530] sm:$0xff]  ;;  %v5868_v60 = vcombine.low %v1192_v37, %v1196_v38 }
 0x1c6   :  { %4591 = vmatprep.subr.bf16.mxu1 %v6291_v61  ;;  %v5996_v61 = vcombine.low %v1320_v40, %v1324_v41  ;;  %v5989_v5 = vcombine.high %v1312_v55, %v1316_v57  ;;  %v1160_v27 = vld [vmem:[%s8974_s3 + $0x50] sm:$0xff] }
 0x1c7   :  { %v1164_v28 = vld [vmem:[%s8974_s3 + $0x70] sm:$0xff] }
 0x1c8   :  { %4549 = vmatpush2.bf16.msra.mxu0 %v6162_v12  ;;  %v1304_v12 = vld [vmem:[%s8974_s3 + $0x4d0] sm:$0xff]  ;;  %v5837_v31 = vcombine.high %v1160_v27, %v1164_v28 }
 0x1c9   :  { %4592 = vmatpush2.bf16.msra.mxu1 %v6290_v13  ;;  %4550 = vmatprep.subr.bf16.mxu0 %v6155_v14  ;;  %v1308_v13 = vld [vmem:[%s8974_s3 + $0x4f0] sm:$0xff]  ;;  %v5860_v14 = vcombine.low %v1184_v52, %v1188_v53 }
 0x1ca   :  { %4593 = vmatprep.subr.bf16.mxu1 %v6283_v15  ;;  %v5988_v15 = vcombine.low %v1312_v55, %v1316_v57  ;;  %v5981_v44 = vcombine.high %v1304_v12, %v1308_v13  ;;  %v1156_v34 = vld [vmem:[%s8974_s3 + $0x30] sm:$0xff] }
 0x1cb   :  { %v1280_v56 = vld [vmem:[%s8974_s3 + $0x410] sm:$0xff] }
 0x1cc   :  { %4551 = vmatpush2.bf16.msra.mxu0 %v6154_v50  ;;  %v1296_v50 = vld [vmem:[%s8974_s3 + $0x490] sm:$0xff] }
 0x1cd   :  { %4594 = vmatpush2.bf16.msra.mxu1 %v6282_v51  ;;  %4552 = vmatprep.subr.bf16.mxu0 %v6147_v16  ;;  %v1300_v51 = vld [vmem:[%s8974_s3 + $0x4b0] sm:$0xff]  ;;  %v5852_v16 = vcombine.low %v1176_v6, %v1180_v9 }
 0x1ce   :  { %4595 = vmatprep.subr.bf16.mxu1 %v6275_v17  ;;  %v5980_v17 = vcombine.low %v1304_v12, %v1308_v13  ;;  %v5973_v26 = vcombine.high %v1296_v50, %v1300_v51  ;;  %v1272_v40 = vld [vmem:[%s8974_s3 + $0x3d0] sm:$0xff] }
 0x1cf   :  { %v1276_v41 = vld [vmem:[%s8974_s3 + $0x3f0] sm:$0xff] }
 0x1d0   :  { %4553 = vmatpush2.bf16.msra.mxu0 %v6146_v10  ;;  %v1288_v10 = vld [vmem:[%s8974_s3 + $0x450] sm:$0xff]  ;;  %v5949_v52 = vcombine.high %v1272_v40, %v1276_v41 }
 0x1d1   :  { %4596 = vmatpush2.bf16.msra.mxu1 %v6274_v24  ;;  %4608 = vmatprep.subr.bf16.mxu0 %v5885_v29  ;;  %v1292_v24 = vld [vmem:[%s8974_s3 + $0x470] sm:$0xff]  ;;  %v5844_v29 = vcombine.low %v1168_v45, %v1172_v48 }
 0x1d2   :  { %4651 = vmatprep.subr.bf16.mxu1 %v6013_v30  ;;  %v5972_v30 = vcombine.low %v1296_v50, %v1300_v51  ;;  %v5965_v32 = vcombine.high %v1288_v10, %v1292_v24  ;;  %v5964_v37 = vcombine.low %v1288_v10, %v1292_v24  ;;  %v1264_v55 = vld [vmem:[%s8974_s3 + $0x390] sm:$0xff] }
 0x1d3   :  { %4555 = vmatmul.mubr.bf16.vlgmr.msra.gmra.mxu0 %v7495_v7  ;;  %v1268_v57 = vld [vmem:[%s8974_s3 + $0x3b0] sm:$0xff] }
 0x1d4   :  { %4598 = vmatmul.mubr.bf16.vlgmr.msra.gmra.mxu1 %v7499_v11  ;;  %4609 = vmatpush1.bf16.msra.mxu0 %v5884_v33  ;;  %v1152_v33 = vld [vmem:[%s8974_s3 + $0x10] sm:$0xff]  ;;  %v5941_v6 = vcombine.high %v1264_v55, %v1268_v57 }
 0x1d5   :  { %4640 = vmatprep.mubr.bf16.mxu0 %v7267_v63  ;;  %4652 = vmatpush1.bf16.msra.mxu1 %v6012_v35  ;;  %v1284_v35 = vld [vmem:[%s8974_s3 + $0x430] sm:$0xff]  ;;  %v5829_v38 = vcombine.high %v1152_v33, %v1156_v34 }
 0x1d6   :  { %4683 = vmatprep.mubr.bf16.mxu1 %v7271_v1  ;;  %4610 = vmatprep.subr.bf16.mxu0 %v5877_v36  ;;  %v5836_v36 = vcombine.low %v1160_v27, %v1164_v28  ;;  %v1256_v12 = vld [vmem:[%s8974_s3 + $0x350] sm:$0xff] }
 0x1d7   :  { %4653 = vmatprep.subr.bf16.mxu1 %v6005_v39  ;;  %v5957_v39 = vcombine.high %v1280_v56, %v1284_v35  ;;  %v1260_v13 = vld [vmem:[%s8974_s3 + $0x370] sm:$0xff] }
 0x1d8   :  { %4611 = vmatpush1.bf16.msra.mxu0 %v5876_v42  ;;  %v1400_v42 = vld [vmem:[%s8974_s3 + $0x7d0] sm:$0xff]  ;;  %v5933_v45 = vcombine.high %v1256_v12, %v1260_v13 }
 0x1d9   :  { %4654 = vmatpush1.bf16.msra.mxu1 %v6004_v46  ;;  %4612 = vmatprep.subr.bf16.mxu0 %v5869_v47  ;;  %v1404_v46 = vld [vmem:[%s8974_s3 + $0x7f0] sm:$0xff]  ;;  %v5828_v47 = vcombine.low %v1152_v33, %v1156_v34 }
 0x1da   :  { %4655 = vmatprep.subr.bf16.mxu1 %v5997_v49  ;;  %v5956_v49 = vcombine.low %v1280_v56, %v1284_v35  ;;  %v6077_v53 = vcombine.high %v1400_v42, %v1404_v46  ;;  %v1248_v50 = vld [vmem:[%s8974_s3 + $0x310] sm:$0xff] }
 0x1db   :  { %v1252_v51 = vld [vmem:[%s8974_s3 + $0x330] sm:$0xff] }
 0x1dc   :  { %4613 = vmatpush1.bf16.msra.mxu0 %v5868_v60  ;;  %v1392_v60 = vld [vmem:[%s8974_s3 + $0x790] sm:$0xff]  ;;  %v5925_v27 = vcombine.high %v1248_v50, %v1252_v51 }
 0x1dd   :  { %4656 = vmatpush1.bf16.msra.mxu1 %v5996_v61  ;;  %4614 = vmatprep.subr.bf16.mxu0 %v5861_v4  ;;  %v1396_v61 = vld [vmem:[%s8974_s3 + $0x7b0] sm:$0xff]  ;;  %v5948_v4 = vcombine.low %v1272_v40, %v1276_v41 }
 0x1de   :  { %4657 = vmatprep.subr.bf16.mxu1 %v5989_v5  ;;  %v6076_v5 = vcombine.low %v1400_v42, %v1404_v46  ;;  %v6069_v9 = vcombine.high %v1392_v60, %v1396_v61  ;;  %v1240_v10 = vld [vmem:[%s8974_s3 + $0x2d0] sm:$0xff] }
 0x1df   :  { %v1244_v24 = vld [vmem:[%s8974_s3 + $0x2f0] sm:$0xff] }
 0x1e0   :  { %4615 = vmatpush1.bf16.msra.mxu0 %v5860_v14  ;;  %v1384_v14 = vld [vmem:[%s8974_s3 + $0x750] sm:$0xff]  ;;  %v5917_v33 = vcombine.high %v1240_v10, %v1244_v24 }
 0x1e1   :  { %4658 = vmatpush1.bf16.msra.mxu1 %v5988_v15  ;;  %4616 = vmatprep.subr.bf16.mxu0 %v5853_v43  ;;  %v1388_v15 = vld [vmem:[%s8974_s3 + $0x770] sm:$0xff]  ;;  %v5940_v43 = vcombine.low %v1264_v55, %v1268_v57 }
 0x1e2   :  { %4659 = vmatprep.subr.bf16.mxu1 %v5981_v44  ;;  %v6068_v44 = vcombine.low %v1392_v60, %v1396_v61  ;;  %v6061_v48 = vcombine.high %v1384_v14, %v1388_v15  ;;  %v1232_v56 = vld [vmem:[%s8974_s3 + $0x290] sm:$0xff] }
 0x1e3   :  { %v1236_v35 = vld [vmem:[%s8974_s3 + $0x2b0] sm:$0xff] }
 0x1e4   :  { %4617 = vmatpush1.bf16.msra.mxu0 %v5852_v16  ;;  %v1376_v16 = vld [vmem:[%s8974_s3 + $0x710] sm:$0xff]  ;;  %v5909_v40 = vcombine.high %v1232_v56, %v1236_v35 }
 0x1e5   :  { %4660 = vmatpush1.bf16.msra.mxu1 %v5980_v17  ;;  %4618 = vmatprep.subr.bf16.mxu0 %v5845_v18  ;;  %v1380_v17 = vld [vmem:[%s8974_s3 + $0x730] sm:$0xff]  ;;  %v5932_v18 = vcombine.low %v1256_v12, %v1260_v13 }
 0x1e6   :  { %4661 = vmatprep.subr.bf16.mxu1 %v5973_v26  ;;  %v6060_v26 = vcombine.low %v1384_v14, %v1388_v15  ;;  %v6053_v28 = vcombine.high %v1376_v16, %v1380_v17  ;;  %v1224_v42 = vld [vmem:[%s8974_s3 + $0x250] sm:$0xff] }
 0x1e7   :  { %v1228_v46 = vld [vmem:[%s8974_s3 + $0x270] sm:$0xff] }
 0x1e8   :  { %4619 = vmatpush1.bf16.msra.mxu0 %v5844_v29  ;;  %v1368_v29 = vld [vmem:[%s8974_s3 + $0x6d0] sm:$0xff]  ;;  %v5901_v55 = vcombine.high %v1224_v42, %v1228_v46 }
 0x1e9   :  { %4662 = vmatpush1.bf16.msra.mxu1 %v5972_v30  ;;  %4620 = vmatprep.subr.bf16.mxu0 %v5837_v31  ;;  %v1372_v30 = vld [vmem:[%s8974_s3 + $0x6f0] sm:$0xff]  ;;  %v5924_v31 = vcombine.low %v1248_v50, %v1252_v51 }
 0x1ea   :  { %4663 = vmatprep.subr.bf16.mxu1 %v5965_v32  ;;  %v6052_v32 = vcombine.low %v1376_v16, %v1380_v17  ;;  %v6045_v34 = vcombine.high %v1368_v29, %v1372_v30  ;;  %v1216_v60 = vld [vmem:[%s8974_s3 + $0x210] sm:$0xff] }
 0x1eb   :  { %v1220_v61 = vld [vmem:[%s8974_s3 + $0x230] sm:$0xff] }
 0x1ec   :  { %4621 = vmatpush1.bf16.msra.mxu0 %v5836_v36  ;;  %v1360_v36 = vld [vmem:[%s8974_s3 + $0x690] sm:$0xff]  ;;  %v5893_v12 = vcombine.high %v1216_v60, %v1220_v61 }
 0x1ed   :  { %4664 = vmatpush1.bf16.msra.mxu1 %v5964_v37  ;;  %4622 = vmatprep.subr.bf16.mxu0 %v5829_v38  ;;  %v1364_v37 = vld [vmem:[%s8974_s3 + $0x6b0] sm:$0xff]  ;;  %v5916_v38 = vcombine.low %v1240_v10, %v1244_v24 }
 0x1ee   :  { %4665 = vmatprep.subr.bf16.mxu1 %v5957_v39  ;;  %v6044_v39 = vcombine.low %v1368_v29, %v1372_v30  ;;  %v6037_v41 = vcombine.high %v1360_v36, %v1364_v37  ;;  %v1464_v14 = vld [vmem:[%s8974_s3 + $0x9d0] sm:$0xff] }
 0x1ef   :  { %v1468_v15 = vld [vmem:[%s8974_s3 + $0x9f0] sm:$0xff] }
 0x1f0   :  { %4623 = vmatpush1.bf16.msra.mxu0 %v5828_v47  ;;  %v1352_v47 = vld [vmem:[%s8974_s3 + $0x650] sm:$0xff]  ;;  %v6141_v50 = vcombine.high %v1464_v14, %v1468_v15 }
 0x1f1   :  { %4666 = vmatpush1.bf16.msra.mxu1 %v5956_v49  ;;  %4624 = vmatprep.subr.bf16.mxu0 %v5949_v52  ;;  %v1356_v49 = vld [vmem:[%s8974_s3 + $0x670] sm:$0xff]  ;;  %v5908_v52 = vcombine.low %v1232_v56, %v1236_v35 }
 0x1f2   :  { %4667 = vmatprep.subr.bf16.mxu1 %v6077_v53  ;;  %v6036_v53 = vcombine.low %v1360_v36, %v1364_v37  ;;  %v6029_v57 = vcombine.high %v1352_v47, %v1356_v49  ;;  %v1456_v16 = vld [vmem:[%s8974_s3 + $0x990] sm:$0xff] }
 0x1f3   :  { %v1460_v17 = vld [vmem:[%s8974_s3 + $0x9b0] sm:$0xff] }
 0x1f4   :  { %4625 = vmatpush2.bf16.msra.mxu0 %v5948_v4  ;;  %v1344_v4 = vld [vmem:[%s8974_s3 + $0x610] sm:$0xff]  ;;  %v6133_v10 = vcombine.high %v1456_v16, %v1460_v17 }
 0x1f5   :  { %4668 = vmatpush2.bf16.msra.mxu1 %v6076_v5  ;;  %4626 = vmatprep.subr.bf16.mxu0 %v5941_v6  ;;  %v1348_v5 = vld [vmem:[%s8974_s3 + $0x630] sm:$0xff]  ;;  %v5900_v6 = vcombine.low %v1224_v42, %v1228_v46 }
 0x1f6   :  { %4669 = vmatprep.subr.bf16.mxu1 %v6069_v9  ;;  %v6028_v9 = vcombine.low %v1352_v47, %v1356_v49  ;;  %v6021_v13 = vcombine.high %v1344_v4, %v1348_v5  ;;  %v1448_v24 = vld [vmem:[%s8974_s3 + $0x950] sm:$0xff] }
 0x1f7   :  { %v1452_v29 = vld [vmem:[%s8974_s3 + $0x970] sm:$0xff] }
 0x1f8   :  { %4627 = vmatpush2.bf16.msra.mxu0 %v5940_v43  ;;  %v1592_v43 = vld [vmem:[%s8974_s3 + $0xdd0] sm:$0xff]  ;;  %v6125_v56 = vcombine.high %v1448_v24, %v1452_v29 }
 0x1f9   :  { %4670 = vmatpush2.bf16.msra.mxu1 %v6068_v44  ;;  %4628 = vmatprep.subr.bf16.mxu0 %v5933_v45  ;;  %v1596_v44 = vld [vmem:[%s8974_s3 + $0xdf0] sm:$0xff]  ;;  %v5892_v45 = vcombine.low %v1216_v60, %v1220_v61 }
 0x1fa   :  { %4671 = vmatprep.subr.bf16.mxu1 %v6061_v48  ;;  %v6020_v48 = vcombine.low %v1344_v4, %v1348_v5  ;;  %v6269_v51 = vcombine.high %v1592_v43, %v1596_v44  ;;  %v1440_v36 = vld [vmem:[%s8974_s3 + $0x910] sm:$0xff] }
 0x1fb   :  { %v1444_v37 = vld [vmem:[%s8974_s3 + $0x930] sm:$0xff] }
 0x1fc   :  { %4629 = vmatpush2.bf16.msra.mxu0 %v5932_v18  ;;  %v6140_v18 = vcombine.low %v1464_v14, %v1468_v15  ;;  %v6117_v42 = vcombine.high %v1440_v36, %v1444_v37  ;;  %v1432_v47 = vld [vmem:[%s8974_s3 + $0x8d0] sm:$0xff] }
 0x1fd   :  { %4672 = vmatpush2.bf16.msra.mxu1 %v6060_v26  ;;  %4630 = vmatprep.subr.bf16.mxu0 %v5925_v27  ;;  %v1584_v26 = vld [vmem:[%s8974_s3 + $0xd90] sm:$0xff] }
 0x1fe   :  { %4673 = vmatprep.subr.bf16.mxu1 %v6053_v28  ;;  %v1588_v27 = vld [vmem:[%s8974_s3 + $0xdb0] sm:$0xff]  ;;  %v6268_v28 = vcombine.low %v1592_v43, %v1596_v44 }
 0x1ff   :  { %v6261_v30 = vcombine.high %v1584_v26, %v1588_v27  ;;  %v1436_v49 = vld [vmem:[%s8974_s3 + $0x8f0] sm:$0xff] }
 0x200   :  { %4631 = vmatpush2.bf16.msra.mxu0 %v5924_v31  ;;  %v1576_v31 = vld [vmem:[%s8974_s3 + $0xd50] sm:$0xff]  ;;  %v6109_v60 = vcombine.high %v1432_v47, %v1436_v49 }
 0x201   :  { %4674 = vmatpush2.bf16.msra.mxu1 %v6052_v32  ;;  %4632 = vmatprep.subr.bf16.mxu0 %v5917_v33  ;;  %v1580_v32 = vld [vmem:[%s8974_s3 + $0xd70] sm:$0xff]  ;;  %v6132_v33 = vcombine.low %v1456_v16, %v1460_v17 }
 0x202   :  { %4675 = vmatprep.subr.bf16.mxu1 %v6045_v34  ;;  %v6260_v34 = vcombine.low %v1584_v26, %v1588_v27  ;;  %v6253_v35 = vcombine.high %v1576_v31, %v1580_v32  ;;  %v1424_v4 = vld [vmem:[%s8974_s3 + $0x890] sm:$0xff] }
 0x203   :  { %v1428_v5 = vld [vmem:[%s8974_s3 + $0x8b0] sm:$0xff] }
 0x204   :  { %4633 = vmatpush2.bf16.msra.mxu0 %v5916_v38  ;;  %v1568_v38 = vld [vmem:[%s8974_s3 + $0xd10] sm:$0xff]  ;;  %v6101_v14 = vcombine.high %v1424_v4, %v1428_v5 }
 0x205   :  { %4676 = vmatpush2.bf16.msra.mxu1 %v6044_v39  ;;  %4634 = vmatprep.subr.bf16.mxu0 %v5909_v40  ;;  %v1572_v39 = vld [vmem:[%s8974_s3 + $0xd30] sm:$0xff]  ;;  %v6124_v40 = vcombine.low %v1448_v24, %v1452_v29 }
 0x206   :  { %4677 = vmatprep.subr.bf16.mxu1 %v6037_v41  ;;  %v6252_v41 = vcombine.low %v1576_v31, %v1580_v32  ;;  %v6245_v46 = vcombine.high %v1568_v38, %v1572_v39  ;;  %v1416_v43 = vld [vmem:[%s8974_s3 + $0x850] sm:$0xff] }
 0x207   :  { %v1420_v44 = vld [vmem:[%s8974_s3 + $0x870] sm:$0xff] }
 0x208   :  { %4635 = vmatpush2.bf16.msra.mxu0 %v5908_v52  ;;  %v1560_v52 = vld [vmem:[%s8974_s3 + $0xcd0] sm:$0xff]  ;;  %v6093_v16 = vcombine.high %v1416_v43, %v1420_v44 }
 0x209   :  { %4678 = vmatpush2.bf16.msra.mxu1 %v6036_v53  ;;  %4636 = vmatprep.subr.bf16.mxu0 %v5901_v55  ;;  %v1564_v53 = vld [vmem:[%s8974_s3 + $0xcf0] sm:$0xff]  ;;  %v6116_v55 = vcombine.low %v1440_v36, %v1444_v37 }
 0x20a   :  { %4679 = vmatprep.subr.bf16.mxu1 %v6029_v57  ;;  %v6244_v57 = vcombine.low %v1568_v38, %v1572_v39  ;;  %v6237_v61 = vcombine.high %v1560_v52, %v1564_v53  ;;  %v1412_v26 = vld [vmem:[%s8974_s3 + $0x830] sm:$0xff] }
 0x20b   :  { %v1536_v27 = vld [vmem:[%s8974_s3 + $0xc10] sm:$0xff] }
 0x20c   :  { %4637 = vmatpush2.bf16.msra.mxu0 %v5900_v6  ;;  %v1552_v6 = vld [vmem:[%s8974_s3 + $0xc90] sm:$0xff] }
 0x20d   :  { %4680 = vmatpush2.bf16.msra.mxu1 %v6028_v9  ;;  %4638 = vmatprep.subr.bf16.mxu0 %v5893_v12  ;;  %v1556_v9 = vld [vmem:[%s8974_s3 + $0xcb0] sm:$0xff]  ;;  %v6108_v12 = vcombine.low %v1432_v47, %v1436_v49 }
 0x20e   :  { %4681 = vmatprep.subr.bf16.mxu1 %v6021_v13  ;;  %v6236_v13 = vcombine.low %v1560_v52, %v1564_v53  ;;  %v6229_v15 = vcombine.high %v1552_v6, %v1556_v9  ;;  %v1528_v31 = vld [vmem:[%s8974_s3 + $0xbd0] sm:$0xff] }
 0x20f   :  { %v1532_v32 = vld [vmem:[%s8974_s3 + $0xbf0] sm:$0xff] }
 0x210   :  { %4639 = vmatpush2.bf16.msra.mxu0 %v5892_v45  ;;  %v1544_v45 = vld [vmem:[%s8974_s3 + $0xc50] sm:$0xff]  ;;  %v6205_v36 = vcombine.high %v1528_v31, %v1532_v32 }
 0x211   :  { %4682 = vmatpush2.bf16.msra.mxu1 %v6020_v48  ;;  %4694 = vmatprep.subr.bf16.mxu0 %v6141_v50  ;;  %v1548_v48 = vld [vmem:[%s8974_s3 + $0xc70] sm:$0xff]  ;;  %v6100_v50 = vcombine.low %v1424_v4, %v1428_v5 }
 0x212   :  { %4737 = vmatprep.subr.bf16.mxu1 %v6269_v51  ;;  %v6228_v51 = vcombine.low %v1552_v6, %v1556_v9  ;;  %v6221_v17 = vcombine.high %v1544_v45, %v1548_v48  ;;  %v6220_v24 = vcombine.low %v1544_v45, %v1548_v48  ;;  %v1520_v38 = vld [vmem:[%s8974_s3 + $0xb90] sm:$0xff] }
 0x213   :  { %4641 = vmatmul.mubr.bf16.vlgmr.msra.gmra.mxu0 %v7269_v0  ;;  %v1524_v39 = vld [vmem:[%s8974_s3 + $0xbb0] sm:$0xff] }
 0x214   :  { %4684 = vmatmul.mubr.bf16.vlgmr.msra.gmra.mxu1 %v7273_v3  ;;  %4695 = vmatpush1.bf16.msra.mxu0 %v6140_v18  ;;  %v1408_v18 = vld [vmem:[%s8974_s3 + $0x810] sm:$0xff]  ;;  %v6197_v47 = vcombine.high %v1520_v38, %v1524_v39 }
 0x215   :  { %4726 = vmatprep.mubr.bf16.mxu0 %v7487_v2  ;;  %4738 = vmatpush1.bf16.msra.mxu1 %v6268_v28  ;;  %v1540_v28 = vld [vmem:[%s8974_s3 + $0xc30] sm:$0xff]  ;;  %v6085_v29 = vcombine.high %v1408_v18, %v1412_v26 }
 0x216   :  { %4769 = vmatprep.mubr.bf16.mxu1 %v7497_v8  ;;  %4696 = vmatprep.subr.bf16.mxu0 %v6133_v10  ;;  %v6092_v10 = vcombine.low %v1416_v43, %v1420_v44  ;;  %v1512_v52 = vld [vmem:[%s8974_s3 + $0xb50] sm:$0xff] }
 0x217   :  { %4739 = vmatprep.subr.bf16.mxu1 %v6261_v30  ;;  %v6213_v30 = vcombine.high %v1536_v27, %v1540_v28  ;;  %v1516_v53 = vld [vmem:[%s8974_s3 + $0xb70] sm:$0xff] }
 0x218   :  { %4697 = vmatpush1.bf16.msra.mxu0 %v6132_v33  ;;  %v1656_v33 = vld [vmem:[%s8974_s3 + $0xfd0] sm:$0xff]  ;;  %v6189_v4 = vcombine.high %v1512_v52, %v1516_v53 }
 0x219   :  { %4740 = vmatpush1.bf16.msra.mxu1 %v6260_v34  ;;  %4698 = vmatprep.subr.bf16.mxu0 %v6125_v56  ;;  %v1660_v34 = vld [vmem:[%s8974_s3 + $0xff0] sm:$0xff]  ;;  %v6084_v56 = vcombine.low %v1408_v18, %v1412_v26 }
 0x21a   :  { %4741 = vmatprep.subr.bf16.mxu1 %v6253_v35  ;;  %v6212_v35 = vcombine.low %v1536_v27, %v1540_v28  ;;  %v6333_v37 = vcombine.high %v1656_v33, %v1660_v34  ;;  %v1504_v6 = vld [vmem:[%s8974_s3 + $0xb10] sm:$0xff] }
 0x21b   :  { %v1508_v9 = vld [vmem:[%s8974_s3 + $0xb30] sm:$0xff] }
 0x21c   :  { %4699 = vmatpush1.bf16.msra.mxu0 %v6124_v40  ;;  %v1648_v40 = vld [vmem:[%s8974_s3 + $0xf90] sm:$0xff]  ;;  %v6181_v43 = vcombine.high %v1504_v6, %v1508_v9 }
 0x21d   :  { %4742 = vmatpush1.bf16.msra.mxu1 %v6252_v41  ;;  %4700 = vmatprep.subr.bf16.mxu0 %v6117_v42  ;;  %v1652_v41 = vld [vmem:[%s8974_s3 + $0xfb0] sm:$0xff]  ;;  %v6204_v42 = vcombine.low %v1528_v31, %v1532_v32 }
 0x21e   :  { %4743 = vmatprep.subr.bf16.mxu1 %v6245_v46  ;;  %v6332_v46 = vcombine.low %v1656_v33, %v1660_v34  ;;  %v6325_v49 = vcombine.high %v1648_v40, %v1652_v41  ;;  %v1496_v45 = vld [vmem:[%s8974_s3 + $0xad0] sm:$0xff] }
 0x21f   :  { %v1500_v48 = vld [vmem:[%s8974_s3 + $0xaf0] sm:$0xff] }
 0x220   :  { %4701 = vmatpush1.bf16.msra.mxu0 %v6116_v55  ;;  %v1640_v55 = vld [vmem:[%s8974_s3 + $0xf50] sm:$0xff]  ;;  %v6173_v18 = vcombine.high %v1496_v45, %v1500_v48 }
 0x221   :  { %4744 = vmatpush1.bf16.msra.mxu1 %v6244_v57  ;;  %4702 = vmatprep.subr.bf16.mxu0 %v6109_v60  ;;  %v1644_v57 = vld [vmem:[%s8974_s3 + $0xf70] sm:$0xff]  ;;  %v6196_v60 = vcombine.low %v1520_v38, %v1524_v39 }
 0x222   :  { %4745 = vmatprep.subr.bf16.mxu1 %v6237_v61  ;;  %v6324_v61 = vcombine.low %v1648_v40, %v1652_v41  ;;  %v6317_v5 = vcombine.high %v1640_v55, %v1644_v57  ;;  %v1488_v27 = vld [vmem:[%s8974_s3 + $0xa90] sm:$0xff] }
 0x223   :  { %v1492_v28 = vld [vmem:[%s8974_s3 + $0xab0] sm:$0xff] }
 0x224   :  { %4703 = vmatpush1.bf16.msra.mxu0 %v6108_v12  ;;  %v1632_v12 = vld [vmem:[%s8974_s3 + $0xf10] sm:$0xff]  ;;  %v6165_v31 = vcombine.high %v1488_v27, %v1492_v28 }
 0x225   :  { %4746 = vmatpush1.bf16.msra.mxu1 %v6236_v13  ;;  %4704 = vmatprep.subr.bf16.mxu0 %v6101_v14  ;;  %v1636_v13 = vld [vmem:[%s8974_s3 + $0xf30] sm:$0xff]  ;;  %v6188_v14 = vcombine.low %v1512_v52, %v1516_v53 }
 0x226   :  { %4747 = vmatprep.subr.bf16.mxu1 %v6229_v15  ;;  %v6316_v15 = vcombine.low %v1640_v55, %v1644_v57  ;;  %v6309_v44 = vcombine.high %v1632_v12, %v1636_v13  ;;  %v1480_v33 = vld [vmem:[%s8974_s3 + $0xa50] sm:$0xff]  ;;  %v1209_v55 = vld [vmem:[%s8974_s3 + $0x1d8] sm:$0xff] }
 0x227   :  { %v1484_v34 = vld [vmem:[%s8974_s3 + $0xa70] sm:$0xff]  ;;  %v1213_v57 = vld [vmem:[%s8974_s3 + $0x1f8] sm:$0xff] }
 0x228   :  { %4705 = vmatpush1.bf16.msra.mxu0 %v6100_v50  ;;  %v1624_v50 = vld [vmem:[%s8974_s3 + $0xed0] sm:$0xff]  ;;  %v6157_v38 = vcombine.high %v1480_v33, %v1484_v34 }
 0x229   :  { %4748 = vmatpush1.bf16.msra.mxu1 %v6228_v51  ;;  %4706 = vmatprep.subr.bf16.mxu0 %v6093_v16  ;;  %v1628_v51 = vld [vmem:[%s8974_s3 + $0xef0] sm:$0xff]  ;;  %v6180_v16 = vcombine.low %v1504_v6, %v1508_v9  ;;  %v5887_v6 = vcombine.high %v1209_v55, %v1213_v57 }
 0x22a   :  { %4749 = vmatprep.subr.bf16.mxu1 %v6221_v17  ;;  %v6308_v17 = vcombine.low %v1632_v12, %v1636_v13  ;;  %v6301_v26 = vcombine.high %v1624_v50, %v1628_v51  ;;  %v1472_v40 = vld [vmem:[%s8974_s3 + $0xa10] sm:$0xff]  ;;  %v1201_v12 = vld [vmem:[%s8974_s3 + $0x198] sm:$0xff] }
 0x22b   :  { %v1476_v41 = vld [vmem:[%s8974_s3 + $0xa30] sm:$0xff]  ;;  %v1205_v13 = vld [vmem:[%s8974_s3 + $0x1b8] sm:$0xff] }
 0x22c   :  { %4707 = vmatpush1.bf16.msra.mxu0 %v6092_v10  ;;  %v1616_v10 = vld [vmem:[%s8974_s3 + $0xe90] sm:$0xff]  ;;  %v6149_v52 = vcombine.high %v1472_v40, %v1476_v41 }
 0x22d   :  { %4750 = vmatpush1.bf16.msra.mxu1 %v6220_v24  ;;  %4708 = vmatprep.subr.bf16.mxu0 %v6085_v29  ;;  %v1620_v24 = vld [vmem:[%s8974_s3 + $0xeb0] sm:$0xff]  ;;  %v6172_v29 = vcombine.low %v1496_v45, %v1500_v48  ;;  %v5879_v45 = vcombine.high %v1201_v12, %v1205_v13  ;;  %v1193_v48 = vld [vmem:[%s8974_s3 + $0x158] sm:$0xff] }
 0x22e   :  { %4751 = vmatprep.subr.bf16.mxu1 %v6213_v30  ;;  %v6300_v30 = vcombine.low %v1624_v50, %v1628_v51  ;;  %v6293_v32 = vcombine.high %v1616_v10, %v1620_v24  ;;  %v1197_v50 = vld [vmem:[%s8974_s3 + $0x178] sm:$0xff] }
 0x22f   :  { %v1321_v51 = vld [vmem:[%s8974_s3 + $0x558] sm:$0xff] }
 0x230   :  { %4709 = vmatpush1.bf16.msra.mxu0 %v6084_v56  ;;  %v1608_v56 = vld [vmem:[%s8974_s3 + $0xe50] sm:$0xff] }
 0x231   :  { %4752 = vmatpush1.bf16.msra.mxu1 %v6212_v35  ;;  %4710 = vmatprep.subr.bf16.mxu0 %v6205_v36  ;;  %v1612_v35 = vld [vmem:[%s8974_s3 + $0xe70] sm:$0xff]  ;;  %v6164_v36 = vcombine.low %v1488_v27, %v1492_v28  ;;  %v5871_v28 = vcombine.high %v1193_v48, %v1197_v50 }
 0x232   :  { %4753 = vmatprep.subr.bf16.mxu1 %v6333_v37  ;;  %v6292_v37 = vcombine.low %v1616_v10, %v1620_v24  ;;  %v6285_v39 = vcombine.high %v1608_v56, %v1612_v35  ;;  %v1189_v10 = vld [vmem:[%s8974_s3 + $0x138] sm:$0xff] }
 0x234   :  { %4711 = vmatpush2.bf16.msra.mxu0 %v6204_v42  ;;  %v1600_v42 = vld [vmem:[%s8974_s3 + $0xe10] sm:$0xff] }
 0x235   :  { %4754 = vmatpush2.bf16.msra.mxu1 %v6332_v46  ;;  %4712 = vmatprep.subr.bf16.mxu0 %v6197_v47  ;;  %v1604_v46 = vld [vmem:[%s8974_s3 + $0xe30] sm:$0xff]  ;;  %v6156_v47 = vcombine.low %v1480_v33, %v1484_v34  ;;  %v1181_v33 = vld [vmem:[%s8974_s3 + $0xf8] sm:$0xff] }
 0x236   :  { %4755 = vmatprep.subr.bf16.mxu1 %v6325_v49  ;;  %v6284_v49 = vcombine.low %v1608_v56, %v1612_v35  ;;  %v6277_v53 = vcombine.high %v1600_v42, %v1604_v46  ;;  %v1305_v56 = vld [vmem:[%s8974_s3 + $0x4d8] sm:$0xff] }
 0x237   :  { %v1309_v35 = vld [vmem:[%s8974_s3 + $0x4f8] sm:$0xff] }
 0x238   :  { %4713 = vmatpush2.bf16.msra.mxu0 %v6196_v60  ;;  %v1337_v60 = vld [vmem:[%s8974_s3 + $0x5d8] sm:$0xff] }
 0x239   :  { %4756 = vmatpush2.bf16.msra.mxu1 %v6324_v61  ;;  %4714 = vmatprep.subr.bf16.mxu0 %v6189_v4  ;;  %v1341_v61 = vld [vmem:[%s8974_s3 + $0x5f8] sm:$0xff]  ;;  %v6148_v4 = vcombine.low %v1472_v40, %v1476_v41  ;;  %v5983_v41 = vcombine.high %v1305_v56, %v1309_v35 }
 0x23a   :  { %4757 = vmatprep.subr.bf16.mxu1 %v6317_v5  ;;  %v6276_v5 = vcombine.low %v1600_v42, %v1604_v46  ;;  %v6015_v9 = vcombine.high %v1337_v60, %v1341_v61  ;;  %v1173_v40 = vld [vmem:[%s8974_s3 + $0xb8] sm:$0xff] }
 0x23b   :  { %v1297_v42 = vld [vmem:[%s8974_s3 + $0x498] sm:$0xff] }
 0x23c   :  { %4715 = vmatpush2.bf16.msra.mxu0 %v6188_v14  ;;  %v5886_v14 = vcombine.low %v1209_v55, %v1213_v57  ;;  %v1301_v46 = vld [vmem:[%s8974_s3 + $0x4b8] sm:$0xff] }
 0x23d   :  { %4758 = vmatpush2.bf16.msra.mxu1 %v6316_v15  ;;  %4716 = vmatprep.subr.bf16.mxu0 %v6181_v43  ;;  %v1329_v15 = vld [vmem:[%s8974_s3 + $0x598] sm:$0xff]  ;;  %v5975_v57 = vcombine.high %v1297_v42, %v1301_v46 }
 0x23e   :  { %4759 = vmatprep.subr.bf16.mxu1 %v6309_v44  ;;  %v1333_v43 = vld [vmem:[%s8974_s3 + $0x5b8] sm:$0xff]  ;;  %v6014_v44 = vcombine.low %v1337_v60, %v1341_v61 }
 0x23f   :  { %v6006_v27 = vcombine.low %v1329_v15, %v1333_v43  ;;  %v1165_v55 = vld [vmem:[%s8974_s3 + $0x78] sm:$0xff] }
 0x240   :  { %4717 = vmatpush2.bf16.msra.mxu0 %v6180_v16  ;;  %v6007_v16 = vcombine.high %v1329_v15, %v1333_v43  ;;  %v1289_v60 = vld [vmem:[%s8974_s3 + $0x458] sm:$0xff] }
 0x241   :  { %4760 = vmatpush2.bf16.msra.mxu1 %v6308_v17  ;;  %4718 = vmatprep.subr.bf16.mxu0 %v6173_v18  ;;  %v1325_v17 = vld [vmem:[%s8974_s3 + $0x578] sm:$0xff]  ;;  %v5878_v18 = vcombine.low %v1201_v12, %v1205_v13 }
 0x242   :  { %4761 = vmatprep.subr.bf16.mxu1 %v6301_v26  ;;  %v1185_v26 = vld [vmem:[%s8974_s3 + $0x118] sm:$0xff]  ;;  %v5999_v24 = vcombine.high %v1321_v51, %v1325_v17 }
 0x243   :  { %v1293_v61 = vld [vmem:[%s8974_s3 + $0x478] sm:$0xff] }
 0x244   :  { %4719 = vmatpush2.bf16.msra.mxu0 %v6172_v29  ;;  %v1313_v29 = vld [vmem:[%s8974_s3 + $0x518] sm:$0xff]  ;;  %v5967_v13 = vcombine.high %v1289_v60, %v1293_v61 }
 0x245   :  { %4762 = vmatpush2.bf16.msra.mxu1 %v6300_v30  ;;  %4720 = vmatprep.subr.bf16.mxu0 %v6165_v31  ;;  %v5870_v30 = vcombine.low %v1193_v48, %v1197_v50  ;;  %v1177_v31 = vld [vmem:[%s8974_s3 + $0xd8] sm:$0xff] }
 0x246   :  { %4763 = vmatprep.subr.bf16.mxu1 %v6293_v32  ;;  %v5863_v32 = vcombine.high %v1185_v26, %v1189_v10  ;;  %v1157_v12 = vld [vmem:[%s8974_s3 + $0x38] sm:$0xff] }
 0x247   :  { %v1285_v15 = vld [vmem:[%s8974_s3 + $0x438] sm:$0xff] }
 0x248   :  { %4721 = vmatpush2.bf16.msra.mxu0 %v6164_v36  ;;  %v5862_v36 = vcombine.low %v1185_v26, %v1189_v10  ;;  %v1277_v50 = vld [vmem:[%s8974_s3 + $0x3f8] sm:$0xff] }
 0x249   :  { %4764 = vmatpush2.bf16.msra.mxu1 %v6292_v37  ;;  %4722 = vmatprep.subr.bf16.mxu0 %v6157_v38  ;;  %v1169_v37 = vld [vmem:[%s8974_s3 + $0x98] sm:$0xff] }
 0x24a   :  { %4765 = vmatprep.subr.bf16.mxu1 %v6285_v39  ;;  %v5855_v39 = vcombine.high %v1177_v31, %v1181_v33  ;;  %v1265_v26 = vld [vmem:[%s8974_s3 + $0x398] sm:$0xff] }
 0x24b   :  { %v1269_v10 = vld [vmem:[%s8974_s3 + $0x3b8] sm:$0xff] }
 0x24c   :  { %4723 = vmatpush2.bf16.msra.mxu0 %v6156_v47  ;;  %v5854_v47 = vcombine.low %v1177_v31, %v1181_v33  ;;  %v1257_v31 = vld [vmem:[%s8974_s3 + $0x358] sm:$0xff]  ;;  %v5943_v33 = vcombine.high %v1265_v26, %v1269_v10 }
 0x24d   :  { %4766 = vmatpush2.bf16.msra.mxu1 %v6284_v49  ;;  %4724 = vmatprep.subr.bf16.mxu0 %v6149_v52  ;;  %v1161_v49 = vld [vmem:[%s8974_s3 + $0x58] sm:$0xff]  ;;  %v5982_v52 = vcombine.low %v1305_v56, %v1309_v35 }
 0x24e   :  { %4767 = vmatprep.subr.bf16.mxu1 %v6277_v53  ;;  %v5847_v53 = vcombine.high %v1169_v37, %v1173_v40  ;;  %v5838_v43 = vcombine.low %v1161_v49, %v1165_v55  ;;  %v1389_v35 = vld [vmem:[%s8974_s3 + $0x778] sm:$0xff] }
 0x250   :  { %4725 = vmatpush2.bf16.msra.mxu0 %v6148_v4  ;;  %v5846_v4 = vcombine.low %v1169_v37, %v1173_v40  ;;  %v1249_v37 = vld [vmem:[%s8974_s3 + $0x318] sm:$0xff] }
 0x251   :  { %4768 = vmatpush2.bf16.msra.mxu1 %v6276_v5  ;;  %4780 = vmatprep.subr.bf16.mxu0 %v5887_v6  ;;  %v1153_v5 = vld [vmem:[%s8974_s3 + $0x18] sm:$0xff]  ;;  %v5974_v6 = vcombine.low %v1297_v42, %v1301_v46 }
 0x252   :  { %4823 = vmatprep.subr.bf16.mxu1 %v6015_v9  ;;  %v5839_v9 = vcombine.high %v1161_v49, %v1165_v55  ;;  %v5831_v48 = vcombine.high %v1153_v5, %v1157_v12  ;;  %v1381_v46 = vld [vmem:[%s8974_s3 + $0x738] sm:$0xff] }
 0x253   :  { %4727 = vmatmul.mubr.bf16.vlgmr.msra.gmra.mxu0 %v7495_v7  ;;  %v1241_v49 = vld [vmem:[%s8974_s3 + $0x2d8] sm:$0xff] }
 0x254   :  { %4770 = vmatmul.mubr.bf16.vlgmr.msra.gmra.mxu1 %v7499_v11  ;;  %4781 = vmatpush1.bf16.msra.mxu0 %v5886_v14  ;;  %v1281_v14 = vld [vmem:[%s8974_s3 + $0x418] sm:$0xff] }
 0x255   :  { %4812 = vmatprep.mubr.bf16.mxu0 %v7267_v63  ;;  %4824 = vmatpush1.bf16.msra.mxu1 %v6014_v44  ;;  %v1317_v63 = vld [vmem:[%s8974_s3 + $0x538] sm:$0xff] }
 0x256   :  { %4855 = vmatprep.mubr.bf16.mxu1 %v7271_v1  ;;  %4782 = vmatprep.subr.bf16.mxu0 %v5879_v45  ;;  %v5998_v1 = vcombine.low %v1321_v51, %v1325_v17  ;;  %v5991_v34 = vcombine.high %v1313_v29, %v1317_v63  ;;  %v5990_v38 = vcombine.low %v1313_v29, %v1317_v63  ;;  %v1273_v44 = vld [vmem:[%s8974_s3 + $0x3d8] sm:$0xff] }
 0x257   :  { %4825 = vmatprep.subr.bf16.mxu1 %v6007_v16  ;;  %v5966_v45 = vcombine.low %v1289_v60, %v1293_v61  ;;  %v5959_v51 = vcombine.high %v1281_v14, %v1285_v15  ;;  %v1401_v16 = vld [vmem:[%s8974_s3 + $0x7d8] sm:$0xff] }
 0x258   :  { %4783 = vmatpush1.bf16.msra.mxu0 %v5878_v18  ;;  %v1405_v17 = vld [vmem:[%s8974_s3 + $0x7f8] sm:$0xff]  ;;  %v5830_v18 = vcombine.low %v1153_v5, %v1157_v12 }
 0x259   :  { %4826 = vmatpush1.bf16.msra.mxu1 %v6006_v27  ;;  %4784 = vmatprep.subr.bf16.mxu0 %v5871_v28  ;;  %v5958_v27 = vcombine.low %v1281_v14, %v1285_v15  ;;  %v5951_v28 = vcombine.high %v1273_v44, %v1277_v50  ;;  %v1393_v29 = vld [vmem:[%s8974_s3 + $0x798] sm:$0xff] }
 0x25a   :  { %4827 = vmatprep.subr.bf16.mxu1 %v5999_v24  ;;  %v6079_v24 = vcombine.high %v1401_v16, %v1405_v17  ;;  %v1397_v63 = vld [vmem:[%s8974_s3 + $0x7b8] sm:$0xff] }
 0x25b   :  { %v6071_v56 = vcombine.high %v1393_v29, %v1397_v63  ;;  %v1373_v60 = vld [vmem:[%s8974_s3 + $0x6f8] sm:$0xff] }
 0x25c   :  { %4785 = vmatpush1.bf16.msra.mxu0 %v5870_v30  ;;  %v5950_v30 = vcombine.low %v1273_v44, %v1277_v50  ;;  %v1233_v5 = vld [vmem:[%s8974_s3 + $0x298] sm:$0xff] }
 0x25d   :  { %4828 = vmatpush1.bf16.msra.mxu1 %v5998_v1  ;;  %4786 = vmatprep.subr.bf16.mxu0 %v5863_v32  ;;  %v1261_v1 = vld [vmem:[%s8974_s3 + $0x378] sm:$0xff]  ;;  %v6078_v32 = vcombine.low %v1401_v16, %v1405_v17 }
 0x25e   :  { %4829 = vmatprep.subr.bf16.mxu1 %v5991_v34  ;;  %v1385_v34 = vld [vmem:[%s8974_s3 + $0x758] sm:$0xff]  ;;  %v5935_v40 = vcombine.high %v1257_v31, %v1261_v1 }
 0x25f   :  { %v6063_v42 = vcombine.high %v1385_v34, %v1389_v35  ;;  %v1365_v14 = vld [vmem:[%s8974_s3 + $0x6b8] sm:$0xff] }
 0x260   :  { %4787 = vmatpush1.bf16.msra.mxu0 %v5862_v36  ;;  %v5942_v36 = vcombine.low %v1265_v26, %v1269_v10  ;;  %v1225_v44 = vld [vmem:[%s8974_s3 + $0x258] sm:$0xff] }
 0x261   :  { %4830 = vmatpush1.bf16.msra.mxu1 %v5990_v38  ;;  %4788 = vmatprep.subr.bf16.mxu0 %v5855_v39  ;;  %v1253_v38 = vld [vmem:[%s8974_s3 + $0x338] sm:$0xff]  ;;  %v6070_v39 = vcombine.low %v1393_v29, %v1397_v63 }
 0x262   :  { %4831 = vmatprep.subr.bf16.mxu1 %v5983_v41  ;;  %v1377_v41 = vld [vmem:[%s8974_s3 + $0x718] sm:$0xff]  ;;  %v5927_v55 = vcombine.high %v1249_v37, %v1253_v38 }
 0x263   :  { %v6055_v61 = vcombine.high %v1377_v41, %v1381_v46  ;;  %v1357_v16 = vld [vmem:[%s8974_s3 + $0x678] sm:$0xff] }
 0x264   :  { %4789 = vmatpush1.bf16.msra.mxu0 %v5854_v47  ;;  %v5934_v47 = vcombine.low %v1257_v31, %v1261_v1  ;;  %v1217_v26 = vld [vmem:[%s8974_s3 + $0x218] sm:$0xff] }
 0x265   :  { %4832 = vmatpush1.bf16.msra.mxu1 %v5982_v52  ;;  %4790 = vmatprep.subr.bf16.mxu0 %v5847_v53  ;;  %v1245_v52 = vld [vmem:[%s8974_s3 + $0x2f8] sm:$0xff]  ;;  %v6062_v53 = vcombine.low %v1385_v34, %v1389_v35 }
 0x266   :  { %4833 = vmatprep.subr.bf16.mxu1 %v5975_v57  ;;  %v1369_v57 = vld [vmem:[%s8974_s3 + $0x6d8] sm:$0xff]  ;;  %v5919_v12 = vcombine.high %v1241_v49, %v1245_v52 }
 0x267   :  { %v6047_v15 = vcombine.high %v1369_v57, %v1373_v60  ;;  %v1349_v29 = vld [vmem:[%s8974_s3 + $0x638] sm:$0xff] }
 0x268   :  { %4791 = vmatpush1.bf16.msra.mxu0 %v5846_v4  ;;  %v5926_v4 = vcombine.low %v1249_v37, %v1253_v38  ;;  %v1465_v31 = vld [vmem:[%s8974_s3 + $0x9d8] sm:$0xff] }
 0x269   :  { %4834 = vmatpush1.bf16.msra.mxu1 %v5974_v6  ;;  %4792 = vmatprep.subr.bf16.mxu0 %v5839_v9  ;;  %v1237_v6 = vld [vmem:[%s8974_s3 + $0x2b8] sm:$0xff]  ;;  %v6054_v9 = vcombine.low %v1377_v41, %v1381_v46 }
 0x26a   :  { %4835 = vmatprep.subr.bf16.mxu1 %v5967_v13  ;;  %v1361_v13 = vld [vmem:[%s8974_s3 + $0x698] sm:$0xff]  ;;  %v5911_v50 = vcombine.high %v1233_v5, %v1237_v6 }
 0x26b   :  { %v6039_v17 = vcombine.high %v1361_v13, %v1365_v14  ;;  %v1469_v1 = vld [vmem:[%s8974_s3 + $0x9f8] sm:$0xff] }
 0x26c   :  { %4793 = vmatpush1.bf16.msra.mxu0 %v5838_v43  ;;  %v5918_v43 = vcombine.low %v1241_v49, %v1245_v52  ;;  %v1597_v35 = vld [vmem:[%s8974_s3 + $0xdf8] sm:$0xff]  ;;  %v6143_v38 = vcombine.high %v1465_v31, %v1469_v1  ;;  %v6142_v46 = vcombine.low %v1465_v31, %v1469_v1 }
 0x26d   :  { %4836 = vmatpush1.bf16.msra.mxu1 %v5966_v45  ;;  %4794 = vmatprep.subr.bf16.mxu0 %v5831_v48  ;;  %v1229_v45 = vld [vmem:[%s8974_s3 + $0x278] sm:$0xff]  ;;  %v6046_v48 = vcombine.low %v1369_v57, %v1373_v60 }
 0x26e   :  { %4837 = vmatprep.subr.bf16.mxu1 %v5959_v51  ;;  %v1353_v51 = vld [vmem:[%s8974_s3 + $0x658] sm:$0xff]  ;;  %v5903_v10 = vcombine.high %v1225_v44, %v1229_v45 }
 0x26f   :  { %v6031_v63 = vcombine.high %v1353_v51, %v1357_v16  ;;  %v1457_v41 = vld [vmem:[%s8974_s3 + $0x998] sm:$0xff] }
 0x270   :  { %4795 = vmatpush1.bf16.msra.mxu0 %v5830_v18  ;;  %v5910_v18 = vcombine.low %v1233_v5, %v1237_v6  ;;  %v1589_v49 = vld [vmem:[%s8974_s3 + $0xdb8] sm:$0xff] }
 0x271   :  { %4838 = vmatpush1.bf16.msra.mxu1 %v5958_v27  ;;  %4796 = vmatprep.subr.bf16.mxu0 %v5951_v28  ;;  %v1221_v27 = vld [vmem:[%s8974_s3 + $0x238] sm:$0xff]  ;;  %v6038_v28 = vcombine.low %v1361_v13, %v1365_v14 }
 0x272   :  { %4839 = vmatprep.subr.bf16.mxu1 %v6079_v24  ;;  %v1345_v24 = vld [vmem:[%s8974_s3 + $0x618] sm:$0xff] }
 0x273   :  { %v6023_v34 = vcombine.high %v1345_v24, %v1349_v29  ;;  %v6022_v37 = vcombine.low %v1345_v24, %v1349_v29  ;;  %v1453_v57 = vld [vmem:[%s8974_s3 + $0x978] sm:$0xff] }
 0x274   :  { %4797 = vmatpush2.bf16.msra.mxu0 %v5950_v30  ;;  %v5902_v30 = vcombine.low %v1225_v44, %v1229_v45  ;;  %v1581_v5 = vld [vmem:[%s8974_s3 + $0xd78] sm:$0xff] }
 0x275   :  { %4840 = vmatpush2.bf16.msra.mxu1 %v6078_v32  ;;  %4798 = vmatprep.subr.bf16.mxu0 %v5943_v33  ;;  %v6030_v32 = vcombine.low %v1353_v51, %v1357_v16  ;;  %v5895_v33 = vcombine.high %v1217_v26, %v1221_v27  ;;  %v1441_v14 = vld [vmem:[%s8974_s3 + $0x918] sm:$0xff] }
 0x276   :  { %4841 = vmatprep.subr.bf16.mxu1 %v6071_v56  ;;  %v1593_v56 = vld [vmem:[%s8974_s3 + $0xdd8] sm:$0xff] }
 0x277   :  { %v6270_v52 = vcombine.low %v1593_v56, %v1597_v35  ;;  %v1433_v51 = vld [vmem:[%s8974_s3 + $0x8d8] sm:$0xff] }
 0x278   :  { %4799 = vmatpush2.bf16.msra.mxu0 %v5942_v36  ;;  %v5894_v36 = vcombine.low %v1217_v26, %v1221_v27  ;;  %v1437_v16 = vld [vmem:[%s8974_s3 + $0x8f8] sm:$0xff] }
 0x279   :  { %4842 = vmatpush2.bf16.msra.mxu1 %v6070_v39  ;;  %4800 = vmatprep.subr.bf16.mxu0 %v5935_v40  ;;  %v6271_v39 = vcombine.high %v1593_v56, %v1597_v35  ;;  %v8471_v40 = vpop.f32.mrf.mxu0  ;;  %v1565_v26 = vld [vmem:[%s8974_s3 + $0xcf8] sm:$0xff]  ;;  %v6111_v29 = vcombine.high %v1433_v51, %v1437_v16 }
 0x27a   :  { %4843 = vmatprep.subr.bf16.mxu1 %v6063_v42  ;;  %v1461_v42 = vld [vmem:[%s8974_s3 + $0x9b8] sm:$0xff] }
 0x27b   :  { %v8491_v60 = vpop.f32.mrf.mxu0  ;;  %v6134_v6 = vcombine.low %v1457_v41, %v1461_v42  ;;  %v1429_v31 = vld [vmem:[%s8974_s3 + $0x8b8] sm:$0xff] }
 0x27c   :  { %4801 = vmatpush2.bf16.msra.mxu0 %v5934_v47  ;;  %v1585_v47 = vld [vmem:[%s8974_s3 + $0xd98] sm:$0xff] }
 0x27d   :  { %4844 = vmatpush2.bf16.msra.mxu1 %v6062_v53  ;;  %4802 = vmatprep.subr.bf16.mxu0 %v5927_v55  ;;  %v6135_v53 = vcombine.high %v1457_v41, %v1461_v42  ;;  %v1449_v55 = vld [vmem:[%s8974_s3 + $0x958] sm:$0xff] }
 0x27e   :  { %4845 = vmatprep.subr.bf16.mxu1 %v6055_v61  ;;  %v6263_v61 = vcombine.high %v1585_v47, %v1589_v49  ;;  %v1553_v1 = vld [vmem:[%s8974_s3 + $0xc98] sm:$0xff] }
 0x27f   :  { %v1545_v42 = vld [vmem:[%s8974_s3 + $0xc58] sm:$0xff] }
 0x280   :  { %4803 = vmatpush2.bf16.msra.mxu0 %v5926_v4  ;;  %v1577_v4 = vld [vmem:[%s8974_s3 + $0xd58] sm:$0xff] }
 0x281   :  { %4846 = vmatpush2.bf16.msra.mxu1 %v6054_v9  ;;  %4804 = vmatprep.subr.bf16.mxu0 %v5919_v12  ;;  %v8501_v9 = vpop.f32.mrf.mxu1  ;;  %v6262_v12 = vcombine.low %v1585_v47, %v1589_v49  ;;  %v6255_v13 = vcombine.high %v1577_v4, %v1581_v5  ;;  %v6254_v45 = vcombine.low %v1577_v4, %v1581_v5  ;;  %v1537_v5 = vld [vmem:[%s8974_s3 + $0xc18] sm:$0xff] }
 0x282   :  { %4847 = vmatprep.subr.bf16.mxu1 %v6047_v15  ;;  %v8511_v15 = vpop.f32.mrf.mxu0 }
 0x283   :  { %v8519_v44 = vpop.f32.mrf.mxu1 }
 0x284   :  { %4805 = vmatpush2.bf16.msra.mxu0 %v5918_v43  ;;  %v6126_v43 = vcombine.low %v1449_v55, %v1453_v57 }
 0x285   :  { %4848 = vmatpush2.bf16.msra.mxu1 %v6046_v48  ;;  %4806 = vmatprep.subr.bf16.mxu0 %v5911_v50 }
 0x286   :  { %4849 = vmatprep.subr.bf16.mxu1 %v6039_v17  ;;  %v8527_v17 = vpop.f32.mrf.mxu0 }
 0x288   :  { %4807 = vmatpush2.bf16.msra.mxu0 %v5910_v18  ;;  %v1561_v18 = vld [vmem:[%s8974_s3 + $0xcd8] sm:$0xff] }
 0x289   :  { %4850 = vmatpush2.bf16.msra.mxu1 %v6038_v28  ;;  %4808 = vmatprep.subr.bf16.mxu0 %v5903_v10  ;;  %v8535_v28 = vpop.f32.mrf.mxu1  ;;  %v8537_v10 = vpop.f32.mrf.mxu0  ;;  %v6238_v35 = vcombine.low %v1561_v18, %v1565_v26 }
 0x28a   :  { %4851 = vmatprep.subr.bf16.mxu1 %v6031_v63  ;;  %v6239_v63 = vcombine.high %v1561_v18, %v1565_v26 }
 0x28b   :  { %v8553_v56 = vpop.f32.mrf.mxu0 }
 0x28c   :  { %4809 = vmatpush2.bf16.msra.mxu0 %v5902_v30  ;;  %v1425_v30 = vld [vmem:[%s8974_s3 + $0x898] sm:$0xff] }
 0x28d   :  { %4852 = vmatpush2.bf16.msra.mxu1 %v6030_v32  ;;  %4810 = vmatprep.subr.bf16.mxu0 %v5895_v33  ;;  %v1557_v32 = vld [vmem:[%s8974_s3 + $0xcb8] sm:$0xff]  ;;  %v6110_v33 = vcombine.low %v1433_v51, %v1437_v16  ;;  %v6102_v47 = vcombine.low %v1425_v30, %v1429_v31  ;;  %v8569_v49 = vpop.f32.mrf.mxu0 }
 0x28e   :  { %4853 = vmatprep.subr.bf16.mxu1 %v6023_v34  ;;  %v8551_v34 = vpop.f32.mrf.mxu1 }
 0x290   :  { %4811 = vmatpush2.bf16.msra.mxu0 %v5894_v36  ;;  %v6103_v36 = vcombine.high %v1425_v30, %v1429_v31  ;;  %v8561_v41 = vpop.f32.mrf.mxu1  ;;  %v1649_v30 = vld [vmem:[%s8974_s3 + $0xf98] sm:$0xff] }
 0x291   :  { %4854 = vmatpush2.bf16.msra.mxu1 %v6022_v37  ;;  %4866 = vmatprep.subr.bf16.mxu0 %v6143_v38  ;;  %v6231_v37 = vcombine.high %v1553_v1, %v1557_v32  ;;  %v1417_v38 = vld [vmem:[%s8974_s3 + $0x858] sm:$0xff] }
 0x292   :  { %4909 = vmatprep.subr.bf16.mxu1 %v6271_v39  ;;  %v1421_v39 = vld [vmem:[%s8974_s3 + $0x878] sm:$0xff]  ;;  %v8577_v4 = vpop.f32.mrf.mxu1 }
 0x293   :  { %4813 = vmatmul.mubr.bf16.vlgmr.msra.gmra.mxu0 %v7269_v0  ;;  %v6127_v0 = vcombine.high %v1449_v55, %v1453_v57  ;;  %v1409_v57 = vld [vmem:[%s8974_s3 + $0x818] sm:$0xff] }
 0x294   :  { %4856 = vmatmul.mubr.bf16.vlgmr.msra.gmra.mxu1 %v7273_v3  ;;  %4867 = vmatpush1.bf16.msra.mxu0 %v6142_v46  ;;  %v1445_v3 = vld [vmem:[%s8974_s3 + $0x938] sm:$0xff] }
 0x295   :  { %4898 = vmatprep.mubr.bf16.mxu0 %v7487_v2  ;;  %4910 = vmatpush1.bf16.msra.mxu1 %v6270_v52  ;;  %v1569_v2 = vld [vmem:[%s8974_s3 + $0xd18] sm:$0xff]  ;;  %v6119_v48 = vcombine.high %v1441_v14, %v1445_v3  ;;  %v6118_v27 = vcombine.low %v1441_v14, %v1445_v3  ;;  %v6230_v52 = vcombine.low %v1553_v1, %v1557_v32 }
 0x296   :  { %4941 = vmatprep.mubr.bf16.mxu1 %v7497_v8  ;;  %4868 = vmatprep.subr.bf16.mxu0 %v6135_v53  ;;  %v1573_v8 = vld [vmem:[%s8974_s3 + $0xd38] sm:$0xff]  ;;  %v6095_v53 = vcombine.high %v1417_v38, %v1421_v39 }
 0x297   :  { %4911 = vmatprep.subr.bf16.mxu1 %v6263_v61  ;;  %v6247_v50 = vcombine.high %v1569_v2, %v1573_v8  ;;  %v6246_v24 = vcombine.low %v1569_v2, %v1573_v8  ;;  %v1549_v46 = vld [vmem:[%s8974_s3 + $0xc78] sm:$0xff] }
 0x298   :  { %4869 = vmatpush1.bf16.msra.mxu0 %v6134_v6  ;;  %v6223_v55 = vcombine.high %v1545_v42, %v1549_v46  ;;  %v1413_v61 = vld [vmem:[%s8974_s3 + $0x838] sm:$0xff] }
 0x299   :  { %4912 = vmatpush1.bf16.msra.mxu1 %v6262_v12  ;;  %4870 = vmatprep.subr.bf16.mxu0 %v6127_v0  ;;  %v1541_v6 = vld [vmem:[%s8974_s3 + $0xc38] sm:$0xff]  ;;  %v6094_v12 = vcombine.low %v1417_v38, %v1421_v39  ;;  %v8585_v0 = vpop.f32.mrf.mxu0  ;;  %v6087_v14 = vcombine.high %v1409_v57, %v1413_v61  ;;  %v6086_v51 = vcombine.low %v1409_v57, %v1413_v61 }
 0x29a   :  { %4913 = vmatprep.subr.bf16.mxu1 %v6255_v13  ;;  %v6222_v13 = vcombine.low %v1545_v42, %v1549_v46  ;;  %v6215_v3 = vcombine.high %v1537_v5, %v1541_v6  ;;  %v1529_v2 = vld [vmem:[%s8974_s3 + $0xbd8] sm:$0xff]  ;;  %v6214_v16 = vcombine.low %v1537_v5, %v1541_v6 }
 0x29b   :  { %v1533_v8 = vld [vmem:[%s8974_s3 + $0xbf8] sm:$0xff] }
 0x29c   :  { %4871 = vmatpush1.bf16.msra.mxu0 %v6126_v43  ;;  %v8593_v43 = vpop.f32.mrf.mxu1  ;;  %v6207_v18 = vcombine.high %v1529_v2, %v1533_v8  ;;  %v1653_v31 = vld [vmem:[%s8974_s3 + $0xfb8] sm:$0xff]  ;;  %v6206_v1 = vcombine.low %v1529_v2, %v1533_v8 }
 0x29d   :  { %4914 = vmatpush1.bf16.msra.mxu1 %v6254_v45  ;;  %4872 = vmatprep.subr.bf16.mxu0 %v6119_v48  ;;  %v8595_v45 = vpop.f32.mrf.mxu0  ;;  %v1657_v48 = vld [vmem:[%s8974_s3 + $0xfd8] sm:$0xff] }
 0x29e   :  { %4915 = vmatprep.subr.bf16.mxu1 %v6247_v50  ;;  %v1661_v50 = vld [vmem:[%s8974_s3 + $0xff8] sm:$0xff] }
 0x29f   :  { %v6335_v26 = vcombine.high %v1657_v48, %v1661_v50  ;;  %v1517_v38 = vld [vmem:[%s8974_s3 + $0xb78] sm:$0xff] }
 0x2a0   :  { %4873 = vmatpush1.bf16.msra.mxu0 %v6118_v27  ;;  %v1521_v27 = vld [vmem:[%s8974_s3 + $0xb98] sm:$0xff] }
 0x2a1   :  { %4916 = vmatpush1.bf16.msra.mxu1 %v6246_v24  ;;  %4874 = vmatprep.subr.bf16.mxu0 %v6111_v29  ;;  %v1525_v24 = vld [vmem:[%s8974_s3 + $0xbb8] sm:$0xff]  ;;  %v8609_v29 = vpop.f32.mrf.mxu1 }
 0x2a2   :  { %4917 = vmatprep.subr.bf16.mxu1 %v6239_v63  ;;  %v8611_v63 = vpop.f32.mrf.mxu0  ;;  %v1641_v42 = vld [vmem:[%s8974_s3 + $0xf58] sm:$0xff] }
 0x2a3   :  { %v8619_v32 = vpop.f32.mrf.mxu1  ;;  %v1645_v46 = vld [vmem:[%s8974_s3 + $0xf78] sm:$0xff] }
 0x2a4   :  { %4875 = vmatpush1.bf16.msra.mxu0 %v6110_v33  ;;  %v6334_v33 = vcombine.low %v1657_v48, %v1661_v50  ;;  %v8627_v39 = vpop.f32.mrf.mxu0  ;;  %v6319_v57 = vcombine.high %v1641_v42, %v1645_v46  ;;  %v1505_v61 = vld [vmem:[%s8974_s3 + $0xb18] sm:$0xff]  ;;  %v6318_v8 = vcombine.low %v1641_v42, %v1645_v46 }
 0x2a5   :  { %4918 = vmatpush1.bf16.msra.mxu1 %v6238_v35  ;;  %4876 = vmatprep.subr.bf16.mxu0 %v6103_v36  ;;  %v6199_v35 = vcombine.high %v1521_v27, %v1525_v24  ;;  %v6327_v36 = vcombine.high %v1649_v30, %v1653_v31  ;;  %v1509_v5 = vld [vmem:[%s8974_s3 + $0xb38] sm:$0xff] }
 0x2a6   :  { %4919 = vmatprep.subr.bf16.mxu1 %v6231_v37  ;;  %v1513_v37 = vld [vmem:[%s8974_s3 + $0xb58] sm:$0xff]  ;;  %v4476_v6 = vpop.f32.mrf.mxu0  ;;  %v6183_v48 = vcombine.high %v1505_v61, %v1509_v5 }
 0x2a7   :  { %v1617_v46 = vld [vmem:[%s8974_s3 + $0xe98] sm:$0xff] }
 0x2a8   :  { %4877 = vmatpush1.bf16.msra.mxu0 %v6102_v47  ;;  %v6198_v47 = vcombine.low %v1521_v27, %v1525_v24  ;;  %v8651_v2 = vpop.f32.mrf.mxu0  ;;  %v6182_v27 = vcombine.low %v1505_v61, %v1509_v5 }
 0x2a9   :  { %4920 = vmatpush1.bf16.msra.mxu1 %v6230_v52  ;;  %4878 = vmatprep.subr.bf16.mxu0 %v6095_v53  ;;  %v8635_v52 = vpop.f32.mrf.mxu1  ;;  %v6326_v53 = vcombine.low %v1649_v30, %v1653_v31 }
 0x2aa   :  { %4921 = vmatprep.subr.bf16.mxu1 %v6223_v55  ;;  %v6191_v55 = vcombine.high %v1513_v37, %v1517_v38  ;;  %v4558_v30 = vpop.f32.mrf.mxu0 }
 0x2ac   :  { %4879 = vmatpush1.bf16.msra.mxu0 %v6094_v12  ;;  %v1633_v12 = vld [vmem:[%s8974_s3 + $0xf18] sm:$0xff]  ;;  %v8691_v61 = vpop.f32.mrf.mxu0 }
 0x2ad   :  { %4922 = vmatpush1.bf16.msra.mxu1 %v6222_v13  ;;  %4880 = vmatprep.subr.bf16.mxu0 %v6087_v14  ;;  %v1637_v13 = vld [vmem:[%s8974_s3 + $0xf38] sm:$0xff]  ;;  %v6190_v14 = vcombine.low %v1513_v37, %v1517_v38 }
 0x2ae   :  { %4923 = vmatprep.subr.bf16.mxu1 %v6215_v3  ;;  %v8649_v3 = vpop.f32.mrf.mxu1  ;;  %v6311_v50 = vcombine.high %v1633_v12, %v1637_v13  ;;  %v6310_v31 = vcombine.low %v1633_v12, %v1637_v13  ;;  %v1493_v37 = vld [vmem:[%s8974_s3 + $0xab8] sm:$0xff] }
 0x2b0   :  { %4881 = vmatpush1.bf16.msra.mxu0 %v6086_v51  ;;  %v1497_v51 = vld [vmem:[%s8974_s3 + $0xad8] sm:$0xff]  ;;  %v4519_v24 = vpop.f32.mrf.mxu1 }
 0x2b1   :  { %4924 = vmatpush1.bf16.msra.mxu1 %v6214_v16  ;;  %4882 = vmatprep.subr.bf16.mxu0 %v6207_v18  ;;  %v1501_v16 = vld [vmem:[%s8974_s3 + $0xaf8] sm:$0xff] }
 0x2b2   :  { %4925 = vmatprep.subr.bf16.mxu1 %v6335_v26  ;;  %v1625_v18 = vld [vmem:[%s8974_s3 + $0xed8] sm:$0xff]  ;;  %v8679_v42 = vpop.f32.mrf.mxu1 }
 0x2b3   :  { %v1629_v26 = vld [vmem:[%s8974_s3 + $0xef8] sm:$0xff] }
 0x2b4   :  { %4883 = vmatpush2.bf16.msra.mxu0 %v6206_v1  ;;  %v6175_v1 = vcombine.high %v1497_v51, %v1501_v16 }
 0x2b5   :  { %4926 = vmatpush2.bf16.msra.mxu1 %v6334_v33  ;;  %4884 = vmatprep.subr.bf16.mxu0 %v6199_v35  ;;  %v8668_v33 = vld [vmem:[%s8977_s4] sm:$0xff]  ;;  %v6303_v35 = vcombine.high %v1625_v18, %v1629_v26 }
 0x2b6   :  { %4927 = vmatprep.subr.bf16.mxu1 %v6327_v36  ;;  %v1489_v36 = vld [vmem:[%s8974_s3 + $0xa98] sm:$0xff]  ;;  %v1671_v38 = vrot.slane %v8668_v33, %v1076_v21  ;;  %v6302_v21 = vcombine.low %v1625_v18, %v1629_v26  ;;  %v4562_v18 = vpop.f32.mrf.mxu0 }
 0x2b7   :  { %v6167_v5 = vcombine.high %v1489_v36, %v1493_v37 }
 0x2b8   :  { %4885 = vmatpush2.bf16.msra.mxu0 %v6198_v47  ;;  %v1621_v47 = vld [vmem:[%s8974_s3 + $0xeb8] sm:$0xff] }
 0x2b9   :  { %4928 = vmatpush2.bf16.msra.mxu1 %v6326_v53  ;;  %4886 = vmatprep.subr.bf16.mxu0 %v6191_v55  ;;  %v1679_v53 = vrot.slane %v8668_v33, %v1084_v23  ;;  %v6174_v55 = vcombine.low %v1497_v51, %v1501_v16  ;;  %v6295_v13 = vcombine.high %v1617_v46, %v1621_v47  ;;  %v1485_v23 = vld [vmem:[%s8974_s3 + $0xa78] sm:$0xff] }
 0x2ba   :  { %4929 = vmatprep.subr.bf16.mxu1 %v6319_v57  ;;  %v4305_v57 = vadd.f32 %v8527_v17, %v1671_v38  ;;  %v4601_v17 = vpop.f32.mrf.mxu1  ;;  %v6166_v51 = vcombine.low %v1489_v36, %v1493_v37  ;;  %v6294_v26 = vcombine.low %v1617_v46, %v1621_v47  ;;  %v1605_v37 = vld [vmem:[%s8974_s3 + $0xe38] sm:$0xff] }
 0x2bb   :  { %v4477_v12 = vadd.f32 %v4476_v6, %v1679_v53  ;;  %v1613_v6 = vld [vmem:[%s8974_s3 + $0xe78] sm:$0xff] }
 0x2bc   :  { %4887 = vmatpush2.bf16.msra.mxu0 %v6190_v14  ;;  %v1481_v14 = vld [vmem:[%s8974_s3 + $0xa58] sm:$0xff]  ;;  %v4348_v16 = vadd.f32 %v8551_v34, %v4305_v57  ;;  %v8716_v36 = vpop.f32.mrf.mxu1 }
 0x2bd   :  { %4930 = vmatpush2.bf16.msra.mxu1 %v6318_v8  ;;  %4888 = vmatprep.subr.bf16.mxu0 %v6183_v48  ;;  %v4301_v8 = vadd.f32 %v8491_v60, %v1671_v38  ;;  %v1609_v48 = vld [vmem:[%s8974_s3 + $0xe58] sm:$0xff]  ;;  %v6159_v60 = vcombine.high %v1481_v14, %v1485_v23  ;;  %v6158_v47 = vcombine.low %v1481_v14, %v1485_v23 }
 0x2be   :  { %4931 = vmatprep.subr.bf16.mxu1 %v6311_v50  ;;  %v4473_v50 = vadd.f32 %v8611_v63, %v1679_v53  ;;  %v1477_v63 = vld [vmem:[%s8974_s3 + $0xa38] sm:$0xff]  ;;  %v4391_v34 = vadd.f32 %v8585_v0, %v4348_v16  ;;  %v6497_v16 = vld [vmem:[%s8976_s5 + $0xf0] sm:$0xff]  }
 0x2c0   :  { %4889 = vmatpush2.bf16.msra.mxu0 %v6182_v27  ;;  %v4520_v27 = vadd.f32 %v4519_v24, %v4477_v12  ;;  %v1601_v24 = vld [vmem:[%s8974_s3 + $0xe18] sm:$0xff]  ;;  %v4516_v38 = vadd.f32 %v8635_v52, %v4473_v50  ;;  %v6496_v50 = vld [vmem:[%s8976_s5 + $0x70] sm:$0xff]  }
 0x2c1   :  { %4932 = vmatpush2.bf16.msra.mxu1 %v6310_v31  ;;  %4890 = vmatprep.subr.bf16.mxu0 %v6175_v1  ;;  %v6287_v31 = vcombine.high %v1609_v48, %v1613_v6  ;;  %v1473_v1 = vld [vmem:[%s8974_s3 + $0xa18] sm:$0xff]  ;;  %v6279_v57 = vcombine.high %v1601_v24, %v1605_v37  ;;  %v6278_v14 = vcombine.low %v1601_v24, %v1605_v37  ;;  %v6507_v24 = vld [vmem:[%s8976_s5 + $0xa0] sm:$0xff]  }
 0x2c2   :  { %4933 = vmatprep.subr.bf16.mxu1 %v6303_v35  ;;  %v4344_v35 = vadd.f32 %v8519_v44, %v4301_v8  ;;  %v4563_v46 = vadd.f32 %v4562_v18, %v4520_v27  ;;  %v6286_v44 = vcombine.low %v1609_v48, %v1613_v6  ;;  %v6151_v0 = vcombine.high %v1473_v1, %v1477_v63  ;;  %v6495_v6 = vld [vmem:[%s8976_s5 + $0xb8] sm:$0xff]   ;;  %v6502_v27 = vld [vmem:[%s8976_s5 + $0x28] sm:$0xff]  }
 0x2c3   :  { %v6508_v37 = vld [vmem:[%s8976_s5 + $0x58] sm:$0xff]  }
 0x2c4   :  { %4891 = vmatpush2.bf16.msra.mxu0 %v6174_v55  ;;  %v4387_v53 = vadd.f32 %v8553_v56, %v4344_v35  ;;  %v4559_v55 = vadd.f32 %v4558_v30, %v4516_v38  ;;  %v6492_v56 = vld [vmem:[%s8976_s5 + $0x78] sm:$0xff]   ;;  %v6506_v35 = vld [vmem:[%s8976_s5 + $0x20] sm:$0xff]   ;;  %v1675_v38 = vrot.slane %v8668_v33, %v1080_v25 }
 0x2c5   :  { %4934 = vmatpush2.bf16.msra.mxu1 %v6302_v21  ;;  %4892 = vmatprep.subr.bf16.mxu0 %v6167_v5  ;;  %v4434_v21 = vadd.f32 %v8609_v29, %v4391_v34  ;;  %v4605_v5 = vpop.f32.mrf.mxu1  ;;  %v6493_v30 = vld [vmem:[%s8976_s5 + $0xf8] sm:$0xff]   ;;  %v1667_v34 = vrot.slane %v8668_v33, %v1072_v22 }
 0x2c6   :  { %4935 = vmatprep.subr.bf16.mxu1 %v6295_v13  ;;  %v4606_v12 = vadd.f32 %v4605_v5, %v4563_v46  ;;  %v6150_v13 = vcombine.low %v1473_v1, %v1477_v63  ;;  %v4430_v52 = vadd.f32 %v8577_v4, %v4387_v53  ;;  %v4602_v23 = vadd.f32 %v4601_v17, %v4559_v55  ;;  %v6494_v4 = vld [vmem:[%s8976_s5 + $0x38] sm:$0xff]   ;;  %v6504_v1 = vld [vmem:[%s8976_s5 + $0x60] sm:$0xff]  }
 0x2c7   :  { %v4961_v29 = vmax.f32 %v4434_v21, 0.0  ;;  %v6505_v63 = vld [vmem:[%s8976_s5 + $0xe0] sm:$0xff]   ;;  %v6509_v46 = vld [vmem:[%s8976_s5 + $0xd8] sm:$0xff]   ;;  %v4303_v22 = vadd.f32 %v8511_v15, %v1667_v34  ;;  %v4471_v15 = vadd.f32 %v8595_v45, %v1675_v38  ;;  %v6515_v45 = vld [vmem:[%s8976_s5 + $0x90] sm:$0xff]  }
 0x2c8   :  { %4893 = vmatpush2.bf16.msra.mxu0 %v6166_v51  ;;  %v4963_v8 = vmax.f32 %v4606_v12, 0.0  ;;  %v4953_v48 = vmax.f32 %v4430_v52, 0.0  ;;  %v4955_v17 = vmax.f32 %v4602_v23, 0.0  ;;  %v6510_v53 = vld [vmem:[%s8976_s5 + $0x18] sm:$0xff]   ;;  %v6518_v52 = vld [vmem:[%s8976_s5 + $0x8] sm:$0xff]   ;;  %v6522_v23 = vld [vmem:[%s8976_s5] sm:$0xff]  }
 0x2c9   :  { %4936 = vmatpush2.bf16.msra.mxu1 %v6294_v26  ;;  %4894 = vmatprep.subr.bf16.mxu0 %v6159_v60  ;;  %v6498_v26 = vld [vmem:[%s8976_s5 + $0x30] sm:$0xff]   ;;  %v6511_v25 = vld [vmem:[%s8976_s5 + $0x98] sm:$0xff]   ;;  %v4346_v55 = vadd.f32 %v8535_v28, %v4303_v22  ;;  %v6516_v28 = vld [vmem:[%s8976_s5 + $0x48] sm:$0xff]  }
 0x2ca   :  { %4937 = vmatprep.subr.bf16.mxu1 %v6287_v31  ;;  %v4969_v51 = vpack.c.bf16 %v4961_v29, %v4953_v48  ;;  %v4971_v18 = vpack.c.bf16 %v4963_v8, %v4955_v17  ;;  %v6499_v60 = vld [vmem:[%s8976_s5 + $0xb0] sm:$0xff]   ;;  %v6503_v31 = vld [vmem:[%s8976_s5 + $0xa8] sm:$0xff]   ;;  %v6524_v29 = vld [vmem:[%s8976_s5 + $0x178] sm:$0xff]  }
 0x2cb   :  { %v4389_v5 = vadd.f32 %v8569_v49, %v4346_v55  ;;  %v6525_v48 = vld [vmem:[%s8976_s5 + $0x138] sm:$0xff]   ;;  %v6526_v17 = vld [vmem:[%s8976_s5 + $0x170] sm:$0xff]   ;;  %v6536_v22 = vld [vmem:[%s8976_s5 + $0x148] sm:$0xff]   ;;  %v1683_v55 = vrot.slane %v8668_v33, %v1088_v58 }
 0x2cc   :  { %4895 = vmatpush2.bf16.msra.mxu0 %v6158_v47  ;;  %v4475_v47 = vadd.f32 %v8627_v39, %v1675_v38  ;;  %v6513_v39 = vld [vmem:[%s8976_s5 + $0xd0] sm:$0xff]   ;;  %v6549_v58 = vld [vmem:[%s8976_s5 + $0x198] sm:$0xff]  }
 0x2cd   :  { %4938 = vmatpush2.bf16.msra.mxu1 %v6286_v44  ;;  %4896 = vmatprep.subr.bf16.mxu0 %v6151_v0  ;;  %v4299_v44 = vadd.f32 %v8471_v40, %v1667_v34  ;;  %v6512_v0 = vld [vmem:[%s8976_s5 + $0x50] sm:$0xff]   ;;  %v6547_v34 = vld [vmem:[%s8976_s5 + $0x1a0] sm:$0xff]  }
 0x2ce   :  { %4939 = vmatprep.subr.bf16.mxu1 %v6279_v57  ;;  %v4518_v40 = vadd.f32 %v8649_v3, %v4475_v47  ;;  %v6514_v57 = vld [vmem:[%s8976_s5 + $0x10] sm:$0xff]   ;;  %v4514_v3 = vadd.f32 %v8619_v32, %v4471_v15  ;;  %v6519_v32 = vld [vmem:[%s8976_s5 + $0x88] sm:$0xff]   ;;  %v1687_v15 = vrot.slane %v8668_v33, %v1092_v54  ;;  %v6548_v54 = vld [vmem:[%s8976_s5 + $0x1d8] sm:$0xff]  }
 0x2cf   :  { %v4342_v21 = vadd.f32 %v8501_v9, %v4299_v44  ;;  %v6517_v9 = vld [vmem:[%s8976_s5 + $0xc8] sm:$0xff]   ;;  %v6535_v38 = vld [vmem:[%s8976_s5 + $0x110] sm:$0xff]  }
 0x2d0   :  { %4897 = vmatpush2.bf16.msra.mxu0 %v6150_v13  ;;  %v4561_v12 = vadd.f32 %v8691_v61, %v4518_v40  ;;  %v4557_v13 = vadd.f32 %v8651_v2, %v4514_v3  ;;  %v6520_v61 = vld [vmem:[%s8976_s5 + $0x40] sm:$0xff]  }
 0x2d1   :  { %4940 = vmatpush2.bf16.msra.mxu1 %v6278_v14  ;;  %6401 = vmatprep.subr.bf16.mxu0 %v6492_v56  ;;  %v4385_v49 = vadd.f32 %v8537_v10, %v4342_v21  ;;  %v4432_v14 = vadd.f32 %v8593_v43, %v4389_v5  ;;  %v6521_v2 = vld [vmem:[%s8976_s5 + $0xc0] sm:$0xff]  }
 0x2d2   :  { %6423 = vmatprep.subr.bf16.mxu1 %v6493_v30  ;;  %v4604_v10 = vadd.f32 %v8716_v36, %v4561_v12  ;;  %v4600_v43 = vadd.f32 %v8679_v42, %v4557_v13  ;;  %v6523_v36 = vld [vmem:[%s8976_s5 + $0x80] sm:$0xff]  }
 0x2d3   :  { %4899 = vmatmul.mubr.bf16.vlgmr.msra.gmra.mxu0 %v7495_v7  ;;  %v6500_v7 = vld [vmem:[%s8976_s5 + $0x68] sm:$0xff]   ;;  %v4428_v56 = vadd.f32 %v8561_v41, %v4385_v49  ;;  %v4960_v30 = vmax.f32 %v4432_v14, 0.0  ;;  %v6540_v41 = vld [vmem:[%s8976_s5 + $0x1f8] sm:$0xff]  }
 0x2d4   :  { %4942 = vmatmul.mubr.bf16.vlgmr.msra.gmra.mxu1 %v7499_v11  ;;  %6402 = vmatpush3.bf16.msra.mxu0 %v6494_v4  ;;  %v6501_v11 = vld [vmem:[%s8976_s5 + $0xe8] sm:$0xff]   ;;  %v4962_v8 = vmax.f32 %v4604_v10, 0.0  ;;  %v4954_v4 = vmax.f32 %v4600_v43, 0.0  ;;  %v4685_v47 = vpop.f32.mrf.mxu1  ;;  %v6550_v43 = vld [vmem:[%s8976_s5 + $0x1d0] sm:$0xff]  }
 0x2d5   :  { %5527 = vmatprep.mubr.bf16.mxu0 %v4969_v51  ;;  %6424 = vmatpush3.bf16.msra.mxu1 %v6495_v6  ;;  %v4952_v42 = vmax.f32 %v4428_v56, 0.0 }
 0x2d6   :  { %5568 = vmatprep.mubr.bf16.mxu1 %v4971_v18  ;;  %6403 = vmatprep.subr.bf16.mxu0 %v6496_v50  ;;  %v6541_v50 = vld [vmem:[%s8976_s5 + $0x1b8] sm:$0xff]   ;;  %v4970_v51 = vpack.c.bf16 %v4962_v8, %v4954_v4  ;;  %v6527_v18 = vld [vmem:[%s8976_s5 + $0x130] sm:$0xff]  }
 0x2d7   :  { %6425 = vmatprep.subr.bf16.mxu1 %v6497_v16  ;;  %v4968_v6 = vpack.c.bf16 %v4960_v30, %v4952_v42  ;;  %v6542_v16 = vld [vmem:[%s8976_s5 + $0x1f0] sm:$0xff]  }
 0x2d8   :  { %6404 = vmatpush3.bf16.msra.mxu0 %v6498_v26  ;;  %v6528_v26 = vld [vmem:[%s8976_s5 + $0x168] sm:$0xff]  }
 0x2d9   :  { %6426 = vmatpush3.bf16.msra.mxu1 %v6499_v60  ;;  %6405 = vmatprep.subr.bf16.mxu0 %v6500_v7  ;;  %v6543_v60 = vld [vmem:[%s8976_s5 + $0x1b0] sm:$0xff]   ;;  %v6544_v7 = vld [vmem:[%s8976_s5 + $0x1e8] sm:$0xff]  }
 0x2da   :  { %6427 = vmatprep.subr.bf16.mxu1 %v6501_v11  ;;  %v6529_v11 = vld [vmem:[%s8976_s5 + $0x128] sm:$0xff]  }
 0x2dc   :  { %6406 = vmatpush3.bf16.msra.mxu0 %v6502_v27  ;;  %v6530_v27 = vld [vmem:[%s8976_s5 + $0x160] sm:$0xff]  }
 0x2dd   :  { %6428 = vmatpush3.bf16.msra.mxu1 %v6503_v31  ;;  %6407 = vmatprep.subr.bf16.mxu0 %v6504_v1  ;;  %v6545_v31 = vld [vmem:[%s8976_s5 + $0x1a8] sm:$0xff]   ;;  %v6546_v1 = vld [vmem:[%s8976_s5 + $0x1e0] sm:$0xff]  }
 0x2de   :  { %6429 = vmatprep.subr.bf16.mxu1 %v6505_v63  ;;  %v6531_v63 = vld [vmem:[%s8976_s5 + $0x120] sm:$0xff]  }
 0x2e0   :  { %6408 = vmatpush3.bf16.msra.mxu0 %v6506_v35  ;;  %v6532_v35 = vld [vmem:[%s8976_s5 + $0x158] sm:$0xff]  }
 0x2e1   :  { %6430 = vmatpush3.bf16.msra.mxu1 %v6507_v24  ;;  %6409 = vmatprep.subr.bf16.mxu0 %v6508_v37  ;;  %v6533_v24 = vld [vmem:[%s8976_s5 + $0x118] sm:$0xff]   ;;  %v6534_v37 = vld [vmem:[%s8976_s5 + $0x150] sm:$0xff]  }
 0x2e2   :  { %6431 = vmatprep.subr.bf16.mxu1 %v6509_v46  ;;  %v4642_v46 = vpop.f32.mrf.mxu0 }
 0x2e3   :  { %v4643_v5 = vadd.f32 %v4642_v46, %v1683_v55 }
 0x2e4   :  { %6410 = vmatpush3.bf16.msra.mxu0 %v6510_v53  ;;  %v6537_v53 = vld [vmem:[%s8976_s5 + $0x108] sm:$0xff]   ;;  %v4644_v44 = vpop.f32.mrf.mxu0 }
 0x2e5   :  { %6432 = vmatpush3.bf16.msra.mxu1 %v6511_v25  ;;  %6411 = vmatprep.subr.bf16.mxu0 %v6512_v0  ;;  %v6538_v25 = vld [vmem:[%s8976_s5 + $0x140] sm:$0xff]   ;;  %v4687_v0 = vpop.f32.mrf.mxu1  ;;  %v4645_v21 = vadd.f32 %v4644_v44, %v1687_v15 }
 0x2e6   :  { %6433 = vmatprep.subr.bf16.mxu1 %v6513_v39  ;;  %v6539_v39 = vld [vmem:[%s8976_s5 + $0x100] sm:$0xff]   ;;  %v4646_v40 = vpop.f32.mrf.mxu0 }
 0x2e8   :  { %6412 = vmatpush3.bf16.msra.mxu0 %v6514_v57  ;;  %v4689_v57 = vpop.f32.mrf.mxu1 }
 0x2e9   :  { %6434 = vmatpush3.bf16.msra.mxu1 %v6515_v45  ;;  %6413 = vmatprep.subr.bf16.mxu0 %v6516_v28  ;;  %v4648_v45 = vpop.f32.mrf.mxu0  ;;  %v4647_v28 = vadd.f32 %v4646_v40, %v1683_v55 }
 0x2ea   :  { %6435 = vmatprep.subr.bf16.mxu1 %v6517_v9  ;;  %v4691_v3 = vpop.f32.mrf.mxu1  ;;  %v4688_v9 = vadd.f32 %v4687_v0, %v4645_v21  ;;  %v4649_v49 = vadd.f32 %v4648_v45, %v1687_v15 }
 0x2ec   :  { %6414 = vmatpush3.bf16.msra.mxu0 %v6518_v52  ;;  %v4686_v52 = vadd.f32 %v4685_v47, %v4643_v5 }
 0x2ed   :  { %6436 = vmatpush3.bf16.msra.mxu1 %v6519_v32  ;;  %6415 = vmatprep.subr.bf16.mxu0 %v6520_v61  ;;  %v4690_v32 = vadd.f32 %v4689_v57, %v4647_v28 }
 0x2ee   :  { %6437 = vmatprep.subr.bf16.mxu1 %v6521_v2 }
 0x2f0   :  { %6416 = vmatpush3.bf16.msra.mxu0 %v6522_v23  ;;  %v4692_v23 = vadd.f32 %v4691_v3, %v4649_v49 }
 0x2f1   :  { %6438 = vmatpush3.bf16.msra.mxu1 %v6523_v36  ;;  %6445 = vmatprep.subr.bf16.mxu0 %v6524_v29  ;;  %v6551_v29 = vld [vmem:[%s8976_s5 + $0x190] sm:$0xff]  }
 0x2f2   :  { %6467 = vmatprep.subr.bf16.mxu1 %v6540_v41 }
 0x2f3   :  { %5528 = vmatmul.mubr.bf16.vlgmr.msra.gmra.mxu0 %v4968_v6 }
 0x2f4   :  { %5569 = vmatmul.mubr.bf16.vlgmr.msra.gmra.mxu1 %v4970_v51  ;;  %6446 = vmatpush3.bf16.msra.mxu0 %v6525_v48  ;;  %v6553_v51 = vld [vmem:[%s8976_s5 + $0x188] sm:$0xff]  }
 0x2f5   :  { %6447 = vmatprep.subr.bf16.mxu0 %v6526_v17  ;;  %6468 = vmatpush3.bf16.msra.mxu1 %v6541_v50  ;;  %v6552_v17 = vld [vmem:[%s8976_s5 + $0x1c8] sm:$0xff]  }
 0x2f6   :  { %6469 = vmatprep.subr.bf16.mxu1 %v6542_v16 }
 0x2f8   :  { %6448 = vmatpush3.bf16.msra.mxu0 %v6527_v18 }
 0x2f9   :  { %6449 = vmatprep.subr.bf16.mxu0 %v6528_v26  ;;  %6470 = vmatpush3.bf16.msra.mxu1 %v6543_v60 }
 0x2fa   :  { %6471 = vmatprep.subr.bf16.mxu1 %v6544_v7  ;;  %v6554_v7 = vld [vmem:[%s8976_s5 + $0x1c0] sm:$0xff]  }
 0x2fc   :  { %6450 = vmatpush3.bf16.msra.mxu0 %v6529_v11 }
 0x2fd   :  { %6451 = vmatprep.subr.bf16.mxu0 %v6530_v27  ;;  %6472 = vmatpush3.bf16.msra.mxu1 %v6545_v31  ;;  %v6555_v27 = vld [vmem:[%s8976_s5 + $0x180] sm:$0xff]  }
 0x2fe   :  { %6473 = vmatprep.subr.bf16.mxu1 %v6546_v1 }
 0x300   :  { %6452 = vmatpush3.bf16.msra.mxu0 %v6531_v63 }
 0x301   :  { %6453 = vmatprep.subr.bf16.mxu0 %v6532_v35  ;;  %6474 = vmatpush3.bf16.msra.mxu1 %v6547_v34 }
 0x302   :  { %6475 = vmatprep.subr.bf16.mxu1 %v6548_v54 }
 0x304   :  { %6454 = vmatpush3.bf16.msra.mxu0 %v6533_v24  ;;  %v1695_v24 = vrot.slane %v8668_v33, %v1100_v59 }
 0x305   :  { %6455 = vmatprep.subr.bf16.mxu0 %v6534_v37  ;;  %6476 = vmatpush3.bf16.msra.mxu1 %v6549_v58  ;;  %v1691_v37 = vrot.slane %v8668_v33, %v1096_v62 }
 0x306   :  { %6477 = vmatprep.subr.bf16.mxu1 %v6550_v43 }
 0x308   :  { %6456 = vmatpush3.bf16.msra.mxu0 %v6535_v38 }
 0x309   :  { %6457 = vmatprep.subr.bf16.mxu0 %v6536_v22  ;;  %6478 = vmatpush3.bf16.msra.mxu1 %v6551_v29 }
 0x30a   :  { %6479 = vmatprep.subr.bf16.mxu1 %v6552_v17 }
 0x30c   :  { %6458 = vmatpush3.bf16.msra.mxu0 %v6537_v53 }
 0x30d   :  { %6459 = vmatprep.subr.bf16.mxu0 %v6538_v25  ;;  %6480 = vmatpush3.bf16.msra.mxu1 %v6553_v51 }
 0x30e   :  { %6481 = vmatprep.subr.bf16.mxu1 %v6554_v7  ;;  %v5662_v7 = vand.u32 127, %v1070_v19 }
 0x310   :  { %6460 = vmatpush3.bf16.msra.mxu0 %v6539_v39  ;;  %vm5663_vm0 = vcmp.lt.s32.totalorder %v5662_v7, 8 }
 0x311   :  { %6482 = vmatpush3.bf16.msra.mxu1 %v6555_v27 }
 0x313   :  { %v4728_v12 = vpop.f32.mrf.mxu0 }
 0x314   :  { %v4771_v13 = vpop.f32.mrf.mxu1  ;;  %v4729_v2 = vadd.f32 %v4728_v12, %v4686_v52 }
 0x315   :  { %v4730_v14 = vpop.f32.mrf.mxu0 }
 0x316   :  { %v4731_v61 = vadd.f32 %v4730_v14, %v4688_v9  ;;  %v4773_v10 = vpop.f32.mrf.mxu1  ;;  %v4772_v48 = vadd.f32 %v4771_v13, %v4729_v2 }
 0x317   :  { %v4732_v56 = vpop.f32.mrf.mxu0 }
 0x318   :  { %v4733_v30 = vadd.f32 %v4732_v56, %v4690_v32  ;;  %v4775_v36 = vpop.f32.mrf.mxu1  ;;  %v4774_v41 = vadd.f32 %v4773_v10, %v4731_v61  ;;  %v4956_v60 = vmax.f32 %v4772_v48, 0.0 }
 0x319   :  { %v4734_v8 = vpop.f32.mrf.mxu0 }
 0x31a   :  { %v4776_v42 = vadd.f32 %v4775_v36, %v4733_v30  ;;  %v4735_v4 = vadd.f32 %v4734_v8, %v4692_v23  ;;  %v4777_v6 = vpop.f32.mrf.mxu1  ;;  %v4957_v18 = vmax.f32 %v4774_v41, 0.0 }
 0x31c   :  { %v4778_v50 = vadd.f32 %v4777_v6, %v4735_v4  ;;  %v4964_v16 = vmax.f32 %v4776_v42, 0.0  ;;  %v6336_v4 = vld [vmem:[%s8978_s6] ss:$0 sm:$0xff] }
 0x31e   :  { %v4965_v26 = vmax.f32 %v4778_v50, 0.0  ;;  %v4972_v31 = vpack.c.bf16 %v4964_v16, %v4956_v60 }
 0x320   :  { %v4973_v11 = vpack.c.bf16 %v4965_v26, %v4957_v18 }
 0x322   :  { %5609 = vmatprep.mubr.bf16.mxu0 %v4973_v11 }
 0x323   :  { %5610 = vmatmul.mubr.bf16.vlgmr.msra.gmra.mxu0 %v4972_v31 }
 0x353   :  { %v4814_v1 = vpop.f32.mrf.mxu0 }
 0x354   :  { %v4857_v63 = vpop.f32.mrf.mxu1  ;;  %v4815_v47 = vadd.f32 %v4814_v1, %v1691_v37 }
 0x355   :  { %v4816_v35 = vpop.f32.mrf.mxu0 }
 0x356   :  { %v4859_v34 = vpop.f32.mrf.mxu1  ;;  %v4817_v22 = vadd.f32 %v4816_v35, %v1695_v24  ;;  %v4858_v40 = vadd.f32 %v4857_v63, %v4815_v47 }
 0x357   :  { %v4818_v38 = vpop.f32.mrf.mxu0 }
 0x358   :  { %v4861_v46 = vpop.f32.mrf.mxu1  ;;  %v4819_v44 = vadd.f32 %v4818_v38, %v1691_v37  ;;  %v4860_v15 = vadd.f32 %v4859_v34, %v4817_v22 }
 0x359   :  { %v4820_v53 = vpop.f32.mrf.mxu0 }
 0x35a   :  { %v4863_v25 = vpop.f32.mrf.mxu1  ;;  %v4821_v39 = vadd.f32 %v4820_v53, %v1695_v24  ;;  %v4862_v21 = vadd.f32 %v4861_v46, %v4819_v44 }
 0x35c   :  { %v4864_v28 = vadd.f32 %v4863_v25, %v4821_v39 }
 0x393   :  { %v4900_v0 = vpop.f32.mrf.mxu0 }
 0x394   :  { %v4943_v55 = vpop.f32.mrf.mxu1  ;;  %v4901_v45 = vadd.f32 %v4900_v0, %v4858_v40 }
 0x395   :  { %v4902_v57 = vpop.f32.mrf.mxu0 }
 0x396   :  { %v4903_v5 = vadd.f32 %v4902_v57, %v4860_v15  ;;  %v4945_v59 = vpop.f32.mrf.mxu1  ;;  %v4944_v49 = vadd.f32 %v4943_v55, %v4901_v45 }
 0x397   :  { %v4904_v20 = vpop.f32.mrf.mxu0 }
 0x398   :  { %v4905_v62 = vadd.f32 %v4904_v20, %v4862_v21  ;;  %v4947_v33 = vpop.f32.mrf.mxu1  ;;  %v4946_v12 = vadd.f32 %v4945_v59, %v4903_v5  ;;  %v4958_v61 = vmax.f32 %v4944_v49, 0.0 }
 0x399   :  { %v4906_v3 = vpop.f32.mrf.mxu0 }
 0x39a   :  { %v4948_v54 = vadd.f32 %v4947_v33, %v4905_v62  ;;  %v4907_v9 = vadd.f32 %v4906_v3, %v4864_v28  ;;  %v4949_v13 = vpop.f32.mrf.mxu1  ;;  %v4959_v14 = vmax.f32 %v4946_v12, 0.0 }
 0x39c   :  { %v4950_v58 = vadd.f32 %v4949_v13, %v4907_v9  ;;  %v4966_v52 = vmax.f32 %v4948_v54, 0.0 }
 0x39e   :  { %v4967_v32 = vmax.f32 %v4950_v58, 0.0  ;;  %v4974_v2 = vpack.c.bf16 %v4966_v52, %v4958_v61 }
 0x3a0   :  { %v4975_v10 = vpack.c.bf16 %v4967_v32, %v4959_v14 }
 0x3a2   :  { %5650 = vmatprep.mubr.bf16.mxu1 %v4975_v10 }
 0x3a3   :  { %5651 = vmatmul.mubr.bf16.vlgmr.msra.gmra.mxu1 %v4974_v2 }
 0x3b3   :  { %v6417_v56 = vpop.f32.mrf.mxu0 }
 0x3b4   :  { %v6439_v30 = vpop.f32.mrf.mxu1 }
 0x3b5   :  { %v6418_v43 = vpop.f32.mrf.mxu0 }
 0x3b6   :  { %v6440_v8 = vpop.f32.mrf.mxu1  ;;  %v6419_v42 = vadd.f32 %v6418_v43, %v6417_v56 }
 0x3b7   :  { %v6420_v23 = vpop.f32.mrf.mxu0  ;;  %v6441_v16 = vadd.f32 %v6440_v8, %v6439_v30 }
 0x3b8   :  { %v6442_v48 = vpop.f32.mrf.mxu1  ;;  %v5530_v17 = vadd.f32 %v6419_v42, %v6336_v4 }
 0x3b9   :  { %v6421_v36 = vpop.f32.mrf.mxu0 }
 0x3ba   :  { %v6422_v50 = vadd.f32 %v6421_v36, %v6420_v23  ;;  %v6443_v51 = vpop.f32.mrf.mxu1  ;;  %v5571_v11 = vadd.f32 %v6441_v16, %v5530_v17 }
 0x3bb   :  { %v6444_v1 = vadd.f32 %v6443_v51, %v6442_v48 }
 0x3bc   :  { %v5533_v27 = vadd.f32 %v6422_v50, %v6336_v4 }
 0x3be   :  { %v5574_v37 = vadd.f32 %v6444_v1, %v5533_v27 }
 0x3e3   :  { %v6461_v29 = vpop.f32.mrf.mxu0 }
 0x3e5   :  { %v6462_v41 = vpop.f32.mrf.mxu0 }
 0x3e6   :  { %v6463_v18 = vadd.f32 %v6462_v41, %v6461_v29 }
 0x3e7   :  { %v6464_v6 = vpop.f32.mrf.mxu0 }
 0x3e8   :  { %v5612_v63 = vadd.f32 %v6463_v18, %v5571_v11 }
 0x3e9   :  { %v6465_v26 = vpop.f32.mrf.mxu0 }
 0x3ea   :  { %v6466_v35 = vadd.f32 %v6465_v26, %v6464_v6 }
 0x3ec   :  { %v5615_v22 = vadd.f32 %v6466_v35, %v5574_v37 }
 0x463   :  { %v6483_v60 = vpop.f32.mrf.mxu1 }
 0x465   :  { %v6484_v31 = vpop.f32.mrf.mxu1 }
 0x466   :  { %v6485_v34 = vadd.f32 %v6484_v31, %v6483_v60 }
 0x467   :  { %v6486_v24 = vpop.f32.mrf.mxu1 }
 0x468   :  { %v5653_v38 = vadd.f32 %v6485_v34, %v5612_v63 }
 0x469   :  { %v6487_v46 = vpop.f32.mrf.mxu1 }
 0x46a   :  { %v6488_v47 = vadd.f32 %v6487_v46, %v6486_v24  ;;  %v5664_v53 = vsel %vm5663_vm0, %v5653_v38, -inf  ;;  %5659 = vst [vmem:[%s8979_s7] sm:$0xff] %v5653_v38 }
 0x46b   :  { %5666 = vmax.xlane.f32.xlu0 %v5664_v53 }
 0x46c   :  { %v5656_v19 = vadd.f32 %v6488_v47, %v5615_v22 }
 0x46e   :  { %5660 = vst [vmem:[%s8979_s7 + $0x8] sm:$0xff] %v5656_v19  ;;  %v5665_v44 = vsel %vm5663_vm0, %v5656_v19, -inf }
 0x46f   :  { %5668 = vmax.xlane.f32.xlu0 %v5665_v44 }
 0x4f4   :  { %v5667_v25 = vpop.xlane.xlu0 %5666 }
 0x4f5   :  { %v5670_v0 = vsub.f32 %v5664_v53, %v5667_v25 }
 0x4f7   :  { %v5672_v15 = vmul.f32 1.442695, %v5670_v0 }
 0x4f8   :  { %v5669_v39 = vpop.xlane.xlu0 %5668 }
 0x4f9   :  { %6556 = vpow2.f32 %v5672_v15  ;;  %v5671_v55 = vsub.f32 %v5665_v44, %v5669_v39 }
 0x4fb   :  { %v5674_v40 = vmul.f32 1.442695, %v5671_v55 }
 0x4fd   :  { %6558 = vpow2.f32 %v5674_v40 }
 0x506   :  { %v6557_v57 = vpop.eup %6556 }
 0x507   :  { %5676 = vadd.xlane.f32.xlu1 %v6557_v57 }
 0x50a   :  { %v6559_v21 = vpop.eup %6558 }
 0x50b   :  { %5678 = vadd.xlane.f32.xlu1 %v6559_v21 }
 0x590   :  { %v5677_v5 = vpop.xlane.xlu1 %5676 }
 0x591   :  { %6560 = vrcp.f32 %v5677_v5 }
 0x594   :  { %v5679_v59 = vpop.xlane.xlu1 %5678 }
 0x595   :  { %6562 = vrcp.f32 %v5679_v59 }
 0x59e   :  { %v6561_v45 = vpop.eup %6560 }
 0x59f   :  { %v5681_v20 = vmul.f32 %v6561_v45, %v6557_v57 }
 0x5a1   :  { %5684 = vst [vmem:[%s8980_s8] sm:$0xff] %v5681_v20 }
 0x5a2   :  { %v6563_v28 = vpop.eup %6562 }
 0x5a3   :  { %v5683_v62 = vmul.f32 %v6563_v28, %v6559_v21 }
 0x5a5   :  { %5685 = vst [vmem:[%s8980_s8 + $0x8] sm:$0xff] %v5683_v62 }

</bundles_post_ra>
